<compile_context>
chip_gen: v7x
topology: tpu7x:2x2x1
jax: 0.10.0
libtpu: 0.0.40
codegen_flags: <defaults>
</compile_context>

<pallas_src>
import jax
import jax.numpy as jnp
from jax.experimental import pallas as pl
from jax.experimental.pallas import tpu as pltpu

GROUPS = 32                     # l
SUBCH = 8                       # i
KTAPS = 3                       # k  (channel-group taps)
JTAPS = 3                       # j  (column taps)
MOUT = 16                       # m
H = 14                          # spatial rows/cols
HP = 16                         # padded rows
WP = 16                         # padded cols
SPAD = HP * WP                  # 256 lanes  (multiple of 128 -> unmasked stores)
RPG = JTAPS * SUBCH             # 24 x_big rows per padded group
KRED = KTAPS * JTAPS * SUBCH    # 72 fused contraction size
NG = 8                          # groups per grid step
NSTEPS = GROUPS // NG           # 4 grid steps (>=2 keeps v7x's two TCs busy)


def _group_conv_kernel(x_ref, w_ref, o_ref):
    """Per grid step: 8 groups, each a single (16,72)x(72,256) MXU dot."""
    t = pl.program_id(0)
    base = t * (NG * RPG)
    for g in range(NG):                       # static unroll; back-to-back MXU pushes
        off = pl.multiple_of(base + g * RPG, 8)
        rhs = x_ref[pl.ds(off, KRED), :]      # (72, 256) contiguous sublane slice
        o_ref[g] = jnp.dot(
            w_ref[g], rhs,
            preferred_element_type=jnp.float32,
            precision=jax.lax.Precision.HIGHEST,
        )


def _pallas_group_conv(x_big, w_in):
    return pl.pallas_call(
        _group_conv_kernel,
        out_shape=jax.ShapeDtypeStruct((GROUPS, MOUT, SPAD), jnp.float32),
        grid=(NSTEPS,),
        in_specs=[
            # whole pre-gathered tap tensor stays resident in VMEM (~0.8 MiB);
            # constant index map -> fetched once per core.
            pl.BlockSpec(((GROUPS + 2) * RPG, SPAD), lambda t: (0, 0)),
            pl.BlockSpec((NG, MOUT, KRED), lambda t: (t, 0, 0)),
        ],
        out_specs=pl.BlockSpec((NG, MOUT, SPAD), lambda t: (t, 0, 0)),
        compiler_params=pltpu.CompilerParams(
            dimension_semantics=("parallel",),
        ),
    )(x_big, w_in)


@jax.jit
def _forward_impl(x, weights, shift_direction):
    # --- glue: sum, rolls, tap gather, pads (one/two XLA fusions, pure data movement) ---
    s2 = x.reshape(2, GROUPS, SUBCH, H, H).sum(axis=0)          # (32,8,14,14)
    # column roll (torch.roll dim=5 commutes past the first unfold) and
    # row roll (the final torch.roll dim=2 commutes all the way back since rows
    # are never mixed by the contraction) are both folded into the input here.
    s2 = jnp.roll(s2, shift_direction, axis=3)                  # columns
    s2 = jnp.roll(s2, shift_direction, axis=2)                  # rows (replaces output roll)

    # 3 column taps with zero boundary, laid out (group, j, subch, row, col)
    s2p = jnp.pad(s2, ((0, 0), (0, 0), (0, 0), (1, 1)))         # (32,8,14,16)
    taps = jnp.stack([s2p[..., j:j + H] for j in range(JTAPS)], axis=1)  # (32,3,8,14,14)
    # pad groups (zero group each side) and spatial to 16x16
    taps = jnp.pad(taps, ((1, 1), (0, 0), (0, 0), (0, HP - H), (0, WP - H)))  # (34,3,8,16,16)
    x_big = taps.reshape((GROUPS + 2) * RPG, SPAD)              # (816, 256)

    # weights (k,i,l,m,j) -> (l,m,k,j,i) -> (32,16,72)
    w_in = jnp.transpose(weights, (2, 3, 0, 4, 1)).reshape(GROUPS, MOUT, KRED)

    out = _pallas_group_conv(x_big, w_in)                       # (32,16,256)

    # --- glue: strip spatial padding (row roll already applied on the input side) ---
    out = out.reshape(GROUPS * MOUT, HP, WP)[:, :H, :H]         # (512,14,14)
    return out[None]                                            # (1,512,14,14)


def kernel_generated_2_forward(x, weights, shift_direction=1):
    return _forward_impl(x, weights, shift_direction)


def reference_forward(x, weights, shift_direction=1):
    """Pure-JAX reference that literally follows the torch op sequence."""
    t2 = x.reshape(1, 2, 256, 14, 14).sum(axis=1)                       # (1,256,14,14)
    t3 = t2.reshape(1, 1, 32, 1568)
    t3p = jnp.pad(t3, ((0, 0), (0, 0), (1, 1), (0, 0)))
    u1 = jnp.stack([t3p[:, 0, k:k + 32, :] for k in range(3)], axis=1)  # unfold (3,1), pad (1,0)
    u1 = u1.reshape(1, 3, 32, 8, 14, 14)
    u1 = jnp.roll(u1, shift_direction, axis=5)
    b = u1.reshape(1, 10752, 14, 1)
    bp = jnp.pad(b, ((0, 0), (0, 0), (1, 1), (0, 0)))
    u2 = jnp.stack([bp[:, :, k:k + 14, 0] for k in range(3)], axis=2)   # unfold (3,1), pad (1,0)
    u2 = u2.reshape(1, 3, 32, 8, 14, 3, 14)
    t4 = jnp.einsum('nklipjo,kilmj->nlmpo', u2, weights,
                    precision=jax.lax.Precision.HIGHEST)
    t5 = t4.reshape(1, 512, 14, 14)
    return jnp.roll(t5, shift_direction, axis=2)


if __name__ == "__main__":
    key = jax.random.PRNGKey(0)
    kx, kw = jax.random.split(key)
    # Shapes are dictated by the module's reshapes: x must have 1*2*256*14*14 elements.
    x = jax.random.normal(kx, (1, 512, 14, 14), dtype=jnp.float32)
    weights = jax.random.normal(kw, (3, 8, 32, 16, 3), dtype=jnp.float32)
    shift_direction = 1  # deterministic stand-in for (random.random() > 0.5) * 2 - 1

    y = kernel_generated_2_forward(x, weights, shift_direction)
    y = jax.block_until_ready(y)

    y_ref = reference_forward(x, weights, shift_direction)
    max_err = float(jnp.max(jnp.abs(y - y_ref)))
    assert y.shape == (1, 512, 14, 14), y.shape
    assert max_err < 1e-2, f"max abs error too large: {max_err}"
    print("KERNEL_OK")
</pallas_src>

<mosaic_0001>
module attributes {stable_mosaic.version = 11 : i64} {
  func.func @_group_conv_kernel(%arg0: i32, %arg1: memref<816x256xf32, #tpu.memory_space<vmem>>, %arg2: memref<8x16x72xf32, #tpu.memory_space<vmem>>, %arg3: memref<8x16x256xf32, #tpu.memory_space<vmem>>) attributes {dimension_semantics = [#tpu.dimension_semantics<parallel>], iteration_bounds = array<i64: 4>, scalar_prefetch = 0 : i64, scratch_operands = 0 : i64, tpu.core_type = #tpu.core_type<tc>, window_params = [{pipeline_mode = #tpu.pipeline_mode<synchronous>, transform_indices = @transform_0, window_bounds = array<i64: 816, 256>}, {transform_indices = @transform_1, window_bounds = array<i64: 8, 16, 72>}, {transform_indices = @transform_2, window_bounds = array<i64: 8, 16, 256>}]} {
    %c192_i32 = arith.constant 192 : i32
    %0 = arith.muli %arg0, %c192_i32 : i32
    %c0_i32 = arith.constant 0 : i32
    %1 = arith.addi %0, %c0_i32 : i32
    %2 = tpu.assume_multiple %1, 8 : i32
    %3 = arith.index_cast %2 : i32 to index
    %c0 = arith.constant 0 : index
    %4 = vector.load %arg1[%3, %c0] : memref<816x256xf32, #tpu.memory_space<vmem>>, vector<72x256xf32>
    %c0_0 = arith.constant 0 : index
    %c0_1 = arith.constant 0 : index
    %c0_2 = arith.constant 0 : index
    %5 = vector.load %arg2[%c0_0, %c0_1, %c0_2] : memref<8x16x72xf32, #tpu.memory_space<vmem>>, vector<1x16x72xf32>
    %6 = vector.shape_cast %5 : vector<1x16x72xf32> to vector<16x72xf32>
    %cst = arith.constant dense<0.000000e+00> : vector<16x256xf32>
    %7 = tpu.matmul %6, %4, %cst {dimension_numbers = #tpu.dot_dimension_numbers<[1], [0], [0], [1], [0, 0, 1, 1], [], []>, precision = #tpu.contract_precision<fp32>} : vector<16x72xf32>, vector<72x256xf32>, vector<16x256xf32> -> vector<16x256xf32>
    %c0_3 = arith.constant 0 : index
    %c0_4 = arith.constant 0 : index
    %c0_5 = arith.constant 0 : index
    %8 = vector.load %arg3[%c0_3, %c0_4, %c0_5] : memref<8x16x256xf32, #tpu.memory_space<vmem>>, vector<1x16x256xf32>
    %9 = vector.shape_cast %8 : vector<1x16x256xf32> to vector<16x256xf32>
    %10 = vector.shape_cast %7 : vector<16x256xf32> to vector<1x16x256xf32>
    tpu.vector_store %arg3[%c0_3, %c0_4, %c0_5], %10 {strides = array<i32>} : memref<8x16x256xf32, #tpu.memory_space<vmem>>, vector<1x16x256xf32>,
    %c24_i32 = arith.constant 24 : i32
    %11 = arith.addi %0, %c24_i32 : i32
    %12 = tpu.assume_multiple %11, 8 : i32
    %13 = arith.index_cast %12 : i32 to index
    %c0_6 = arith.constant 0 : index
    %14 = vector.load %arg1[%13, %c0_6] : memref<816x256xf32, #tpu.memory_space<vmem>>, vector<72x256xf32>
    %c1 = arith.constant 1 : index
    %c0_7 = arith.constant 0 : index
    %c0_8 = arith.constant 0 : index
    %15 = vector.load %arg2[%c1, %c0_7, %c0_8] : memref<8x16x72xf32, #tpu.memory_space<vmem>>, vector<1x16x72xf32>
    %16 = vector.shape_cast %15 : vector<1x16x72xf32> to vector<16x72xf32>
    %cst_9 = arith.constant dense<0.000000e+00> : vector<16x256xf32>
    %17 = tpu.matmul %16, %14, %cst_9 {dimension_numbers = #tpu.dot_dimension_numbers<[1], [0], [0], [1], [0, 0, 1, 1], [], []>, precision = #tpu.contract_precision<fp32>} : vector<16x72xf32>, vector<72x256xf32>, vector<16x256xf32> -> vector<16x256xf32>
    %c1_10 = arith.constant 1 : index
    %c0_11 = arith.constant 0 : index
    %c0_12 = arith.constant 0 : index
    %18 = vector.load %arg3[%c1_10, %c0_11, %c0_12] : memref<8x16x256xf32, #tpu.memory_space<vmem>>, vector<1x16x256xf32>
    %19 = vector.shape_cast %18 : vector<1x16x256xf32> to vector<16x256xf32>
    %20 = vector.shape_cast %17 : vector<16x256xf32> to vector<1x16x256xf32>
    tpu.vector_store %arg3[%c1_10, %c0_11, %c0_12], %20 {strides = array<i32>} : memref<8x16x256xf32, #tpu.memory_space<vmem>>, vector<1x16x256xf32>,
    %c48_i32 = arith.constant 48 : i32
    %21 = arith.addi %0, %c48_i32 : i32
    %22 = tpu.assume_multiple %21, 8 : i32
    %23 = arith.index_cast %22 : i32 to index
    %c0_13 = arith.constant 0 : index
    %24 = vector.load %arg1[%23, %c0_13] : memref<816x256xf32, #tpu.memory_space<vmem>>, vector<72x256xf32>
    %c2 = arith.constant 2 : index
    %c0_14 = arith.constant 0 : index
    %c0_15 = arith.constant 0 : index
    %25 = vector.load %arg2[%c2, %c0_14, %c0_15] : memref<8x16x72xf32, #tpu.memory_space<vmem>>, vector<1x16x72xf32>
    %26 = vector.shape_cast %25 : vector<1x16x72xf32> to vector<16x72xf32>
    %cst_16 = arith.constant dense<0.000000e+00> : vector<16x256xf32>
    %27 = tpu.matmul %26, %24, %cst_16 {dimension_numbers = #tpu.dot_dimension_numbers<[1], [0], [0], [1], [0, 0, 1, 1], [], []>, precision = #tpu.contract_precision<fp32>} : vector<16x72xf32>, vector<72x256xf32>, vector<16x256xf32> -> vector<16x256xf32>
    %c2_17 = arith.constant 2 : index
    %c0_18 = arith.constant 0 : index
    %c0_19 = arith.constant 0 : index
    %28 = vector.load %arg3[%c2_17, %c0_18, %c0_19] : memref<8x16x256xf32, #tpu.memory_space<vmem>>, vector<1x16x256xf32>
    %29 = vector.shape_cast %28 : vector<1x16x256xf32> to vector<16x256xf32>
    %30 = vector.shape_cast %27 : vector<16x256xf32> to vector<1x16x256xf32>
    tpu.vector_store %arg3[%c2_17, %c0_18, %c0_19], %30 {strides = array<i32>} : memref<8x16x256xf32, #tpu.memory_space<vmem>>, vector<1x16x256xf32>,
    %c72_i32 = arith.constant 72 : i32
    %31 = arith.addi %0, %c72_i32 : i32
    %32 = tpu.assume_multiple %31, 8 : i32
    %33 = arith.index_cast %32 : i32 to index
    %c0_20 = arith.constant 0 : index
    %34 = vector.load %arg1[%33, %c0_20] : memref<816x256xf32, #tpu.memory_space<vmem>>, vector<72x256xf32>
    %c3 = arith.constant 3 : index
    %c0_21 = arith.constant 0 : index
    %c0_22 = arith.constant 0 : index
    %35 = vector.load %arg2[%c3, %c0_21, %c0_22] : memref<8x16x72xf32, #tpu.memory_space<vmem>>, vector<1x16x72xf32>
    %36 = vector.shape_cast %35 : vector<1x16x72xf32> to vector<16x72xf32>
    %cst_23 = arith.constant dense<0.000000e+00> : vector<16x256xf32>
    %37 = tpu.matmul %36, %34, %cst_23 {dimension_numbers = #tpu.dot_dimension_numbers<[1], [0], [0], [1], [0, 0, 1, 1], [], []>, precision = #tpu.contract_precision<fp32>} : vector<16x72xf32>, vector<72x256xf32>, vector<16x256xf32> -> vector<16x256xf32>
    %c3_24 = arith.constant 3 : index
    %c0_25 = arith.constant 0 : index
    %c0_26 = arith.constant 0 : index
    %38 = vector.load %arg3[%c3_24, %c0_25, %c0_26] : memref<8x16x256xf32, #tpu.memory_space<vmem>>, vector<1x16x256xf32>
    %39 = vector.shape_cast %38 : vector<1x16x256xf32> to vector<16x256xf32>
    %40 = vector.shape_cast %37 : vector<16x256xf32> to vector<1x16x256xf32>
    tpu.vector_store %arg3[%c3_24, %c0_25, %c0_26], %40 {strides = array<i32>} : memref<8x16x256xf32, #tpu.memory_space<vmem>>, vector<1x16x256xf32>,
    %c96_i32 = arith.constant 96 : i32
    %41 = arith.addi %0, %c96_i32 : i32
    %42 = tpu.assume_multiple %41, 8 : i32
    %43 = arith.index_cast %42 : i32 to index
    %c0_27 = arith.constant 0 : index
    %44 = vector.load %arg1[%43, %c0_27] : memref<816x256xf32, #tpu.memory_space<vmem>>, vector<72x256xf32>
    %c4 = arith.constant 4 : index
    %c0_28 = arith.constant 0 : index
    %c0_29 = arith.constant 0 : index
    %45 = vector.load %arg2[%c4, %c0_28, %c0_29] : memref<8x16x72xf32, #tpu.memory_space<vmem>>, vector<1x16x72xf32>
    %46 = vector.shape_cast %45 : vector<1x16x72xf32> to vector<16x72xf32>
    %cst_30 = arith.constant dense<0.000000e+00> : vector<16x256xf32>
    %47 = tpu.matmul %46, %44, %cst_30 {dimension_numbers = #tpu.dot_dimension_numbers<[1], [0], [0], [1], [0, 0, 1, 1], [], []>, precision = #tpu.contract_precision<fp32>} : vector<16x72xf32>, vector<72x256xf32>, vector<16x256xf32> -> vector<16x256xf32>
    %c4_31 = arith.constant 4 : index
    %c0_32 = arith.constant 0 : index
    %c0_33 = arith.constant 0 : index
    %48 = vector.load %arg3[%c4_31, %c0_32, %c0_33] : memref<8x16x256xf32, #tpu.memory_space<vmem>>, vector<1x16x256xf32>
    %49 = vector.shape_cast %48 : vector<1x16x256xf32> to vector<16x256xf32>
    %50 = vector.shape_cast %47 : vector<16x256xf32> to vector<1x16x256xf32>
    tpu.vector_store %arg3[%c4_31, %c0_32, %c0_33], %50 {strides = array<i32>} : memref<8x16x256xf32, #tpu.memory_space<vmem>>, vector<1x16x256xf32>,
    %c120_i32 = arith.constant 120 : i32
    %51 = arith.addi %0, %c120_i32 : i32
    %52 = tpu.assume_multiple %51, 8 : i32
    %53 = arith.index_cast %52 : i32 to index
    %c0_34 = arith.constant 0 : index
    %54 = vector.load %arg1[%53, %c0_34] : memref<816x256xf32, #tpu.memory_space<vmem>>, vector<72x256xf32>
    %c5 = arith.constant 5 : index
    %c0_35 = arith.constant 0 : index
    %c0_36 = arith.constant 0 : index
    %55 = vector.load %arg2[%c5, %c0_35, %c0_36] : memref<8x16x72xf32, #tpu.memory_space<vmem>>, vector<1x16x72xf32>
    %56 = vector.shape_cast %55 : vector<1x16x72xf32> to vector<16x72xf32>
    %cst_37 = arith.constant dense<0.000000e+00> : vector<16x256xf32>
    %57 = tpu.matmul %56, %54, %cst_37 {dimension_numbers = #tpu.dot_dimension_numbers<[1], [0], [0], [1], [0, 0, 1, 1], [], []>, precision = #tpu.contract_precision<fp32>} : vector<16x72xf32>, vector<72x256xf32>, vector<16x256xf32> -> vector<16x256xf32>
    %c5_38 = arith.constant 5 : index
    %c0_39 = arith.constant 0 : index
    %c0_40 = arith.constant 0 : index
    %58 = vector.load %arg3[%c5_38, %c0_39, %c0_40] : memref<8x16x256xf32, #tpu.memory_space<vmem>>, vector<1x16x256xf32>
    %59 = vector.shape_cast %58 : vector<1x16x256xf32> to vector<16x256xf32>
    %60 = vector.shape_cast %57 : vector<16x256xf32> to vector<1x16x256xf32>
    tpu.vector_store %arg3[%c5_38, %c0_39, %c0_40], %60 {strides = array<i32>} : memref<8x16x256xf32, #tpu.memory_space<vmem>>, vector<1x16x256xf32>,
    %c144_i32 = arith.constant 144 : i32
    %61 = arith.addi %0, %c144_i32 : i32
    %62 = tpu.assume_multiple %61, 8 : i32
    %63 = arith.index_cast %62 : i32 to index
    %c0_41 = arith.constant 0 : index
    %64 = vector.load %arg1[%63, %c0_41] : memref<816x256xf32, #tpu.memory_space<vmem>>, vector<72x256xf32>
    %c6 = arith.constant 6 : index
    %c0_42 = arith.constant 0 : index
    %c0_43 = arith.constant 0 : index
    %65 = vector.load %arg2[%c6, %c0_42, %c0_43] : memref<8x16x72xf32, #tpu.memory_space<vmem>>, vector<1x16x72xf32>
    %66 = vector.shape_cast %65 : vector<1x16x72xf32> to vector<16x72xf32>
    %cst_44 = arith.constant dense<0.000000e+00> : vector<16x256xf32>
    %67 = tpu.matmul %66, %64, %cst_44 {dimension_numbers = #tpu.dot_dimension_numbers<[1], [0], [0], [1], [0, 0, 1, 1], [], []>, precision = #tpu.contract_precision<fp32>} : vector<16x72xf32>, vector<72x256xf32>, vector<16x256xf32> -> vector<16x256xf32>
    %c6_45 = arith.constant 6 : index
    %c0_46 = arith.constant 0 : index
    %c0_47 = arith.constant 0 : index
    %68 = vector.load %arg3[%c6_45, %c0_46, %c0_47] : memref<8x16x256xf32, #tpu.memory_space<vmem>>, vector<1x16x256xf32>
    %69 = vector.shape_cast %68 : vector<1x16x256xf32> to vector<16x256xf32>
    %70 = vector.shape_cast %67 : vector<16x256xf32> to vector<1x16x256xf32>
    tpu.vector_store %arg3[%c6_45, %c0_46, %c0_47], %70 {strides = array<i32>} : memref<8x16x256xf32, #tpu.memory_space<vmem>>, vector<1x16x256xf32>,
    %c168_i32 = arith.constant 168 : i32
    %71 = arith.addi %0, %c168_i32 : i32
    %72 = tpu.assume_multiple %71, 8 : i32
    %73 = arith.index_cast %72 : i32 to index
    %c0_48 = arith.constant 0 : index
    %74 = vector.load %arg1[%73, %c0_48] : memref<816x256xf32, #tpu.memory_space<vmem>>, vector<72x256xf32>
    %c7 = arith.constant 7 : index
    %c0_49 = arith.constant 0 : index
    %c0_50 = arith.constant 0 : index
    %75 = vector.load %arg2[%c7, %c0_49, %c0_50] : memref<8x16x72xf32, #tpu.memory_space<vmem>>, vector<1x16x72xf32>
    %76 = vector.shape_cast %75 : vector<1x16x72xf32> to vector<16x72xf32>
    %cst_51 = arith.constant dense<0.000000e+00> : vector<16x256xf32>
    %77 = tpu.matmul %76, %74, %cst_51 {dimension_numbers = #tpu.dot_dimension_numbers<[1], [0], [0], [1], [0, 0, 1, 1], [], []>, precision = #tpu.contract_precision<fp32>} : vector<16x72xf32>, vector<72x256xf32>, vector<16x256xf32> -> vector<16x256xf32>
    %c7_52 = arith.constant 7 : index
    %c0_53 = arith.constant 0 : index
    %c0_54 = arith.constant 0 : index
    %78 = vector.load %arg3[%c7_52, %c0_53, %c0_54] : memref<8x16x256xf32, #tpu.memory_space<vmem>>, vector<1x16x256xf32>
    %79 = vector.shape_cast %78 : vector<1x16x256xf32> to vector<16x256xf32>
    %80 = vector.shape_cast %77 : vector<16x256xf32> to vector<1x16x256xf32>
    tpu.vector_store %arg3[%c7_52, %c0_53, %c0_54], %80 {strides = array<i32>} : memref<8x16x256xf32, #tpu.memory_space<vmem>>, vector<1x16x256xf32>,
    return
  }
  func.func @transform_0(%arg0: i32) -> (i32, i32) {
    %c0_i32 = arith.constant 0 : i32
    %c0_i32_0 = arith.constant 0 : i32
    %c0_i32_1 = arith.constant 0 : i32
    return %c0_i32, %c0_i32_0 : i32, i32
  }
  func.func @transform_1(%arg0: i32) -> (i32, i32, i32) {
    %c0_i32 = arith.constant 0 : i32
    %c0_i32_0 = arith.constant 0 : i32
    %c0_i32_1 = arith.constant 0 : i32
    return %arg0, %c0_i32, %c0_i32_0 : i32, i32, i32
  }
  func.func @transform_2(%arg0: i32) -> (i32, i32, i32) {
    %c0_i32 = arith.constant 0 : i32
    %c0_i32_0 = arith.constant 0 : i32
    %c0_i32_1 = arith.constant 0 : i32
    return %arg0, %c0_i32, %c0_i32_0 : i32, i32, i32
  }
}

</mosaic_0001>

<bundles_post_ra>
// kernel: _forward_impl.1
= control target key start
LH: loop header
LB: loop body
LE: loop exit
PB: predicated region body
PF: predicated region fallthrough
CT: control target
= control target key end

     0   :  { %s7347_s9 = smov 0   ;;  %s9890_s0 = inlined_call_operand.vmem [shape: f32[816,256], index: 0, kind: input, shape index: {}]   ;;  %s9891_s1 = inlined_call_operand.vmem [shape: f32[32,16,72], index: 1, kind: input, shape index: {}]   ;;  %s9892_s2 = inlined_call_operand.vmem [shape: f32[32,16,256], index: 2, kind: output, shape index: {}]  }
   0x1 LB: > { %s6305_s10 = sadd.s32 4294967295, %s7329_s9   ;;  %p6309_p0 = scmp.ge.s32.totalorder %s7329_s9, 1  ;;  %s7329_s9 = sphi %s7347_s9, %s12_s9  }
   0x2   : > { %p114_p1 = scmp.lt.s32.totalorder %s7329_s9, 5 }
   0x4   : > { %p115_p2 = pnand %p6309_p0, %p114_p1 }
   0x6   : > { %118 = sbr.rel (%p115_p2) target bundleno = 719 (0x2cf), region = 28 }
   0xd   : > { %s7355_s11 = smul.u32 192, %s6305_s10  ;;  %v9893_v0 = vmov 0.0   ;;  %s7374_s23 = sshll.u32 %s6305_s10, 3  ;;  %vm178_vm0 = vcmask 588800  }
   0xe   : > { %267 = vmatprep.mubr.f32.mxu0 %v9893_v0  ;;  %1026 = vmatprep.mubr.f32.mxu1 %v9893_v0  ;;  %p139_p3 = scmp.lt.s32.totalorder %s7374_s23, 31 }
   0xf   : > { %s153_s12 = sshra.s32 %s7355_s11, 3  ;;  %s911_s13 = sadd.s32 24, %s7355_s11 }
  0x10   : > { %s6378_s14 = sshll.u32 %s153_s12, 4  ;;  %s912_s15 = sshra.s32 %s911_s13, 3 }
  0x11   : > { %s7364_s18 = scalar_lea.vmem %s9890_s0, %s6378_s14  ;;  %s6379_s19 = sshll.u32 %s912_s15, 4 }
  0x12   : > { %v159_v1 = vld [vmem:[%s7364_s18 + $0x8] sm:$0xff]  ;;  %v161_v2 = vld [vmem:[%s7364_s18 + $0x18] sm:$0xff]  ;;  %v158_v3 = vld [vmem:[%s7364_s18] sm:$0xff]  ;;  %s7372_s22 = scalar_lea.vmem %s9890_s0, %s6379_s19  ;;  %s10792_s23 = smov (!%p139_p3, %s7374_s23), 31 }
  0x13   : > { %v185_v4 = vand.u32 4294901760, %v159_v1  ;;  %v189_v5 = vand.u32 4294901760, %v161_v2  ;;  %v160_v6 = vld [vmem:[%s7364_s18 + $0x10] sm:$0xff]  ;;  %v187_v7 = vand.u32 4294901760, %v158_v3  ;;  %v918_v8 = vld [vmem:[%s7372_s22 + $0x8] sm:$0xff]  ;;  %v920_v9 = vld [vmem:[%s7372_s22 + $0x18] sm:$0xff] }
  0x14   : > { %v191_v10 = vand.u32 4294901760, %v160_v6  ;;  %v944_v11 = vand.u32 4294901760, %v918_v8  ;;  %v948_v12 = vand.u32 4294901760, %v920_v9  ;;  %v917_v13 = vld [vmem:[%s7372_s22] sm:$0xff]  ;;  %v919_v14 = vld [vmem:[%s7372_s22 + $0x10] sm:$0xff]  ;;  %v163_v15 = vld [vmem:[%s7364_s18 + $0x28] sm:$0xff] }
  0x15   : > { %v7382_v16 = vpack.c.bf16 %v189_v5, %v185_v4  ;;  %v7384_v17 = vsub.f32 %v159_v1, %v185_v4  ;;  %v7386_v18 = vsub.f32 %v161_v2, %v189_v5  ;;  %v7388_v19 = vsub.f32 %v158_v3, %v187_v7  ;;  %v165_v20 = vld [vmem:[%s7364_s18 + $0x38] sm:$0xff]  ;;  %v162_v21 = vld [vmem:[%s7364_s18 + $0x20] sm:$0xff]  ;;  %v164_v22 = vld [vmem:[%s7364_s18 + $0x30] sm:$0xff]  ;;  %s6376_s24 = sshll.u32 %s10792_s23, 4  ;;  %s1671_s28 = sadd.s32 48, %s7355_s11 }
  0x16   : > { %v7393_v23 = vpack.c.bf16 %v191_v10, %v187_v7  ;;  %v7395_v24 = vsub.f32 %v160_v6, %v191_v10  ;;  %v7397_v25 = vpack.c.bf16 %v948_v12, %v944_v11  ;;  %v7399_v26 = vsub.f32 %v918_v8, %v944_v11  ;;  %v922_v27 = vld [vmem:[%s7372_s22 + $0x28] sm:$0xff]  ;;  %v924_v32 = vld [vmem:[%s7372_s22 + $0x38] sm:$0xff]  ;;  %v921_v37 = vld [vmem:[%s7372_s22 + $0x20] sm:$0xff]  ;;  %s7508_s27 = scalar_lea.vmem %s9891_s1, %s6376_s24  ;;  %s2431_s29 = sadd.s32 72, %s7355_s11 }
  0x17   : > { %6387 = vmatprep.subr.bf16.mxu0 %v7382_v16  ;;  %v7403_v28 = vsub.f32 %v920_v9, %v948_v12  ;;  %v946_v29 = vand.u32 4294901760, %v917_v13  ;;  %v950_v30 = vand.u32 4294901760, %v919_v14  ;;  %v193_v31 = vand.u32 4294901760, %v163_v15  ;;  %v923_v38 = vld [vmem:[%s7372_s22 + $0x30] sm:$0xff]  ;;  %v167_v43 = vld [vmem:[%s7364_s18 + $0x48] sm:$0xff]  ;;  %v169_v44 = vld [vmem:[%s7364_s18 + $0x58] sm:$0xff] }
  0x18   : > { %6389 = vmatpush1.bf16.msra.mxu0 %v7393_v23  ;;  %6483 = vmatprep.subr.bf16.mxu1 %v7397_v25  ;;  %v197_v33 = vand.u32 4294901760, %v165_v20  ;;  %v195_v34 = vand.u32 4294901760, %v162_v21  ;;  %v199_v35 = vand.u32 4294901760, %v164_v22  ;;  %v952_v36 = vand.u32 4294901760, %v922_v27  ;;  %v166_v45 = vld [vmem:[%s7364_s18 + $0x40] sm:$0xff]  ;;  %v168_v50 = vld [vmem:[%s7364_s18 + $0x50] sm:$0xff] }
  0x19   : > { %v7411_v39 = vpack.c.bf16 %v950_v30, %v946_v29  ;;  %v7413_v40 = vsub.f32 %v917_v13, %v946_v29  ;;  %v7415_v41 = vsub.f32 %v919_v14, %v950_v30  ;;  %v7417_v42 = vsub.f32 %v163_v15, %v193_v31  ;;  %v926_v59 = vld [vmem:[%s7372_s22 + $0x48] sm:$0xff]  ;;  %v928_v60 = vld [vmem:[%s7372_s22 + $0x58] sm:$0xff]  ;;  %v925_v2 = vld [vmem:[%s7372_s22 + $0x40] sm:$0xff]  ;;  %s1672_s30 = sshra.s32 %s1671_s28, 3  ;;  %s2432_s3 = sshra.s32 %s2431_s29, 3 }
  0x1a   : > { %v7422_v46 = vpack.c.bf16 %v197_v33, %v193_v31  ;;  %v7424_v47 = vsub.f32 %v165_v20, %v197_v33  ;;  %v7426_v48 = vpack.c.bf16 %v199_v35, %v195_v34  ;;  %v7428_v49 = vsub.f32 %v162_v21, %v195_v34  ;;  %v927_v3 = vld [vmem:[%s7372_s22 + $0x50] sm:$0xff]  ;;  %v171_v4 = vld [vmem:[%s7364_s18 + $0x68] sm:$0xff]  ;;  %v173_v9 = vld [vmem:[%s7364_s18 + $0x78] sm:$0xff]  ;;  %s6380_s4 = sshll.u32 %s1672_s30, 4  ;;  %s6381_s5 = sshll.u32 %s2432_s3, 4 }
  0x1b   : > { %10203 = vst [vmem:[#allocation2_spill] sm:$0xff] %v7411_v39  ;;  %6485 = vmatpush1.bf16.msra.mxu1 %v7411_v39  ;;  %v7432_v51 = vsub.f32 %v164_v22, %v199_v35  ;;  %v956_v52 = vand.u32 4294901760, %v924_v32  ;;  %v7434_v53 = vsub.f32 %v922_v27, %v952_v36  ;;  %v954_v54 = vand.u32 4294901760, %v921_v37  ;;  %v170_v10 = vld [vmem:[%s7364_s18 + $0x60] sm:$0xff]  ;;  %v172_v11 = vld [vmem:[%s7364_s18 + $0x70] sm:$0xff]  ;;  %v930_v33 = vld [vmem:[%s7372_s22 + $0x68] sm:$0xff]  ;;  %s7915_s8 = scalar_lea.vmem %s9890_s0, %s6380_s4  ;;  %s7922_s13 = scalar_lea.vmem %s9890_s0, %s6381_s5 }
  0x1c   : > { %10204 = vst [vmem:[#allocation3_spill] sm:$0xff] %v7422_v46  ;;  %10205 = vst [vmem:[#allocation4_spill] sm:$0xff] %v7426_v48  ;;  %6391 = vmatprep.subr.bf16.mxu0 %v7422_v46  ;;  %v958_v55 = vand.u32 4294901760, %v923_v38  ;;  %v201_v56 = vand.u32 4294901760, %v167_v43  ;;  %v205_v57 = vand.u32 4294901760, %v169_v44  ;;  %v203_v58 = vand.u32 4294901760, %v166_v45 }
  0x1d   : > { %6393 = vmatpush1.bf16.msra.mxu0 %v7426_v48  ;;  %v7445_v61 = vpack.c.bf16 %v956_v52, %v952_v36  ;;  %v7447_v62 = vsub.f32 %v924_v32, %v956_v52  ;;  %v7449_v63 = vsub.f32 %v921_v37, %v954_v54  ;;  %v207_v1 = vand.u32 4294901760, %v168_v50  ;;  %s3191_s14 = sadd.s32 96, %s7355_s11  ;;  %s3951_s15 = sadd.s32 120, %s7355_s11 }
  0x1e   : > { %v7454_v5 = vpack.c.bf16 %v958_v55, %v954_v54  ;;  %v7456_v6 = vsub.f32 %v923_v38, %v958_v55  ;;  %v7458_v7 = vpack.c.bf16 %v205_v57, %v201_v56  ;;  %v7460_v8 = vsub.f32 %v167_v43, %v201_v56  ;;  %v932_v38 = vld [vmem:[%s7372_s22 + $0x78] sm:$0xff]  ;;  %v929_v43 = vld [vmem:[%s7372_s22 + $0x60] sm:$0xff]  ;;  %v7499_v55 = vld [vmem:[%s7364_s18 + $0x88] sm:$0xff]  ;;  %s3192_s16 = sshra.s32 %s3191_s14, 3  ;;  %s3952_s17 = sshra.s32 %s3951_s15, 3 }
  0x1f   : > { %10206 = vst [vmem:[#allocation5_spill] sm:$0xff] %v7445_v61  ;;  %6487 = vmatprep.subr.bf16.mxu1 %v7445_v61  ;;  %v7466_v12 = vsub.f32 %v169_v44, %v205_v57  ;;  %v7468_v13 = vpack.c.bf16 %v207_v1, %v203_v58  ;;  %v7470_v14 = vsub.f32 %v166_v45, %v203_v58  ;;  %v960_v20 = vand.u32 4294901760, %v926_v59  ;;  %v931_v44 = vld [vmem:[%s7372_s22 + $0x70] sm:$0xff]  ;;  %v174_v56 = vld [vmem:[%s7364_s18 + $0x80] sm:$0xff]  ;;  %v7503_v57 = vld [vmem:[%s7372_s22 + $0x88] sm:$0xff]  ;;  %s6382_s18 = sshll.u32 %s3192_s16, 4 }
  0x20   : > { %10207 = vst [vmem:[#allocation6_spill] sm:$0xff] %v7454_v5  ;;  %10208 = vst [vmem:[#allocation7_spill] sm:$0xff] %v7458_v7  ;;  %v7472_v15 = vsub.f32 %v168_v50, %v207_v1  ;;  %6489 = vmatpush1.bf16.msra.mxu1 %v7454_v5  ;;  %6395 = vmatprep.subr.bf16.mxu0 %v7458_v7  ;;  %v964_v21 = vand.u32 4294901760, %v928_v60  ;;  %v962_v22 = vand.u32 4294901760, %v925_v2  ;;  %v966_v27 = vand.u32 4294901760, %v927_v3  ;;  %s6383_s19 = sshll.u32 %s3952_s17, 4 }
  0x21   : > { %10209 = vst [vmem:[#allocation8_spill] sm:$0xff] %v7468_v13  ;;  %6397 = vmatpush1.bf16.msra.mxu0 %v7468_v13  ;;  %v209_v29 = vand.u32 4294901760, %v171_v4  ;;  %v213_v30 = vand.u32 4294901760, %v173_v9  ;;  %v211_v31 = vand.u32 4294901760, %v170_v10  ;;  %v215_v32 = vand.u32 4294901760, %v172_v11  ;;  %s8521_s26 = scalar_lea.vmem %s9890_s0, %s6383_s19  ;;  %s4711_s28 = sadd.s32 144, %s7355_s11 }
  0x22   : > { %v7479_v34 = vpack.c.bf16 %v964_v21, %v960_v20  ;;  %v7481_v35 = vsub.f32 %v926_v59, %v960_v20  ;;  %v7483_v36 = vsub.f32 %v928_v60, %v964_v21  ;;  %v7485_v37 = vpack.c.bf16 %v966_v27, %v962_v22  ;;  %s4712_s29 = sshra.s32 %s4711_s28, 3  ;;  %s5471_s30 = sadd.s32 168, %s7355_s11 }
  0x23   : > { %v7490_v45 = vsub.f32 %v925_v2, %v962_v22  ;;  %v7492_v50 = vsub.f32 %v927_v3, %v966_v27  ;;  %v7494_v52 = vpack.c.bf16 %v213_v30, %v209_v29  ;;  %v7496_v54 = vsub.f32 %v171_v4, %v209_v29  ;;  %v933_v22 = vld [vmem:[%s7372_s22 + $0x80] sm:$0xff]  ;;  %s8509_s22 = scalar_lea.vmem %s9890_s0, %s6382_s18  ;;  %s6384_s3 = sshll.u32 %s4712_s29, 4 }
  0x24   : > { %10210 = vst [vmem:[#allocation9_spill] sm:$0xff] %v7479_v34  ;;  %10211 = vst [vmem:[#allocation10_spill] sm:$0xff] %v7485_v37  ;;  %6491 = vmatprep.subr.bf16.mxu1 %v7479_v34  ;;  %v7511_v58 = vsub.f32 %v173_v9, %v213_v30  ;;  %v7513_v59 = vpack.c.bf16 %v215_v32, %v211_v31  ;;  %v7515_v60 = vsub.f32 %v170_v10, %v211_v31  ;;  %v176_v27 = vld [vmem:[%s7508_s27] sm:$0xff]  ;;  %s5472_s4 = sshra.s32 %s5471_s30, 3  ;;  %s9116_s6 = scalar_lea.vmem %s9890_s0, %s6384_s3 }
  0x25   : > { %10212 = vst [vmem:[#allocation11_spill] sm:$0xff] %v7494_v52  ;;  %v7517_v1 = vsub.f32 %v172_v11, %v215_v32  ;;  %6493 = vmatpush1.bf16.msra.mxu1 %v7485_v37  ;;  %6399 = vmatprep.subr.bf16.mxu0 %v7494_v52  ;;  %v968_v2 = vand.u32 4294901760, %v930_v33  ;;  %v972_v3 = vand.u32 4294901760, %v932_v38  ;;  %v970_v4 = vand.u32 4294901760, %v929_v43  ;;  %s6385_s7 = sshll.u32 %s5472_s4, 4 }
  0x26   : > { %10213 = vst [vmem:[#allocation12_spill] sm:$0xff] %v7513_v59  ;;  %v974_v20 = vand.u32 4294901760, %v931_v44  ;;  %6401 = vmatpush1.bf16.msra.mxu0 %v7513_v59  ;;  %v7523_v9 = vand.u32 4294901760, %v7499_v55  ;;  %v7525_v21 = vand.u32 4294901760, %v174_v56  ;;  %v7528_v10 = vand.u32 4294901760, %v7503_v57  ;;  %s9138_s12 = scalar_lea.vmem %s9890_s0, %s6385_s7 }
  0x27   : > { %v9901_v11 = vand.u32 4294901760, %v7384_v17  ;;  %v7533_v29 = vpack.c.bf16 %v972_v3, %v968_v2  ;;  %v7535_v30 = vsub.f32 %v930_v33, %v968_v2  ;;  %v7537_v31 = vsub.f32 %v932_v38, %v972_v3  ;;  %v6320_v2 = vld [vmem:[%s7508_s27 + $0x10] sm:$0xff] }
  0x28   : > { %10214 = vst [vmem:[#allocation13_spill] sm:$0xff] %v7523_v9  ;;  %10215 = vst [vmem:[#allocation14_spill] sm:$0xff] %v7525_v21  ;;  %v7539_v32 = vpack.c.bf16 %v974_v20, %v970_v4  ;;  %v7541_v0 = vsub.f32 %v929_v43, %v970_v4  ;;  %v7543_v59 = vsub.f32 %v931_v44, %v974_v20  ;;  %218 = vmatprep.subr.mxu0 %v7523_v9 }
  0x29   : > { %10216 = vst [vmem:[#allocation15_spill] sm:$0xff] %v7528_v10  ;;  %10217 = vst [vmem:[#allocation16_spill] sm:$0xff] %v7533_v29  ;;  %v7547_v37 = vsub.f32 %v174_v56, %v7525_v21  ;;  %v293_v52 = vsub.f32 %v7384_v17, %v9901_v11  ;;  %6495 = vmatprep.subr.bf16.mxu1 %v7533_v29  ;;  %v9908_v33 = vand.u32 4294901760, %v7386_v18  ;;  %v7554_v38 = vand.u32 4294901760, %v933_v22 }
  0x2a   : > { %10218 = vst [vmem:[#allocation17_spill] sm:$0xff] %v7539_v32  ;;  %v180_v43 = vsel %vm178_vm0, %v176_v27, 0  ;;  %v9913_v44 = vand.u32 4294901760, %v7388_v19  ;;  %6497 = vmatpush1.bf16.msra.mxu1 %v7539_v32  ;;  %220 = vmatpush1.msra.mxu0 %v7525_v21  ;;  %v9918_v4 = vand.u32 4294901760, %v7395_v24  ;;  %v10220_v29 = vand.u32 4294901760, %v7399_v26 }
  0x2b   : > { %10219 = vst [vmem:[#allocation18_spill] sm:$0xff] %v7554_v38  ;;  %v294_v56 = vand.u32 4294901760, %v293_v52  ;;  %v7561_v3 = vand.u32 4294901760, %v180_v43  ;;  %977 = vmatprep.subr.mxu1 %v7528_v10  ;;  %v305_v27 = vsub.f32 %v7386_v18, %v9908_v33  ;;  %v7570_v11 = vsub.f32 %v933_v22, %v7554_v38 }
  0x2c   : > { %v299_v21 = vsub.f32 %v7388_v19, %v9913_v44  ;;  %v9923_v52 = vand.u32 4294901760, %v7403_v28  ;;  %v311_v20 = vsub.f32 %v7395_v24, %v9918_v4  ;;  %v1052_v33 = vsub.f32 %v7399_v26, %v10220_v29 }
  0x2d   : > { %v7577_v32 = vsub.f32 %v180_v43, %v7561_v3  ;;  %v939_v22 = vsel %vm178_vm0, %v6320_v2, 0  ;;  %v306_v13 = vand.u32 4294901760, %v305_v27  ;;  %v9933_v48 = vand.u32 4294901760, %v7413_v40 }
  0x2e   : > { %v300_v34 = vand.u32 4294901760, %v299_v21  ;;  %v1064_v44 = vsub.f32 %v7403_v28, %v9923_v52  ;;  %v7589_v5 = vand.u32 4294901760, %v939_v22  ;;  %979 = vmatpush1.msra.mxu1 %v7554_v38  ;;  %v312_v7 = vand.u32 4294901760, %v311_v20 }
  0x2f   : > { %v9928_v43 = vand.u32 4294901760, %v7577_v32  ;;  %v1053_v4 = vand.u32 4294901760, %v1052_v33  ;;  %v6402_v61 = vpack.c.bf16 %v306_v13, %v294_v56  ;;  %v9930_v21 = vand.u32 4294901760, %v7415_v41 }
  0x30   : > { %v1065_v29 = vand.u32 4294901760, %v1064_v44  ;;  %v7595_v2 = vsub.f32 %v939_v22, %v7589_v5  ;;  %v6404_v52 = vpack.c.bf16 %v312_v7, %v300_v34  ;;  %v1058_v38 = vsub.f32 %v7413_v40, %v9933_v48 }
  0x31   : > { %v271_v27 = vsub.f32 %v7577_v32, %v9928_v43  ;;  %v9929_v33 = vand.u32 4294901760, %v7417_v42  ;;  %6403 = vmatprep.subr.bf16.mxu0 %v6402_v61  ;;  %v1070_v44 = vsub.f32 %v7415_v41, %v9930_v21  ;;  %v9932_v56 = vand.u32 4294901760, %v7424_v47 }
  0x32   : > { %10221 = vst [vmem:[#allocation19_spill] sm:$0xff] %v7595_v2  ;;  %v6498_v20 = vpack.c.bf16 %v1065_v29, %v1053_v4  ;;  %v9931_v13 = vand.u32 4294901760, %v7595_v2  ;;  %v1059_v46 = vand.u32 4294901760, %v1058_v38  ;;  %v9934_v34 = vand.u32 4294901760, %v7428_v49 }
  0x33   : > { %v272_v22 = vand.u32 4294901760, %v271_v27  ;;  %v317_v7 = vsub.f32 %v7417_v42, %v9929_v33  ;;  %v1071_v4 = vand.u32 4294901760, %v1070_v44  ;;  %v329_v29 = vsub.f32 %v7424_v47, %v9932_v56 }
  0x34   : > { %6499 = vmatprep.subr.bf16.mxu1 %v6498_v20  ;;  %v1030_v61 = vsub.f32 %v7595_v2, %v9931_v13  ;;  %v9935_v43 = vand.u32 4294901760, %v7432_v51  ;;  %v323_v27 = vsub.f32 %v7428_v49, %v9934_v34  ;;  %v9936_v33 = vand.u32 4294901760, %v7434_v53 }
  0x35   : > { %273 = vmatmul.mubr.f32.vlgmr.msra.gmra.mrb[0].mxu0 %v272_v22  ;;  %v318_v38 = vand.u32 4294901760, %v317_v7  ;;  %v9939_v20 = vand.u32 4294901760, %v7447_v62  ;;  %v6500_v13 = vpack.c.bf16 %v1071_v4, %v1059_v46  ;;  %v330_v44 = vand.u32 4294901760, %v329_v29 }
  0x36   : > { %6405 = vmatpush1.bf16.msra.mxu0 %v6404_v52  ;;  %v1031_v21 = vand.u32 4294901760, %v1030_v61  ;;  %v335_v56 = vsub.f32 %v7432_v51, %v9935_v43  ;;  %v10222_v48 = vmov 0.0   ;;  %v324_v22 = vand.u32 4294901760, %v323_v27 }
  0x37   : > { %278 = vmatprep.mubr.f32.mxu0 %v10222_v48  ;;  %v1076_v7 = vsub.f32 %v7434_v53, %v9936_v33  ;;  %v1088_v34 = vsub.f32 %v7447_v62, %v9939_v20  ;;  %v9944_v52 = vand.u32 4294901760, %v7449_v63  ;;  %v6406_v46 = vpack.c.bf16 %v330_v44, %v318_v38 }
  0x38   : > { %1032 = vmatmul.mubr.f32.vlgmr.msra.gmra.mrb[0].mxu1 %v1031_v21  ;;  %v336_v61 = vand.u32 4294901760, %v335_v56  ;;  %v9940_v4 = vand.u32 4294901760, %v7456_v6  ;;  %v9941_v29 = vand.u32 4294901760, %v7460_v8  ;;  %v9942_v39 = vand.u32 4294901760, %v7466_v12 }
  0x39   : > { %6501 = vmatpush1.bf16.msra.mxu1 %v6500_v13  ;;  %v1077_v43 = vand.u32 4294901760, %v1076_v7  ;;  %v1089_v27 = vand.u32 4294901760, %v1088_v34  ;;  %v1082_v33 = vsub.f32 %v7449_v63, %v9944_v52  ;;  %1037 = vmatprep.mubr.f32.mxu1 %v10222_v48  ;;  %v9943_v56 = vand.u32 4294901760, %v7470_v14 }
  0x3a   : > { %6407 = vmatprep.subr.bf16.mxu0 %v6406_v46  ;;  %v6408_v20 = vpack.c.bf16 %v336_v61, %v324_v22  ;;  %v1094_v21 = vsub.f32 %v7456_v6, %v9940_v4  ;;  %v341_v13 = vsub.f32 %v7460_v8, %v9941_v29  ;;  %v353_v44 = vsub.f32 %v7466_v12, %v9942_v39 }
  0x3b   : > { %v6502_v34 = vpack.c.bf16 %v1089_v27, %v1077_v43  ;;  %v1083_v38 = vand.u32 4294901760, %v1082_v33  ;;  %v9945_v7 = vand.u32 4294901760, %v7472_v15  ;;  %v347_v61 = vsub.f32 %v7470_v14, %v9943_v56 }
  0x3c   : > { %6409 = vmatpush1.bf16.msra.mxu0 %v6408_v20  ;;  %v1095_v22 = vand.u32 4294901760, %v1094_v21  ;;  %v342_v46 = vand.u32 4294901760, %v341_v13  ;;  %v9947_v4 = vand.u32 4294901760, %v7481_v35  ;;  %v354_v29 = vand.u32 4294901760, %v353_v44 }
  0x3d   : > { %6503 = vmatprep.subr.bf16.mxu1 %v6502_v34  ;;  %v359_v43 = vsub.f32 %v7472_v15, %v9945_v7  ;;  %v9946_v33 = vand.u32 4294901760, %v7483_v36  ;;  %v9949_v27 = vand.u32 4294901760, %v7490_v45  ;;  %v348_v20 = vand.u32 4294901760, %v347_v61 }
  0x3e   : > { %v6504_v39 = vpack.c.bf16 %v1095_v22, %v1083_v38  ;;  %v1100_v21 = vsub.f32 %v7481_v35, %v9947_v4  ;;  %v9948_v13 = vand.u32 4294901760, %v7492_v50  ;;  %v6410_v56 = vpack.c.bf16 %v354_v29, %v342_v46 }
  0x3f   : > { %v360_v52 = vand.u32 4294901760, %v359_v43  ;;  %v1112_v34 = vsub.f32 %v7483_v36, %v9946_v33  ;;  %v1106_v44 = vsub.f32 %v7490_v45, %v9949_v27  ;;  %v9950_v22 = vand.u32 4294901760, %v7496_v54 }
  0x40   : > { %6505 = vmatpush1.bf16.msra.mxu1 %v6504_v39  ;;  %v1101_v7 = vand.u32 4294901760, %v1100_v21  ;;  %v1118_v38 = vsub.f32 %v7492_v50, %v9948_v13  ;;  %v9951_v29 = vand.u32 4294901760, %v7511_v58  ;;  %6411 = vmatprep.subr.bf16.mxu0 %v6410_v56  ;;  %v9954_v33 = vand.u32 4294901760, %v7515_v60 }
  0x41   : > { %v6412_v46 = vpack.c.bf16 %v360_v52, %v348_v20  ;;  %v1113_v61 = vand.u32 4294901760, %v1112_v34  ;;  %v1107_v43 = vand.u32 4294901760, %v1106_v44  ;;  %v365_v39 = vsub.f32 %v7496_v54, %v9950_v22  ;;  %v177_v34 = vld [vmem:[%s7508_s27 + $0x8] sm:$0xff] }
  0x42   : > { %v1119_v4 = vand.u32 4294901760, %v1118_v38  ;;  %v377_v21 = vsub.f32 %v7511_v58, %v9951_v29  ;;  %v9956_v13 = vand.u32 4294901760, %v7517_v1  ;;  %v371_v52 = vsub.f32 %v7515_v60, %v9954_v33  ;;  %v6321_v33 = vld [vmem:[%s7508_s27 + $0x18] sm:$0xff] }
  0x43   : > { %6413 = vmatpush1.bf16.msra.mxu0 %v6412_v46  ;;  %v6506_v27 = vpack.c.bf16 %v1113_v61, %v1101_v7  ;;  %v9955_v56 = vand.u32 4294901760, %v7535_v30  ;;  %v9957_v20 = vand.u32 4294901760, %v7537_v31  ;;  %v366_v38 = vand.u32 4294901760, %v365_v39 }
  0x44   : > { %v6508_v44 = vpack.c.bf16 %v1119_v4, %v1107_v43  ;;  %v378_v22 = vand.u32 4294901760, %v377_v21  ;;  %v383_v29 = vsub.f32 %v7517_v1, %v9956_v13  ;;  %v372_v2 = vand.u32 4294901760, %v371_v52 }
  0x45   : > { %6507 = vmatprep.subr.bf16.mxu1 %v6506_v27  ;;  %v1124_v7 = vsub.f32 %v7535_v30, %v9955_v56  ;;  %v1136_v46 = vsub.f32 %v7537_v31, %v9957_v20  ;;  %v9962_v61 = vand.u32 4294901760, %v7541_v0  ;;  %v9958_v39 = vand.u32 4294901760, %v7543_v59 }
  0x46   : > { %6509 = vmatpush1.bf16.msra.mxu1 %v6508_v44  ;;  %v6414_v4 = vpack.c.bf16 %v378_v22, %v366_v38  ;;  %v384_v43 = vand.u32 4294901760, %v383_v29  ;;  %v183_v21 = vsel %vm178_vm0, %v177_v34, 0  ;;  %v7716_v22 = vsub.f32 %v7499_v55, %v7523_v9 }
  0x47   : > { %v1125_v27 = vand.u32 4294901760, %v1124_v7  ;;  %v1137_v52 = vand.u32 4294901760, %v1136_v46  ;;  %v1130_v56 = vsub.f32 %v7541_v0, %v9962_v61  ;;  %v7709_v13 = vand.u32 4294901760, %v183_v21 }
  0x48   : > { %6415 = vmatprep.subr.bf16.mxu0 %v6414_v4  ;;  %v6416_v20 = vpack.c.bf16 %v384_v43, %v372_v2  ;;  %v1142_v44 = vsub.f32 %v7543_v59, %v9958_v39  ;;  %v942_v29 = vsel %vm178_vm0, %v6321_v33, 0  ;;  %v9960_v2 = vand.u32 4294901760, %v7716_v22 }
  0x49   : > { %v6510_v34 = vpack.c.bf16 %v1137_v52, %v1125_v27  ;;  %v1131_v38 = vand.u32 4294901760, %v1130_v56  ;;  %v7720_v7 = vsub.f32 %v183_v21, %v7709_v13  ;;  %v7722_v46 = vand.u32 4294901760, %v942_v29 }
  0x4a   : > { %6417 = vmatpush1.bf16.msra.mxu0 %v6416_v20  ;;  %v1143_v4 = vand.u32 4294901760, %v1142_v44  ;;  %v9959_v43 = vand.u32 4294901760, %v7547_v37  ;;  %v7728_v39 = vsub.f32 %v7503_v57, %v7528_v10  ;;  %v9965_v56 = vand.u32 4294901760, %v7570_v11 }
  0x4b   : > { %6511 = vmatprep.subr.bf16.mxu1 %v6510_v34  ;;  %v9961_v55 = vand.u32 4294901760, %v7720_v7  ;;  %v7732_v33 = vsub.f32 %v942_v29, %v7722_v46  ;;  %v389_v20 = vsub.f32 %v7716_v22, %v9960_v2  ;;  %v6418_v61 = vpack.c.bf16 %v7386_v18, %v7384_v17 }
  0x4c   : > { %v6512_v21 = vpack.c.bf16 %v1143_v4, %v1131_v38  ;;  %v395_v27 = vsub.f32 %v7547_v37, %v9959_v43  ;;  %v9966_v57 = vand.u32 4294901760, %v7728_v39  ;;  %v1154_v29 = vsub.f32 %v7570_v11, %v9965_v56 }
  0x4d   : > { %10223 = vst [vmem:[#allocation20_spill] sm:$0xff] %v7732_v33  ;;  %v282_v52 = vsub.f32 %v7720_v7, %v9961_v55  ;;  %v9967_v44 = vand.u32 4294901760, %v7732_v33  ;;  %v390_v34 = vand.u32 4294901760, %v389_v20  ;;  %v6514_v20 = vpack.c.bf16 %v7403_v28, %v7399_v26 }
  0x4e   : > { %6513 = vmatpush1.bf16.msra.mxu1 %v6512_v21  ;;  %v396_v38 = vand.u32 4294901760, %v395_v27  ;;  %v1148_v4 = vsub.f32 %v7728_v39, %v9966_v57  ;;  %v1155_v10 = vand.u32 4294901760, %v1154_v29  ;;  %v6420_v21 = vpack.c.bf16 %v7395_v24, %v7388_v19 }
  0x4f   : > { %v283_v43 = vand.u32 4294901760, %v282_v52  ;;  %v1041_v2 = vsub.f32 %v7732_v33, %v9967_v44  ;;  %391 = vmatprep.subr.mxu0 %v390_v34  ;;  %v6516_v27 = vpack.c.bf16 %v7415_v41, %v7413_v40  ;;  %v6422_v52 = vpack.c.bf16 %v7424_v47, %v7417_v42 }
  0x50   : > { %v1149_v55 = vand.u32 4294901760, %v1148_v4  ;;  %397 = vmatpush1.msra.mxu0 %v396_v38  ;;  %v10224_v29 = vand.u32 4294901760, %v7384_v17  ;;  %v10225_v34 = vand.u32 4294901760, %v7386_v18  ;;  %v10227_v4 = vand.u32 4294901760, %v7395_v24 }
  0x51   : > { %284 = vmatmul.mubr.f32.gmra.mrb[2].mxu0 %v283_v43  ;;  %v1042_v56 = vand.u32 4294901760, %v1041_v2  ;;  %v6424_v2 = vpack.c.bf16 %v7432_v51, %v7428_v49  ;;  %v6518_v43 = vpack.c.bf16 %v7447_v62, %v7434_v53  ;;  %6419 = vmatprep.subr.bf16.mxu0 %v6418_v61  ;;  %v10228_v44 = vand.u32 4294901760, %v7399_v26 }
  0x52   : > { %1150 = vmatprep.subr.mxu1 %v1149_v55  ;;  %444 = vmatprep.mubr.f32.mxu0 %v10222_v48  ;;  %v6426_v55 = vpack.c.bf16 %v7466_v12, %v7460_v8  ;;  %v7776_v38 = vpack.c.bf16 %v10225_v34, %v10224_v29  ;;  %v10229_v9 = vand.u32 4294901760, %v7403_v28  ;;  %v10230_v17 = vand.u32 4294901760, %v7413_v40 }
  0x53   : > { %1043 = vmatmul.mubr.f32.gmra.mrb[2].mxu1 %v1042_v56  ;;  %v10226_v56 = vand.u32 4294901760, %v7388_v19  ;;  %v10231_v18 = vand.u32 4294901760, %v7415_v41  ;;  %v10232_v19 = vand.u32 4294901760, %v7417_v42  ;;  %v10233_v24 = vand.u32 4294901760, %v7424_v47 }
  0x54   : > { %1156 = vmatpush1.msra.mxu1 %v1155_v10  ;;  %v7788_v33 = vpack.c.bf16 %v10229_v9, %v10228_v44  ;;  %1203 = vmatprep.mubr.f32.mxu1 %v10222_v48  ;;  %v10234_v26 = vand.u32 4294901760, %v7428_v49  ;;  %v10235_v28 = vand.u32 4294901760, %v7432_v51  ;;  %v10236_v40 = vand.u32 4294901760, %v7434_v53 }
  0x55   : > { %v7782_v57 = vpack.c.bf16 %v10227_v4, %v10226_v56  ;;  %446 = vmatmul.mubr.f32.vlgmr.msra.gmra.mrb[0].mxu0 %v7561_v3  ;;  %v7796_v10 = vpack.c.bf16 %v10231_v18, %v10230_v17  ;;  %v7802_v61 = vpack.c.bf16 %v10233_v24, %v10232_v19  ;;  %6515 = vmatprep.subr.bf16.mxu1 %v6514_v20  ;;  %v10237_v41 = vand.u32 4294901760, %v7447_v62 }
  0x56   : > { %v7808_v9 = vpack.c.bf16 %v10235_v28, %v10234_v26  ;;  %6421 = vmatpush1.bf16.msra.mxu0 %v6420_v21  ;;  %v10238_v42 = vand.u32 4294901760, %v7449_v63  ;;  %v10239_v47 = vand.u32 4294901760, %v7456_v6  ;;  %v10240_v49 = vand.u32 4294901760, %v7460_v8  ;;  %451 = vmatprep.mubr.f32.mxu0 %v10222_v48 }
  0x57   : > { %v7814_v44 = vpack.c.bf16 %v10237_v41, %v10236_v40  ;;  %v10241_v51 = vand.u32 4294901760, %v7466_v12  ;;  %1205 = vmatmul.mubr.f32.vlgmr.msra.gmra.mrb[0].mxu1 %v7589_v5  ;;  %6423 = vmatprep.subr.bf16.mxu0 %v6422_v52  ;;  %v10242_v53 = vand.u32 4294901760, %v7470_v14  ;;  %v10243_v62 = vand.u32 4294901760, %v7472_v15  ;;  %v10261_v41 = vld [vmem:[#allocation8_spill] sm:$0xff] }
  0x58   : > { %v7820_v29 = vpack.c.bf16 %v10239_v47, %v10238_v42  ;;  %v10244_v20 = vand.u32 4294901760, %v7481_v35  ;;  %v10245_v56 = vand.u32 4294901760, %v7483_v36  ;;  %v10246_v8 = vand.u32 4294901760, %v7490_v45  ;;  %6517 = vmatpush1.bf16.msra.mxu1 %v6516_v27  ;;  %1210 = vmatprep.mubr.f32.mxu1 %v10222_v48  ;;  %v10262_v42 = vld [vmem:[#allocation11_spill] sm:$0xff]  ;;  %v10263_v47 = vld [vmem:[#allocation10_spill] sm:$0xff] }
  0x59   : > { %v7826_v34 = vpack.c.bf16 %v10241_v51, %v10240_v49  ;;  %v7833_v21 = vpack.c.bf16 %v10243_v62, %v10242_v53  ;;  %v10247_v12 = vand.u32 4294901760, %v7492_v50  ;;  %v6520_v52 = vpack.c.bf16 %v7456_v6, %v7449_v63  ;;  %6519 = vmatprep.subr.bf16.mxu1 %v6518_v43  ;;  %453 = vmatmul.mubr.f32.gmra.mrb[2].mxu0 %v7709_v13  ;;  %v10264_v49 = vld [vmem:[#allocation16_spill] sm:$0xff]  ;;  %v10266_v53 = vld [vmem:[#allocation13_spill] sm:$0xff] }
  0x5a   : > { %v7839_v4 = vpack.c.bf16 %v10245_v56, %v10244_v20  ;;  %v10248_v18 = vand.u32 4294901760, %v7496_v54  ;;  %v10249_v19 = vand.u32 4294901760, %v7511_v58  ;;  %v10250_v26 = vand.u32 4294901760, %v7515_v60  ;;  %6425 = vmatpush1.bf16.msra.mxu0 %v6424_v2  ;;  %559 = vmatprep.mubr.f32.mxu0 %v10222_v48  ;;  %v10259_v2 = vld [vmem:[#allocation9_spill] sm:$0xff]  ;;  %v10265_v51 = vld [vmem:[#allocation12_spill] sm:$0xff]  ;;  %v10268_v20 = vld [vmem:[#allocation15_spill] sm:$0xff] }
  0x5b   : > { %v7845_v17 = vpack.c.bf16 %v10247_v12, %v10246_v8  ;;  %v10251_v28 = vand.u32 4294901760, %v7517_v1  ;;  %v6522_v27 = vpack.c.bf16 %v7483_v36, %v7481_v35  ;;  %v6428_v63 = vpack.c.bf16 %v7472_v15, %v7470_v14  ;;  %6427 = vmatprep.subr.bf16.mxu0 %v6426_v55  ;;  %1212 = vmatmul.mubr.f32.gmra.mrb[2].mxu1 %v7722_v46  ;;  %v10252_v36 = vld [vmem:[#allocation19_spill] sm:$0xff]  ;;  %v10260_v55 = vld [vmem:[#allocation20_spill] sm:$0xff]  ;;  %v10267_v62 = vld [vmem:[#allocation17_spill] sm:$0xff] }
  0x5c   : > { %v7854_v24 = vpack.c.bf16 %v10249_v19, %v10248_v18  ;;  %v6430_v6 = vpack.c.bf16 %v7511_v58, %v7496_v54  ;;  %6521 = vmatpush1.bf16.msra.mxu1 %v6520_v52  ;;  %v6524_v43 = vpack.c.bf16 %v7492_v50, %v7490_v45  ;;  %v6526_v35 = vpack.c.bf16 %v7537_v31, %v7535_v30  ;;  %v10253_v45 = vld [vmem:[#allocation2_spill] sm:$0xff]  ;;  %v10254_v50 = vld [vmem:[#allocation3_spill] sm:$0xff]  ;;  %v10255_v54 = vld [vmem:[#allocation5_spill] sm:$0xff] }
  0x5d   : > { %v7860_v40 = vpack.c.bf16 %v10251_v28, %v10250_v26  ;;  %6523 = vmatprep.subr.bf16.mxu1 %v6522_v27  ;;  %1318 = vmatprep.mubr.f32.mxu1 %v10222_v48  ;;  %v6432_v14 = vpack.c.bf16 %v7517_v1, %v7515_v60  ;;  %v6528_v15 = vpack.c.bf16 %v7543_v59, %v7541_v0  ;;  %v10256_v58 = vld [vmem:[#allocation4_spill] sm:$0xff]  ;;  %v10257_v60 = vld [vmem:[#allocation7_spill] sm:$0xff]  ;;  %v10258_v1 = vld [vmem:[#allocation6_spill] sm:$0xff]  ;;  %v10270_v8 = vand.u32 4294901760, %v7577_v32 }
  0x5e   : > { %6429 = vmatpush1.bf16.msra.mxu0 %v6428_v63  ;;  %v10269_v56 = vld [vmem:[#allocation14_spill] sm:$0xff]  ;;  %v1678_v12 = vld [vmem:[%s7915_s8 + $0x8] sm:$0xff]  ;;  %v1680_v52 = vld [vmem:[%s7915_s8 + $0x18] sm:$0xff]  ;;  %v10272_v28 = vand.u32 4294901760, %v10252_v36 }
  0x5f   : > { %6431 = vmatprep.subr.bf16.mxu0 %v6430_v6  ;;  %v10271_v18 = vld [vmem:[#allocation18_spill] sm:$0xff]  ;;  %v1679_v26 = vld [vmem:[%s7915_s8 + $0x10] sm:$0xff]  ;;  %v2438_v27 = vld [vmem:[%s7922_s13 + $0x8] sm:$0xff]  ;;  %v1708_v63 = vand.u32 4294901760, %v1680_v52 }
  0x60   : > { %6525 = vmatpush1.bf16.msra.mxu1 %v6524_v43  ;;  %v1677_v19 = vld [vmem:[%s7915_s8] sm:$0xff]  ;;  %v2439_v43 = vld [vmem:[%s7922_s13 + $0x10] sm:$0xff] }
  0x61   : > { %6527 = vmatprep.subr.bf16.mxu1 %v6526_v35  ;;  %v2437_v6 = vld [vmem:[%s7922_s13] sm:$0xff]  ;;  %v2464_v35 = vand.u32 4294901760, %v2438_v27 }
  0x62   : > { %6433 = vmatpush1.bf16.msra.mxu0 %v6432_v14  ;;  %v1684_v14 = vld [vmem:[%s7915_s8 + $0x38] sm:$0xff] }
  0x63   : > { %509 = vmatprep.subr.mxu0 %v7716_v22 }
  0x64   : > { %6529 = vmatpush1.bf16.msra.mxu1 %v6528_v15  ;;  %v10274_v15 = vand.u32 4294901760, %v7537_v31 }
  0x65   : > { %1268 = vmatprep.subr.mxu1 %v7728_v39 }
  0x66   : > { %512 = vmatpush1.msra.mxu0 %v7547_v37 }
  0x67   : > { %6435 = vmatprep.subr.bf16.mxu0 %v7382_v16  ;;  %562 = vmatmul.mubr.f32.vlgmr.msra.gmra.mrb[0].mxu0 %v7577_v32  ;;  %v1704_v32 = vand.u32 4294901760, %v1678_v12 }
  0x68   : > { %1271 = vmatpush1.msra.mxu1 %v7570_v11  ;;  %6437 = vmatpush1.bf16.msra.mxu0 %v7393_v23 }
  0x69   : > { %6531 = vmatprep.subr.bf16.mxu1 %v7397_v25  ;;  %1321 = vmatmul.mubr.f32.vlgmr.msra.gmra.mrb[0].mxu1 %v10252_v36  ;;  %v7965_v31 = vsub.f32 %v1678_v12, %v1704_v32  ;;  %v2441_v12 = vld [vmem:[%s7922_s13 + $0x20] sm:$0xff] }
  0x6a   : > { %6533 = vmatpush1.bf16.msra.mxu1 %v10253_v45  ;;  %6439 = vmatprep.subr.bf16.mxu0 %v10254_v50 }
  0x6b   : > { %6535 = vmatprep.subr.bf16.mxu1 %v10255_v54  ;;  %567 = vmatprep.mubr.f32.mxu0 %v10222_v48  ;;  %10279 = vst [vmem:[#allocation2_spill] sm:$0xff] %v7965_v31 }
  0x6c   : > { %6441 = vmatpush1.bf16.msra.mxu0 %v10256_v58  ;;  %1326 = vmatprep.mubr.f32.mxu1 %v10222_v48 }
  0x6d   : > { %6443 = vmatprep.subr.bf16.mxu0 %v10257_v60  ;;  %570 = vmatmul.mubr.f32.gmra.mrb[2].mxu0 %v7720_v7 }
  0x6e   : > { %6537 = vmatpush1.bf16.msra.mxu1 %v10258_v1  ;;  %658 = vmatprep.mubr.f32.mxu0 %v10222_v48 }
  0x6f   : > { %6539 = vmatprep.subr.bf16.mxu1 %v10259_v2  ;;  %1329 = vmatmul.mubr.f32.gmra.mrb[2].mxu1 %v10260_v55 }
  0x70   : > { %6445 = vmatpush1.bf16.msra.mxu0 %v10261_v41  ;;  %1417 = vmatprep.mubr.f32.mxu1 %v10222_v48 }
  0x71   : > { %6447 = vmatprep.subr.bf16.mxu0 %v10262_v42 }
  0x72   : > { %6541 = vmatpush1.bf16.msra.mxu1 %v10263_v47 }
  0x73   : > { %6543 = vmatprep.subr.bf16.mxu1 %v10264_v49 }
  0x74   : > { %6449 = vmatpush1.bf16.msra.mxu0 %v10265_v51 }
  0x75   : > { %609 = vmatprep.subr.mxu0 %v10266_v53  ;;  %v1685_v53 = vld [vmem:[%s7915_s8 + $0x40] sm:$0xff] }
  0x76   : > { %6545 = vmatpush1.bf16.msra.mxu1 %v10267_v62  ;;  %v1683_v62 = vld [vmem:[%s7915_s8 + $0x30] sm:$0xff] }
  0x77   : > { %1368 = vmatprep.subr.mxu1 %v10268_v20  ;;  %v1681_v20 = vld [vmem:[%s7915_s8 + $0x20] sm:$0xff] }
  0x78   : > { %611 = vmatpush1.msra.mxu0 %v10269_v56  ;;  %v2466_v56 = vand.u32 4294901760, %v2437_v6 }
  0x79   : > { %6451 = vmatprep.subr.bf16.mxu0 %v7776_v38  ;;  %662 = vmatmul.mubr.f32.vlgmr.msra.gmra.mrb[0].mxu0 %v10270_v8  ;;  %v2440_v38 = vld [vmem:[%s7922_s13 + $0x18] sm:$0xff]  ;;  %v10275_v8 = vand.u32 4294901760, %v7541_v0  ;;  %v7967_v0 = vsub.f32 %v1680_v52, %v1708_v63 }
  0x7a   : > { %1370 = vmatpush1.msra.mxu1 %v10271_v18  ;;  %6453 = vmatpush1.bf16.msra.mxu0 %v7782_v57  ;;  %v1710_v57 = vand.u32 4294901760, %v1679_v26  ;;  %v10277_v18 = vand.u32 4294901760, %v7720_v7  ;;  %v10281_v7 = vand.u32 4294901760, %v10260_v55  ;;  %v1714_v55 = vand.u32 4294901760, %v1681_v20 }
  0x7b   : > { %6547 = vmatprep.subr.bf16.mxu1 %v7788_v33  ;;  %1421 = vmatmul.mubr.f32.vlgmr.msra.gmra.mrb[0].mxu1 %v10272_v28  ;;  %v1706_v33 = vand.u32 4294901760, %v1677_v19  ;;  %v10276_v28 = vand.u32 4294901760, %v7543_v59  ;;  %10280 = vst [vmem:[#allocation3_spill] sm:$0xff] %v7967_v0  ;;  %v2470_v59 = vand.u32 4294901760, %v2439_v43 }
  0x7c   : > { %6549 = vmatpush1.bf16.msra.mxu1 %v7796_v10  ;;  %6455 = vmatprep.subr.bf16.mxu0 %v7802_v61  ;;  %v2468_v10 = vand.u32 4294901760, %v2440_v38  ;;  %v1682_v61 = vld [vmem:[%s7915_s8 + $0x28] sm:$0xff]  ;;  %v7982_v52 = vsub.f32 %v1679_v26, %v1710_v57 }
  0x7d   : > { %6551 = vmatprep.subr.bf16.mxu1 %v7814_v44  ;;  %667 = vmatprep.mubr.f32.mxu0 %v10222_v48  ;;  %v10273_v44 = vand.u32 4294901760, %v7535_v30  ;;  %v7963_v30 = vpack.c.bf16 %v1708_v63, %v1704_v32  ;;  %v2443_v32 = vld [vmem:[%s7922_s13 + $0x30] sm:$0xff]  ;;  %v1718_v63 = vand.u32 4294901760, %v1683_v62  ;;  %v7994_v26 = vpack.c.bf16 %v2470_v59, %v2466_v56 }
  0x7e   : > { %6457 = vmatpush1.bf16.msra.mxu0 %v7808_v9  ;;  %1426 = vmatprep.mubr.f32.mxu1 %v10222_v48  ;;  %v6560_v9 = vpack.c.bf16 %v10276_v28, %v10275_v8  ;;  %v1716_v8 = vand.u32 4294901760, %v1684_v14  ;;  %10284 = vst [vmem:[#allocation7_spill] sm:$0xff] %v7982_v52 }
  0x7f   : > { %6459 = vmatprep.subr.bf16.mxu0 %v7826_v34  ;;  %v6558_v36 = vpack.c.bf16 %v10274_v15, %v10273_v44  ;;  %671 = vmatmul.mubr.f32.gmra.mrb[2].mxu0 %v10277_v18  ;;  %10278 = vst [vmem:[#allocation19_spill] sm:$0xff] %v7963_v30  ;;  %v2442_v34 = vld [vmem:[%s7922_s13 + $0x28] sm:$0xff]  ;;  %v2444_v44 = vld [vmem:[%s7922_s13 + $0x38] sm:$0xff]  ;;  %v7974_v18 = vpack.c.bf16 %v1710_v57, %v1706_v33  ;;  %10288 = vst [vmem:[#allocation8_spill] sm:$0xff] %v7994_v26  ;;  %v2478_v30 = vand.u32 4294901760, %v2443_v32 }
  0x80   : > { %6553 = vmatpush1.bf16.msra.mxu1 %v7820_v29  ;;  %795 = vmatprep.mubr.f32.mxu0 %v10222_v48  ;;  %v7976_v15 = vsub.f32 %v1677_v19, %v1706_v33  ;;  %v1712_v29 = vand.u32 4294901760, %v1682_v61  ;;  %v7987_v19 = vsub.f32 %v2438_v27, %v2464_v35  ;;  %v7989_v33 = vsub.f32 %v2440_v38, %v2468_v10 }
  0x81   : > { %6555 = vmatprep.subr.bf16.mxu1 %v7839_v4  ;;  %1430 = vmatmul.mubr.f32.gmra.mrb[2].mxu1 %v10281_v7  ;;  %10282 = vst [vmem:[#allocation5_spill] sm:$0xff] %v7974_v18  ;;  %v7984_v4 = vpack.c.bf16 %v2468_v10, %v2464_v35  ;;  %v2472_v28 = vand.u32 4294901760, %v2442_v34  ;;  %v2476_v7 = vand.u32 4294901760, %v2444_v44  ;;  %v1686_v18 = vld [vmem:[%s7915_s8 + $0x48] sm:$0xff]  ;;  %v7996_v57 = vsub.f32 %v2437_v6, %v2466_v56 }
  0x82   : > { %10283 = vst [vmem:[#allocation4_spill] sm:$0xff] %v7976_v15  ;;  %6461 = vmatpush1.bf16.msra.mxu0 %v7833_v21  ;;  %1554 = vmatprep.mubr.f32.mxu1 %v10222_v48  ;;  %10286 = vst [vmem:[#allocation9_spill] sm:$0xff] %v7987_v19  ;;  %v1688_v21 = vld [vmem:[%s7915_s8 + $0x58] sm:$0xff]  ;;  %v8000_v27 = vsub.f32 %v2439_v43, %v2470_v59  ;;  %v8002_v38 = vpack.c.bf16 %v1716_v8, %v1712_v29  ;;  %v1720_v10 = vand.u32 4294901760, %v1686_v18 }
  0x83   : > { %10285 = vst [vmem:[#allocation6_spill] sm:$0xff] %v7984_v4  ;;  %6463 = vmatprep.subr.bf16.mxu0 %v7854_v24  ;;  %10287 = vst [vmem:[#allocation20_spill] sm:$0xff] %v7989_v33  ;;  %v2474_v4 = vand.u32 4294901760, %v2441_v12  ;;  %v1687_v24 = vld [vmem:[%s7915_s8 + $0x50] sm:$0xff]  ;;  %v8004_v35 = vsub.f32 %v1682_v61, %v1712_v29  ;;  %v8009_v56 = vpack.c.bf16 %v1718_v63, %v1714_v55  ;;  %v1724_v26 = vand.u32 4294901760, %v1688_v21  ;;  %v2445_v29 = vld [vmem:[%s7922_s13 + $0x40] sm:$0xff] }
  0x84   : > { %6557 = vmatpush1.bf16.msra.mxu1 %v7845_v17  ;;  %10289 = vst [vmem:[#allocation11_spill] sm:$0xff] %v7996_v57  ;;  %10290 = vst [vmem:[#allocation10_spill] sm:$0xff] %v8002_v38  ;;  %v8006_v17 = vsub.f32 %v1684_v14, %v1716_v8  ;;  %v8011_v6 = vsub.f32 %v1681_v20, %v1714_v55  ;;  %v2446_v57 = vld [vmem:[%s7922_s13 + $0x48] sm:$0xff]  ;;  %v10294_v43 = vand.u32 4294901760, %v7716_v22  ;;  %v1722_v14 = vand.u32 4294901760, %v1685_v53  ;;  %v2447_v8 = vld [vmem:[%s7922_s13 + $0x50] sm:$0xff] }
  0x85   : > { %6559 = vmatprep.subr.bf16.mxu1 %v6558_v36  ;;  %10292 = vst [vmem:[#allocation12_spill] sm:$0xff] %v8009_v56  ;;  %v2448_v36 = vld [vmem:[%s7922_s13 + $0x58] sm:$0xff]  ;;  %v8017_v59 = vsub.f32 %v1683_v62, %v1718_v63  ;;  %v8019_v61 = vpack.c.bf16 %v2476_v7, %v2472_v28  ;;  %v8023_v20 = vsub.f32 %v2442_v34, %v2472_v28  ;;  %v10300_v62 = vand.u32 4294901760, %v7728_v39  ;;  %v6328_v28 = vld [vmem:[%s7508_s27 + $0x20] sm:$0xff] }
  0x86   : > { %10291 = vst [vmem:[#allocation16_spill] sm:$0xff] %v8006_v17  ;;  %6465 = vmatpush1.bf16.msra.mxu0 %v7860_v40  ;;  %10293 = vst [vmem:[#allocation21_spill] sm:$0xff] %v8011_v6  ;;  %v1726_v40 = vand.u32 4294901760, %v1687_v24  ;;  %v8025_v55 = vsub.f32 %v2444_v44, %v2476_v7  ;;  %v8027_v56 = vpack.c.bf16 %v2478_v30, %v2474_v4  ;;  %v2484_v38 = vand.u32 4294901760, %v2448_v36  ;;  %v1692_v34 = vld [vmem:[%s7915_s8 + $0x78] sm:$0xff] }
  0x87   : > { %744 = vmatprep.subr.mxu0 %v10294_v43  ;;  %10295 = vst [vmem:[#allocation22_spill] sm:$0xff] %v8017_v59  ;;  %10296 = vst [vmem:[#allocation23_spill] sm:$0xff] %v8019_v61  ;;  %v8029_v22 = vsub.f32 %v2441_v12, %v2474_v4  ;;  %v8033_v63 = vsub.f32 %v2443_v32, %v2478_v30  ;;  %v8035_v43 = vsub.f32 %v1686_v18, %v1720_v10  ;;  %v1691_v30 = vld [vmem:[%s7915_s8 + $0x70] sm:$0xff] }
  0x88   : > { %6561 = vmatpush1.bf16.msra.mxu1 %v6560_v9  ;;  %10297 = vst [vmem:[#allocation24_spill] sm:$0xff] %v8023_v20  ;;  %10298 = vst [vmem:[#allocation25_spill] sm:$0xff] %v8025_v55  ;;  %v2480_v61 = vand.u32 4294901760, %v2446_v57  ;;  %v1690_v9 = vld [vmem:[%s7915_s8 + $0x68] sm:$0xff]  ;;  %v10301_v44 = vand.u32 4294901760, %v7547_v37  ;;  %v8042_v7 = vpack.c.bf16 %v1724_v26, %v1720_v10  ;;  %v8044_v12 = vsub.f32 %v1688_v21, %v1724_v26 }
  0x89   : > { %10299 = vst [vmem:[#allocation26_spill] sm:$0xff] %v8029_v22  ;;  %1503 = vmatprep.subr.mxu1 %v10300_v62  ;;  %v2482_v4 = vand.u32 4294901760, %v2445_v29  ;;  %v2486_v39 = vand.u32 4294901760, %v2447_v8  ;;  %v1689_v62 = vld [vmem:[%s7915_s8 + $0x60] sm:$0xff]  ;;  %v8050_v18 = vpack.c.bf16 %v1726_v40, %v1722_v14  ;;  %v8052_v32 = vsub.f32 %v1685_v53, %v1722_v14 }
  0x8a   : > { %748 = vmatpush1.msra.mxu0 %v10301_v44  ;;  %10302 = vst [vmem:[#allocation27_spill] sm:$0xff] %v8042_v7  ;;  %v8054_v37 = vsub.f32 %v1687_v24, %v1726_v40  ;;  %v10304_v10 = vand.u32 4294901760, %v7570_v11  ;;  %v8059_v21 = vsub.f32 %v2446_v57, %v2480_v61  ;;  %v1728_v26 = vand.u32 4294901760, %v1690_v9 }
  0x8b   : > { %6467 = vmatprep.subr.bf16.mxu0 %v7382_v16  ;;  %797 = vmatmul.mubr.f32.vlgmr.msra.gmra.mrb[0].mxu0 %v7561_v3  ;;  %10303 = vst [vmem:[#allocation28_spill] sm:$0xff] %v8050_v18  ;;  %v1732_v44 = vand.u32 4294901760, %v1692_v34  ;;  %v2450_v16 = vld [vmem:[%s7922_s13 + $0x68] sm:$0xff]  ;;  %v1699_v7 = vsel %vm178_vm0, %v6328_v28, 0  ;;  %v8065_v53 = vpack.c.bf16 %v2484_v38, %v2480_v61  ;;  %v8067_v24 = vsub.f32 %v2448_v36, %v2484_v38  ;;  %v2449_v28 = vld [vmem:[%s7922_s13 + $0x60] sm:$0xff]  ;;  %v2451_v36 = vld [vmem:[%s7922_s13 + $0x70] sm:$0xff] }
  0x8c   : > { %1507 = vmatpush1.msra.mxu1 %v10304_v10  ;;  %6469 = vmatpush1.bf16.msra.mxu0 %v7393_v23  ;;  %v1730_v11 = vand.u32 4294901760, %v1689_v62  ;;  %v1734_v14 = vand.u32 4294901760, %v1691_v30  ;;  %v2452_v23 = vld [vmem:[%s7922_s13 + $0x78] sm:$0xff]  ;;  %v8072_v57 = vpack.c.bf16 %v2486_v39, %v2482_v4  ;;  %v8074_v40 = vsub.f32 %v2445_v29, %v2482_v4  ;;  %v6336_v4 = vld [vmem:[%s7508_s27 + $0x30] sm:$0xff] }
  0x8d   : > { %6563 = vmatprep.subr.bf16.mxu1 %v7397_v25  ;;  %1556 = vmatmul.mubr.f32.vlgmr.msra.gmra.mrb[0].mxu1 %v7589_v5  ;;  %10305 = vst [vmem:[#allocation29_spill] sm:$0xff] %v8065_v53  ;;  %v8076_v25 = vsub.f32 %v2447_v8, %v2486_v39  ;;  %v2488_v38 = vand.u32 4294901760, %v2450_v16  ;;  %v8084_v10 = vand.u32 4294901760, %v1699_v7  ;;  %v8090_v29 = vsub.f32 %v1690_v9, %v1728_v26 }
  0x8e   : > { %6565 = vmatpush1.bf16.msra.mxu1 %v10253_v45  ;;  %6471 = vmatprep.subr.bf16.mxu0 %v10254_v50  ;;  %10306 = vst [vmem:[#allocation30_spill] sm:$0xff] %v8072_v57  ;;  %v8088_v50 = vpack.c.bf16 %v1732_v44, %v1728_v26  ;;  %v2492_v8 = vand.u32 4294901760, %v2452_v23  ;;  %v8097_v39 = vpack.c.bf16 %v1734_v14, %v1730_v11  ;;  %v2490_v45 = vand.u32 4294901760, %v2449_v28  ;;  %v8106_v26 = vld [vmem:[%s7915_s8 + $0x88] sm:$0xff] }
  0x8f   : > { %6567 = vmatprep.subr.bf16.mxu1 %v10255_v54  ;;  %802 = vmatprep.mubr.f32.mxu0 %v10222_v48  ;;  %10307 = vst [vmem:[#allocation31_spill] sm:$0xff] %v8084_v10  ;;  %v8092_v54 = vsub.f32 %v1692_v34, %v1732_v44  ;;  %v8103_v9 = vsub.f32 %v1689_v62, %v1730_v11  ;;  %v2494_v34 = vand.u32 4294901760, %v2451_v36  ;;  %10311 = vst [vmem:[#allocation35_spill] sm:$0xff] %v8106_v26 }
  0x90   : > { %6473 = vmatpush1.bf16.msra.mxu0 %v10256_v58  ;;  %1561 = vmatprep.mubr.f32.mxu1 %v10222_v48  ;;  %10308 = vst [vmem:[#allocation32_spill] sm:$0xff] %v8088_v50  ;;  %10309 = vst [vmem:[#allocation33_spill] sm:$0xff] %v8097_v39  ;;  %v10312_v61 = vand.u32 4294901760, %v7965_v31  ;;  %v10313_v62 = vand.u32 4294901760, %v7967_v0  ;;  %v8119_v58 = vsub.f32 %v1699_v7, %v8084_v10  ;;  %v8134_v7 = vand.u32 4294901760, %v8106_v26  ;;  %v8138_v10 = vld [vmem:[%s7922_s13 + $0x88] sm:$0xff] }
  0x91   : > { %6475 = vmatprep.subr.bf16.mxu0 %v10257_v60  ;;  %804 = vmatmul.mubr.f32.gmra.mrb[2].mxu0 %v7709_v13  ;;  %10310 = vst [vmem:[#allocation34_spill] sm:$0xff] %v8103_v9  ;;  %v2459_v60 = vsel %vm178_vm0, %v6336_v4, 0  ;;  %v8126_v44 = vpack.c.bf16 %v2492_v8, %v2488_v38  ;;  %v8128_v9 = vsub.f32 %v2450_v16, %v2488_v38 }
  0x92   : > { %6569 = vmatpush1.bf16.msra.mxu1 %v10258_v1  ;;  %892 = vmatprep.mubr.f32.mxu0 %v10222_v48  ;;  %v1812_v1 = vsub.f32 %v7965_v31, %v10312_v61  ;;  %v1824_v11 = vsub.f32 %v7967_v0, %v10313_v62  ;;  %10314 = vst [vmem:[#allocation36_spill] sm:$0xff] %v8119_v58  ;;  %10316 = vst [vmem:[#allocation38_spill] sm:$0xff] %v8134_v7  ;;  %v1693_v62 = vld [vmem:[%s7915_s8 + $0x80] sm:$0xff]  ;;  %v8156_v31 = vand.u32 4294901760, %v2459_v60 }
  0x93   : > { %6571 = vmatprep.subr.bf16.mxu1 %v10259_v2  ;;  %1563 = vmatmul.mubr.f32.gmra.mrb[2].mxu1 %v7722_v46  ;;  %v8124_v2 = vsub.f32 %v1691_v30, %v1734_v14  ;;  %10315 = vst [vmem:[#allocation37_spill] sm:$0xff] %v8126_v44  ;;  %v8131_v61 = vsub.f32 %v2452_v23, %v2492_v8  ;;  %v10318_v30 = vand.u32 4294901760, %v7982_v52  ;;  %v10320_v23 = vand.u32 4294901760, %v7987_v19 }
  0x94   : > { %6477 = vmatpush1.bf16.msra.mxu0 %v10261_v41  ;;  %1651 = vmatprep.mubr.f32.mxu1 %v10222_v48  ;;  %v10317_v41 = vand.u32 4294901760, %v7976_v15  ;;  %v8147_v16 = vpack.c.bf16 %v2494_v34, %v2490_v45  ;;  %v10321_v8 = vand.u32 4294901760, %v7989_v33  ;;  %10322 = vst [vmem:[#allocation40_spill] sm:$0xff] %v8156_v31  ;;  %v8165_v26 = vand.u32 4294901760, %v1693_v62 }
  0x95   : > { %6479 = vmatprep.subr.bf16.mxu0 %v10262_v42  ;;  %v1830_v14 = vsub.f32 %v7982_v52, %v10318_v30  ;;  %v2453_v42 = vld [vmem:[%s7922_s13 + $0x80] sm:$0xff]  ;;  %v2572_v38 = vsub.f32 %v7987_v19, %v10320_v23  ;;  %v1813_v30 = vand.u32 4294901760, %v1812_v1  ;;  %v1825_v52 = vand.u32 4294901760, %v1824_v11  ;;  %v10326_v19 = vld [vmem:[#allocation13_spill] sm:$0xff]  ;;  %v6329_v1 = vld [vmem:[%s7508_s27 + $0x28] sm:$0xff]  ;;  %s6377_s13 = sshll.u32 %s10792_s23, 5 }
  0x96   : > { %v1818_v4 = vsub.f32 %v7976_v15, %v10317_v41  ;;  %6573 = vmatpush1.bf16.msra.mxu1 %v10263_v47  ;;  %10319 = vst [vmem:[#allocation39_spill] sm:$0xff] %v8147_v16  ;;  %v2584_v0 = vsub.f32 %v7989_v33, %v10321_v8  ;;  %v8159_v41 = vsub.f32 %v2449_v28, %v2490_v45  ;;  %10323 = vst [vmem:[#allocation41_spill] sm:$0xff] %v8165_v26  ;;  %v10325_v8 = vld [vmem:[#allocation11_spill] sm:$0xff]  ;;  %v10328_v11 = vld [vmem:[#allocation17_spill] sm:$0xff]  ;;  %s9276_s15 = scalar_lea.vmem %s9892_s2, %s6377_s13 }
  0x97   : > { %6575 = vmatprep.subr.bf16.mxu1 %v10264_v49  ;;  %v8163_v15 = vsub.f32 %v2451_v36, %v2494_v34  ;;  %v8168_v23 = vand.u32 4294901760, %v8138_v10  ;;  %v8172_v49 = vand.u32 4294901760, %v2453_v42  ;;  %v1831_v45 = vand.u32 4294901760, %v1830_v14  ;;  %v10330_v33 = vld [vmem:[#allocation15_spill] sm:$0xff] }
  0x98   : > { %6481 = vmatpush1.bf16.msra.mxu0 %v10265_v51  ;;  %v1819_v28 = vand.u32 4294901760, %v1818_v4  ;;  %v8177_v51 = vsub.f32 %v1693_v62, %v8165_v26  ;;  %v2573_v36 = vand.u32 4294901760, %v2572_v38  ;;  %v2585_v34 = vand.u32 4294901760, %v2584_v0  ;;  %v10332_v38 = vld [vmem:[#allocation14_spill] sm:$0xff] }
  0x99   : > { %10324 = vst [vmem:[#allocation42_spill] sm:$0xff] %v8168_v23  ;;  %843 = vmatprep.subr.mxu0 %v10326_v19  ;;  %10327 = vst [vmem:[#allocation11_spill] sm:$0xff] %v8172_v49  ;;  %v8180_v47 = vsub.f32 %v2459_v60, %v8156_v31  ;;  %v8183_v19 = vpack.c.bf16 %v1825_v52, %v1813_v30  ;;  %v8186_v4 = vsub.f32 %v2453_v42, %v8172_v49  ;;  %v6337_v30 = vld [vmem:[%s7508_s27 + $0x38] sm:$0xff]  ;;  %v10336_v52 = vld [vmem:[#allocation18_spill] sm:$0xff] }
  0x9a   : > { %6577 = vmatpush1.bf16.msra.mxu1 %v10328_v11  ;;  %v10331_v14 = vand.u32 4294901760, %v8119_v58  ;;  %v10333_v0 = vand.u32 4294901760, %v10325_v8  ;;  %v10335_v62 = vand.u32 4294901760, %v8000_v27  ;;  %v8214_v42 = vpack.c.bf16 %v2585_v34, %v2573_v36  ;;  %v10340_v34 = vld [vmem:[#allocation8_spill] sm:$0xff] }
  0x9b   : > { %10329 = vst [vmem:[#allocation13_spill] sm:$0xff] %v8180_v47  ;;  %1602 = vmatprep.subr.mxu1 %v10330_v33  ;;  %v10337_v33 = vld [vmem:[#allocation5_spill] sm:$0xff]  ;;  %v2462_v36 = vsel %vm178_vm0, %v6337_v30, 0  ;;  %v10344_v31 = vand.u32 4294901760, %v8023_v20 }
  0x9c   : > { %v8191_v11 = vsub.f32 %v8119_v58, %v10331_v14  ;;  %845 = vmatpush1.msra.mxu0 %v10332_v38  ;;  %v2578_v60 = vsub.f32 %v10325_v8, %v10333_v0  ;;  %v10334_v14 = vld [vmem:[#allocation19_spill] sm:$0xff]  ;;  %v8205_v58 = vpack.c.bf16 %v1831_v45, %v1819_v28  ;;  %v2590_v38 = vsub.f32 %v8000_v27, %v10335_v62  ;;  %v10338_v45 = vld [vmem:[#allocation6_spill] sm:$0xff] }
  0x9d   : > { %894 = vmatmul.mubr.f32.vlgmr.msra.gmra.mrb[0].mxu0 %v7561_v3  ;;  %6579 = vmatprep.subr.bf16.mxu0 %v10334_v14  ;;  %v1702_v28 = vsel %vm178_vm0, %v6329_v1, 0  ;;  %v10339_v0 = vand.u32 4294901760, %v8004_v35  ;;  %v10341_v1 = vand.u32 4294901760, %v8006_v17  ;;  %v10342_v3 = vand.u32 4294901760, %v8011_v6 }
  0x9e   : > { %1604 = vmatpush1.msra.mxu1 %v10336_v52  ;;  %6581 = vmatpush1.bf16.msra.mxu0 %v10337_v33  ;;  %v2579_v14 = vand.u32 4294901760, %v2578_v60  ;;  %v10343_v33 = vand.u32 4294901760, %v8017_v59  ;;  %v2591_v30 = vand.u32 4294901760, %v2590_v38  ;;  %v2596_v60 = vsub.f32 %v8023_v20, %v10344_v31 }
  0x9f   : > { %1653 = vmatmul.mubr.f32.vlgmr.msra.gmra.mrb[0].mxu1 %v7589_v5  ;;  %6675 = vmatprep.subr.bf16.mxu1 %v10338_v45  ;;  %v1836_v52 = vsub.f32 %v8004_v35, %v10339_v0  ;;  %v1848_v5 = vsub.f32 %v8006_v17, %v10341_v1  ;;  %v1842_v62 = vsub.f32 %v8011_v6, %v10342_v3  ;;  %v8246_v45 = vand.u32 4294901760, %v1702_v28  ;;  %v10346_v3 = vld [vmem:[#allocation10_spill] sm:$0xff]  ;;  %v10347_v6 = vld [vmem:[#allocation23_spill] sm:$0xff] }
  0xa0   : > { %6677 = vmatpush1.bf16.msra.mxu1 %v10340_v34  ;;  %899 = vmatprep.mubr.f32.mxu0 %v10222_v48  ;;  %v1854_v0 = vsub.f32 %v8017_v59, %v10343_v33  ;;  %v10345_v34 = vand.u32 4294901760, %v8025_v55  ;;  %v10348_v33 = vand.u32 4294901760, %v8180_v47  ;;  %v10349_v38 = vand.u32 4294901760, %v8029_v22 }
  0xa1   : > { %901 = vmatmul.mubr.f32.gmra.mrb[2].mxu0 %v7709_v13  ;;  %1658 = vmatprep.mubr.f32.mxu1 %v10222_v48  ;;  %v8259_v20 = vand.u32 4294901760, %v2462_v36  ;;  %v1849_v31 = vand.u32 4294901760, %v1848_v5 }
  0xa2   : > { %v2608_v1 = vsub.f32 %v8025_v55, %v10345_v34  ;;  %6583 = vmatprep.subr.bf16.mxu0 %v10346_v3  ;;  %6679 = vmatprep.subr.bf16.mxu1 %v10347_v6  ;;  %v8253_v13 = vsub.f32 %v8180_v47, %v10348_v33  ;;  %v2602_v59 = vsub.f32 %v8029_v22, %v10349_v38  ;;  %v10350_v34 = vld [vmem:[#allocation12_spill] sm:$0xff]  ;;  %v1837_v3 = vand.u32 4294901760, %v1836_v52  ;;  %v10352_v38 = vld [vmem:[#allocation27_spill] sm:$0xff] }
  0xa3   : > { %1660 = vmatmul.mubr.f32.gmra.mrb[2].mxu1 %v7722_v46  ;;  %6585 = vmatpush1.bf16.msra.mxu0 %v10350_v34  ;;  %v10351_v6 = vand.u32 4294901760, %v8033_v63  ;;  %v1843_v22 = vand.u32 4294901760, %v1842_v62  ;;  %v1855_v17 = vand.u32 4294901760, %v1854_v0  ;;  %v8273_v52 = vpack.c.bf16 %v2591_v30, %v2579_v14 }
  0xa4   : > { %6681 = vmatpush1.bf16.msra.mxu1 %v8027_v56  ;;  %6587 = vmatprep.subr.bf16.mxu0 %v10352_v38  ;;  %v2609_v34 = vand.u32 4294901760, %v2608_v1  ;;  %v8276_v33 = vsub.f32 %v1702_v28, %v8246_v45  ;;  %v2551_v47 = vand.u32 4294901760, %v8253_v13  ;;  %v2603_v5 = vand.u32 4294901760, %v2602_v59 }
  0xa5   : > { %v2614_v55 = vsub.f32 %v8033_v63, %v10351_v6  ;;  %6683 = vmatprep.subr.bf16.mxu1 %v8065_v53  ;;  %1786 = vmatprep.mubr.f32.mxu0 %v10222_v48  ;;  %v2597_v6 = vand.u32 4294901760, %v2596_v60  ;;  %v10353_v62 = vand.u32 4294901760, %v8035_v43  ;;  %v8286_v46 = vsub.f32 %v2462_v36, %v8259_v20  ;;  %v10364_v53 = vld [vmem:[#allocation35_spill] sm:$0xff] }
  0xa6   : > { %2546 = vmatprep.mubr.f32.mxu1 %v10222_v48  ;;  %v10354_v30 = vand.u32 4294901760, %v8044_v12  ;;  %v10355_v60 = vand.u32 4294901760, %v8052_v32  ;;  %v6598_v36 = vpack.c.bf16 %v1849_v31, %v1837_v3  ;;  %v8302_v13 = vpack.c.bf16 %v1855_v17, %v1843_v22  ;;  %v10359_v22 = vld [vmem:[#allocation34_spill] sm:$0xff] }
  0xa7   : > { %v8283_v0 = vsub.f32 %v8035_v43, %v10353_v62  ;;  %6589 = vmatpush1.bf16.msra.mxu0 %v8050_v18  ;;  %v2615_v14 = vand.u32 4294901760, %v2614_v55  ;;  %v10356_v55 = vand.u32 4294901760, %v8054_v37  ;;  %v10024_v18 = vand.u32 4294901760, %v8074_v40 }
  0xa8   : > { %v8292_v28 = vsub.f32 %v8044_v12, %v10354_v30  ;;  %v8297_v59 = vsub.f32 %v8052_v32, %v10355_v60  ;;  %6685 = vmatpush1.bf16.msra.mxu1 %v8072_v57  ;;  %6591 = vmatprep.subr.bf16.mxu0 %v8088_v50  ;;  %v10019_v30 = vand.u32 4294901760, %v8067_v24  ;;  %v6694_v60 = vpack.c.bf16 %v2609_v34, %v2597_v6 }
  0xa9   : > { %v8307_v62 = vsub.f32 %v8054_v37, %v10356_v55  ;;  %6687 = vmatprep.subr.bf16.mxu1 %v8126_v44  ;;  %v1861_v3 = vand.u32 4294901760, %v8283_v0  ;;  %v8319_v55 = vpack.c.bf16 %v2615_v14, %v2603_v5  ;;  %v10357_v1 = vand.u32 4294901760, %v8059_v21 }
  0xaa   : > { %v1873_v34 = vand.u32 4294901760, %v8292_v28  ;;  %v1867_v6 = vand.u32 4294901760, %v8297_v59  ;;  %v2632_v31 = vsub.f32 %v8067_v24, %v10019_v30  ;;  %v2626_v28 = vsub.f32 %v8074_v40, %v10024_v18 }
  0xab   : > { %6593 = vmatpush1.bf16.msra.mxu0 %v8097_v39  ;;  %v2620_v57 = vsub.f32 %v8059_v21, %v10357_v1  ;;  %v1879_v0 = vand.u32 4294901760, %v8307_v62  ;;  %v10358_v59 = vand.u32 4294901760, %v8076_v25  ;;  %v10360_v17 = vand.u32 4294901760, %v8276_v33 }
  0xac   : > { %6689 = vmatpush1.bf16.msra.mxu1 %v8147_v16  ;;  %1737 = vmatprep.subr.mxu0 %v8134_v7  ;;  %v10361_v5 = vand.u32 4294901760, %v8090_v29  ;;  %v10362_v16 = vand.u32 4294901760, %v8092_v54  ;;  %v10363_v44 = vand.u32 4294901760, %v8286_v46  ;;  %v10365_v18 = vand.u32 4294901760, %v8128_v9 }
  0xad   : > { %2497 = vmatprep.subr.mxu1 %v8168_v23  ;;  %v2638_v1 = vsub.f32 %v8076_v25, %v10358_v59  ;;  %v1801_v30 = vsub.f32 %v8276_v33, %v10360_v17  ;;  %v2621_v62 = vand.u32 4294901760, %v2620_v57  ;;  %v8372_v17 = vsub.f32 %v8138_v10, %v8168_v23 }
  0xae   : > { %v1884_v14 = vsub.f32 %v8090_v29, %v10361_v5  ;;  %v1896_v39 = vsub.f32 %v8092_v54, %v10362_v16  ;;  %v2561_v59 = vsub.f32 %v8286_v46, %v10363_v44  ;;  %v8360_v5 = vsub.f32 %v10364_v53, %v8134_v7 }
  0xaf   : > { %1739 = vmatpush1.msra.mxu0 %v8165_v26  ;;  %v2633_v16 = vand.u32 4294901760, %v2632_v31  ;;  %v2644_v44 = vsub.f32 %v8128_v9, %v10365_v18  ;;  %v10366_v26 = vand.u32 4294901760, %v8131_v61  ;;  %v10367_v53 = vand.u32 4294901760, %v8191_v11 }
  0xb0   : > { %6595 = vmatprep.subr.bf16.mxu0 %v8183_v19  ;;  %2499 = vmatpush1.msra.mxu1 %v8172_v49  ;;  %v2627_v19 = vand.u32 4294901760, %v2626_v28  ;;  %v2639_v50 = vand.u32 4294901760, %v2638_v1  ;;  %v10368_v31 = vand.u32 4294901760, %v10359_v22  ;;  %v1802_v18 = vand.u32 4294901760, %v1801_v30 }
  0xb1   : > { %v2656_v57 = vsub.f32 %v8131_v61, %v10366_v26  ;;  %1792 = vmatmul.mubr.f32.vlgmr.msra.gmra.mrb[4].mxu0 %v10367_v53  ;;  %6691 = vmatprep.subr.bf16.mxu1 %v8214_v42  ;;  %v1885_v26 = vand.u32 4294901760, %v1884_v14  ;;  %v1897_v7 = vand.u32 4294901760, %v1896_v39  ;;  %v10369_v10 = vand.u32 4294901760, %v8124_v2 }
  0xb2   : > { %v1890_v49 = vsub.f32 %v10359_v22, %v10368_v31  ;;  %6597 = vmatpush1.bf16.msra.mxu0 %v8205_v58  ;;  %2552 = vmatmul.mubr.f32.vlgmr.msra.gmra.mrb[4].mxu1 %v2551_v47  ;;  %v2562_v11 = vand.u32 4294901760, %v2561_v59  ;;  %v6602_v42 = vpack.c.bf16 %v1873_v34, %v1861_v3  ;;  %v10370_v28 = vand.u32 4294901760, %v8159_v41 }
  0xb3   : > { %v1902_v23 = vsub.f32 %v8124_v2, %v10369_v10  ;;  %6693 = vmatpush1.bf16.msra.mxu1 %v8273_v52  ;;  %6599 = vmatprep.subr.bf16.mxu0 %v6598_v36  ;;  %v10371_v30 = vand.u32 4294901760, %v8163_v15  ;;  %v10042_v47 = vand.u32 4294901760, %v8360_v5  ;;  %v6698_v39 = vpack.c.bf16 %v2633_v16, %v2621_v62 }
  0xb4   : > { %v2650_v1 = vsub.f32 %v8159_v41, %v10370_v28  ;;  %6695 = vmatprep.subr.bf16.mxu1 %v6694_v60  ;;  %v2645_v14 = vand.u32 4294901760, %v2644_v44  ;;  %v2657_v53 = vand.u32 4294901760, %v2656_v57  ;;  %1797 = vmatprep.mubr.f32.mxu0 %v10222_v48  ;;  %v10041_v52 = vand.u32 4294901760, %v8372_v17  ;;  %v10375_v28 = vld [vmem:[#allocation20_spill] sm:$0xff] }
  0xb5   : > { %v2662_v58 = vsub.f32 %v8163_v15, %v10371_v30  ;;  %v6604_v36 = vpack.c.bf16 %v1879_v0, %v1867_v6  ;;  %v6700_v3 = vpack.c.bf16 %v2639_v50, %v2627_v19  ;;  %1803 = vmatmul.mubr.f32.gmra.mrb[6].mxu0 %v1802_v18  ;;  %2557 = vmatprep.mubr.f32.mxu1 %v10222_v48  ;;  %v1891_v59 = vand.u32 4294901760, %v1890_v49  ;;  %v10372_v18 = vld [vmem:[#allocation2_spill] sm:$0xff]  ;;  %v10376_v30 = vld [vmem:[#allocation4_spill] sm:$0xff] }
  0xb6   : > { %6601 = vmatpush1.bf16.msra.mxu0 %v8302_v13  ;;  %v6606_v34 = vpack.c.bf16 %v1897_v7, %v1885_v26  ;;  %v1903_v31 = vand.u32 4294901760, %v1902_v23  ;;  %2563 = vmatmul.mubr.f32.gmra.mrb[6].mxu1 %v2562_v11  ;;  %v10040_v60 = vand.u32 4294901760, %v8177_v51  ;;  %v2651_v62 = vand.u32 4294901760, %v2650_v1  ;;  %v10373_v26 = vld [vmem:[#allocation3_spill] sm:$0xff] }
  0xb7   : > { %6697 = vmatpush1.bf16.msra.mxu1 %v8319_v55  ;;  %6603 = vmatprep.subr.bf16.mxu0 %v6602_v42  ;;  %v2663_v16 = vand.u32 4294901760, %v2662_v58  ;;  %v1908_v50 = vsub.f32 %v8360_v5, %v10042_v47  ;;  %v10039_v6 = vand.u32 4294901760, %v8186_v4  ;;  %v6702_v0 = vpack.c.bf16 %v2657_v53, %v2645_v14  ;;  %v10374_v42 = vld [vmem:[#allocation9_spill] sm:$0xff]  ;;  %v10377_v58 = vld [vmem:[#allocation7_spill] sm:$0xff]  ;;  %v10378_v53 = vld [vmem:[#allocation16_spill] sm:$0xff] }
  0xb8   : > { %6699 = vmatprep.subr.bf16.mxu1 %v6698_v39  ;;  %v2668_v7 = vsub.f32 %v8372_v17, %v10041_v52  ;;  %1963 = vmatprep.mubr.f32.mxu0 %v10222_v48  ;;  %v6608_v23 = vpack.c.bf16 %v1903_v31, %v1891_v59  ;;  %v1914_v49 = vsub.f32 %v8177_v51, %v10040_v60  ;;  %v10381_v31 = vld [vmem:[#allocation31_spill] sm:$0xff]  ;;  %v10402_v60 = vld [vmem:[#allocation38_spill] sm:$0xff]  ;;  %v10403_v52 = vand.u32 4294901760, %v10372_v18 }
  0xb9   : > { %2723 = vmatprep.mubr.f32.mxu1 %v10222_v48  ;;  %v6704_v13 = vpack.c.bf16 %v2663_v16, %v2651_v62  ;;  %v1909_v55 = vand.u32 4294901760, %v1908_v50  ;;  %v2674_v44 = vsub.f32 %v8186_v4, %v10039_v6  ;;  %v6610_v10 = vpack.c.bf16 %v10373_v26, %v10372_v18  ;;  %v10382_v62 = vld [vmem:[#allocation40_spill] sm:$0xff]  ;;  %v10383_v16 = vld [vmem:[#allocation21_spill] sm:$0xff]  ;;  %v10384_v50 = vld [vmem:[#allocation22_spill] sm:$0xff] }
  0xba   : > { %6605 = vmatpush1.bf16.msra.mxu0 %v6604_v36  ;;  %v2669_v57 = vand.u32 4294901760, %v2668_v7  ;;  %v1915_v19 = vand.u32 4294901760, %v1914_v49  ;;  %v6706_v1 = vpack.c.bf16 %v10375_v28, %v10374_v42  ;;  %v6612_v39 = vpack.c.bf16 %v10377_v58, %v10376_v30  ;;  %v10385_v7 = vld [vmem:[#allocation26_spill] sm:$0xff]  ;;  %v10401_v6 = vld [vmem:[#allocation39_spill] sm:$0xff] }
  0xbb   : > { %6701 = vmatpush1.bf16.msra.mxu1 %v6700_v3  ;;  %6607 = vmatprep.subr.bf16.mxu0 %v6606_v34  ;;  %v2675_v11 = vand.u32 4294901760, %v2674_v44  ;;  %v6708_v14 = vpack.c.bf16 %v8000_v27, %v10325_v8  ;;  %v6614_v36 = vpack.c.bf16 %v10378_v53, %v8004_v35  ;;  %v10379_v3 = vld [vmem:[#allocation24_spill] sm:$0xff]  ;;  %v10380_v34 = vld [vmem:[#allocation25_spill] sm:$0xff]  ;;  %v6618_v49 = vpack.c.bf16 %v8044_v12, %v8035_v43 }
  0xbc   : > { %6703 = vmatprep.subr.bf16.mxu1 %v6702_v0  ;;  %v6710_v59 = vpack.c.bf16 %v10380_v34, %v10379_v3  ;;  %v6616_v0 = vpack.c.bf16 %v10384_v50, %v10383_v16  ;;  %v6716_v44 = vpack.c.bf16 %v8076_v25, %v8074_v40  ;;  %v10404_v47 = vand.u32 4294901760, %v10373_v26 }
  0xbd   : > { %v10411_v18 = vand.u32 4294901760, %v10325_v8  ;;  %v10413_v26 = vand.u32 4294901760, %v8004_v35  ;;  %v10417_v8 = vand.u32 4294901760, %v10380_v34  ;;  %v3198_v34 = vld [vmem:[%s8509_s22 + $0x8] sm:$0xff] }
  0xbe   : > { %6609 = vmatpush1.bf16.msra.mxu0 %v6608_v23  ;;  %v6712_v23 = vpack.c.bf16 %v8033_v63, %v10385_v7 }
  0xbf   : > { %6705 = vmatpush1.bf16.msra.mxu1 %v6704_v13  ;;  %1910 = vmatprep.subr.mxu0 %v1909_v55  ;;  %v6714_v13 = vpack.c.bf16 %v8067_v24, %v8059_v21  ;;  %v6620_v55 = vpack.c.bf16 %v8054_v37, %v8052_v32 }
  0xc0   : > { %2670 = vmatprep.subr.mxu1 %v2669_v57  ;;  %v6622_v57 = vpack.c.bf16 %v8092_v54, %v8090_v29 }
  0xc2   : > { %1916 = vmatpush1.msra.mxu0 %v1915_v19  ;;  %v6718_v19 = vpack.c.bf16 %v8131_v61, %v8128_v9 }
  0xc3   : > { %6611 = vmatprep.subr.bf16.mxu0 %v6610_v10  ;;  %2676 = vmatpush1.msra.mxu1 %v2675_v11  ;;  %v6624_v10 = vpack.c.bf16 %v8124_v2, %v10359_v22  ;;  %v6720_v11 = vpack.c.bf16 %v8163_v15, %v8159_v41 }
  0xc4   : > { %1965 = vmatmul.mubr.f32.vlgmr.msra.gmra.mrb[4].mxu0 %v10381_v31  ;;  %6707 = vmatprep.subr.bf16.mxu1 %v6706_v1  ;;  %v10386_v1 = vld [vmem:[#allocation19_spill] sm:$0xff] }
  0xc5   : > { %6613 = vmatpush1.bf16.msra.mxu0 %v6612_v39  ;;  %2725 = vmatmul.mubr.f32.vlgmr.msra.gmra.mrb[4].mxu1 %v10382_v62  ;;  %v10387_v39 = vld [vmem:[#allocation36_spill] sm:$0xff] }
  0xc6   : > { %6709 = vmatpush1.bf16.msra.mxu1 %v6708_v14  ;;  %6615 = vmatprep.subr.bf16.mxu0 %v6614_v36  ;;  %v10388_v14 = vld [vmem:[#allocation6_spill] sm:$0xff]  ;;  %v10389_v36 = vld [vmem:[#allocation5_spill] sm:$0xff] }
  0xc7   : > { %6711 = vmatprep.subr.bf16.mxu1 %v6710_v59  ;;  %1970 = vmatprep.mubr.f32.mxu0 %v10222_v48  ;;  %v10390_v59 = vld [vmem:[#allocation13_spill] sm:$0xff] }
  0xc8   : > { %1972 = vmatmul.mubr.f32.gmra.mrb[6].mxu0 %v8246_v45  ;;  %2730 = vmatprep.mubr.f32.mxu1 %v10222_v48 }
  0xc9   : > { %6617 = vmatpush1.bf16.msra.mxu0 %v6616_v0  ;;  %2732 = vmatmul.mubr.f32.gmra.mrb[6].mxu1 %v8259_v20  ;;  %v10391_v0 = vld [vmem:[#allocation8_spill] sm:$0xff] }
  0xca   : > { %6713 = vmatpush1.bf16.msra.mxu1 %v6712_v23  ;;  %6619 = vmatprep.subr.bf16.mxu0 %v6618_v49  ;;  %v10392_v23 = vld [vmem:[#allocation10_spill] sm:$0xff]  ;;  %v10393_v49 = vld [vmem:[#allocation23_spill] sm:$0xff] }
  0xcb   : > { %6715 = vmatprep.subr.bf16.mxu1 %v6714_v13  ;;  %2078 = vmatprep.mubr.f32.mxu0 %v10222_v48  ;;  %v10394_v13 = vld [vmem:[#allocation12_spill] sm:$0xff] }
  0xcc   : > { %2838 = vmatprep.mubr.f32.mxu1 %v10222_v48 }
  0xcd   : > { %6621 = vmatpush1.bf16.msra.mxu0 %v6620_v55  ;;  %v10395_v55 = vld [vmem:[#allocation29_spill] sm:$0xff] }
  0xce   : > { %6717 = vmatpush1.bf16.msra.mxu1 %v6716_v44  ;;  %6623 = vmatprep.subr.bf16.mxu0 %v6622_v57  ;;  %v10396_v44 = vld [vmem:[#allocation28_spill] sm:$0xff]  ;;  %v10397_v57 = vld [vmem:[#allocation30_spill] sm:$0xff] }
  0xcf   : > { %6719 = vmatprep.subr.bf16.mxu1 %v6718_v19  ;;  %v10398_v19 = vld [vmem:[#allocation32_spill] sm:$0xff] }
  0xd1   : > { %6625 = vmatpush1.bf16.msra.mxu0 %v6624_v10  ;;  %v10399_v10 = vld [vmem:[#allocation37_spill] sm:$0xff] }
  0xd2   : > { %6721 = vmatpush1.bf16.msra.mxu1 %v6720_v11  ;;  %2028 = vmatprep.subr.mxu0 %v8360_v5  ;;  %v10400_v11 = vld [vmem:[#allocation33_spill] sm:$0xff] }
  0xd3   : > { %2788 = vmatprep.subr.mxu1 %v8372_v17 }
  0xd5   : > { %2031 = vmatpush1.msra.mxu0 %v8177_v51 }
  0xd6   : > { %6627 = vmatprep.subr.bf16.mxu0 %v10386_v1  ;;  %2791 = vmatpush1.msra.mxu1 %v8186_v4 }
  0xd7   : > { %2081 = vmatmul.mubr.f32.vlgmr.msra.gmra.mrb[4].mxu0 %v10387_v39  ;;  %6723 = vmatprep.subr.bf16.mxu1 %v10388_v14 }
  0xd8   : > { %6629 = vmatpush1.bf16.msra.mxu0 %v10389_v36  ;;  %2841 = vmatmul.mubr.f32.vlgmr.msra.gmra.mrb[4].mxu1 %v10390_v59 }
  0xd9   : > { %6725 = vmatpush1.bf16.msra.mxu1 %v10391_v0  ;;  %6631 = vmatprep.subr.bf16.mxu0 %v10392_v23 }
  0xda   : > { %6727 = vmatprep.subr.bf16.mxu1 %v10393_v49  ;;  %2086 = vmatprep.mubr.f32.mxu0 %v10222_v48 }
  0xdb   : > { %2089 = vmatmul.mubr.f32.gmra.mrb[6].mxu0 %v8276_v33  ;;  %2846 = vmatprep.mubr.f32.mxu1 %v10222_v48 }
  0xdc   : > { %6633 = vmatpush1.bf16.msra.mxu0 %v10394_v13  ;;  %2849 = vmatmul.mubr.f32.gmra.mrb[6].mxu1 %v8286_v46 }
  0xdd   : > { %6729 = vmatpush1.bf16.msra.mxu1 %v8027_v56  ;;  %6635 = vmatprep.subr.bf16.mxu0 %v10352_v38  ;;  %v10409_v38 = vand.u32 4294901760, %v10377_v58  ;;  %v10420_v58 = vand.u32 4294901760, %v10383_v16 }
  0xde   : > { %6731 = vmatprep.subr.bf16.mxu1 %v10395_v55  ;;  %2177 = vmatprep.mubr.f32.mxu0 %v10222_v48 }
  0xdf   : > { %2937 = vmatprep.mubr.f32.mxu1 %v10222_v48 }
  0xe0   : > { %6637 = vmatpush1.bf16.msra.mxu0 %v10396_v44  ;;  %v6642_v44 = vpack.c.bf16 %v10404_v47, %v10403_v52  ;;  %v10412_v47 = vand.u32 4294901760, %v8000_v27  ;;  %v10416_v27 = vand.u32 4294901760, %v10379_v3 }
  0xe1   : > { %6733 = vmatpush1.bf16.msra.mxu1 %v10397_v57  ;;  %6639 = vmatprep.subr.bf16.mxu0 %v10398_v19  ;;  %v10405_v57 = vld [vmem:[#allocation42_spill] sm:$0xff]  ;;  %v10406_v19 = vand.u32 4294901760, %v10374_v42  ;;  %v10414_v42 = vand.u32 4294901760, %v10378_v53  ;;  %v10421_v53 = vand.u32 4294901760, %v10384_v50  ;;  %v3199_v50 = vld [vmem:[%s8509_s22 + $0x10] sm:$0xff] }
  0xe2   : > { %6735 = vmatprep.subr.bf16.mxu1 %v10399_v10  ;;  %v10407_v10 = vand.u32 4294901760, %v10375_v28  ;;  %v6740_v52 = vpack.c.bf16 %v10412_v47, %v10411_v18  ;;  %v6742_v35 = vpack.c.bf16 %v10417_v8, %v10416_v27  ;;  %v10418_v28 = vand.u32 4294901760, %v10387_v39  ;;  %v3200_v39 = vld [vmem:[%s8509_s22 + $0x18] sm:$0xff] }
  0xe3   : > { %v6648_v3 = vpack.c.bf16 %v10421_v53, %v10420_v58  ;;  %v10427_v18 = vand.u32 4294901760, %v8067_v24  ;;  %v10430_v24 = vand.u32 4294901760, %v8054_v37  ;;  %v10431_v27 = vand.u32 4294901760, %v8286_v46 }
  0xe4   : > { %6641 = vmatpush1.bf16.msra.mxu0 %v10400_v11  ;;  %v6738_v55 = vpack.c.bf16 %v10407_v10, %v10406_v19  ;;  %v10408_v11 = vand.u32 4294901760, %v10376_v30  ;;  %v10419_v30 = vand.u32 4294901760, %v10390_v59  ;;  %v10424_v59 = vand.u32 4294901760, %v8035_v43  ;;  %v3197_v10 = vld [vmem:[%s8509_s22] sm:$0xff] }
  0xe5   : > { %6737 = vmatpush1.bf16.msra.mxu1 %v10401_v6  ;;  %2128 = vmatprep.subr.mxu0 %v10402_v60  ;;  %v10410_v60 = vld [vmem:[#allocation41_spill] sm:$0xff]  ;;  %v10425_v19 = vand.u32 4294901760, %v8044_v12  ;;  %v3228_v43 = vand.u32 4294901760, %v3200_v39  ;;  %v3230_v8 = vand.u32 4294901760, %v3199_v50  ;;  %v10434_v58 = vand.u32 4294901760, %v8090_v29 }
  0xe6   : > { %2888 = vmatprep.subr.mxu1 %v10405_v57  ;;  %v6644_v6 = vpack.c.bf16 %v10409_v38, %v10408_v11  ;;  %v6646_v57 = vpack.c.bf16 %v10414_v42, %v10413_v26  ;;  %v10415_v38 = vld [vmem:[#allocation11_spill] sm:$0xff]  ;;  %v10426_v11 = vand.u32 4294901760, %v8059_v21  ;;  %v3960_v12 = vld [vmem:[%s8521_s26 + $0x18] sm:$0xff]  ;;  %v3959_v26 = vld [vmem:[%s8521_s26 + $0x10] sm:$0xff]  ;;  %v10429_v21 = vand.u32 4294901760, %v8052_v32 }
  0xe7   : > { %v6650_v16 = vpack.c.bf16 %v10425_v19, %v10424_v59  ;;  %v10435_v32 = vand.u32 4294901760, %v8092_v54  ;;  %v10436_v53 = vand.u32 4294901760, %v8128_v9  ;;  %v10437_v46 = vand.u32 4294901760, %v8131_v61  ;;  %v3201_v54 = vld [vmem:[%s8509_s22 + $0x20] sm:$0xff]  ;;  %v3203_v59 = vld [vmem:[%s8509_s22 + $0x30] sm:$0xff] }
  0xe8   : > { %2130 = vmatpush1.msra.mxu0 %v10410_v60  ;;  %v6746_v47 = vpack.c.bf16 %v10427_v18, %v10426_v11  ;;  %v6652_v42 = vpack.c.bf16 %v10430_v24, %v10429_v21  ;;  %v3990_v29 = vand.u32 4294901760, %v3959_v26  ;;  %v10438_v9 = vand.u32 4294901760, %v10359_v22  ;;  %v3962_v21 = vld [vmem:[%s8521_s26 + $0x28] sm:$0xff] }
  0xe9   : > { %6643 = vmatprep.subr.bf16.mxu0 %v6642_v44  ;;  %2890 = vmatpush1.msra.mxu1 %v10415_v38  ;;  %v10423_v44 = vand.u32 4294901760, %v8033_v63  ;;  %v3224_v63 = vand.u32 4294901760, %v3198_v34  ;;  %v6654_v37 = vpack.c.bf16 %v10435_v32, %v10434_v58  ;;  %v10439_v61 = vand.u32 4294901760, %v8124_v2 }
  0xea   : > { %2181 = vmatmul.mubr.f32.vlgmr.msra.gmra.mrb[4].mxu0 %v10418_v28  ;;  %6739 = vmatprep.subr.bf16.mxu1 %v6738_v55  ;;  %v10422_v55 = vand.u32 4294901760, %v10385_v7  ;;  %v10428_v7 = vand.u32 4294901760, %v8276_v33  ;;  %v3226_v33 = vand.u32 4294901760, %v3197_v10  ;;  %v10433_v28 = vand.u32 4294901760, %v8076_v25 }
  0xeb   : > { %6645 = vmatpush1.bf16.msra.mxu0 %v6644_v6  ;;  %2941 = vmatmul.mubr.f32.vlgmr.msra.gmra.mrb[4].mxu1 %v10419_v30  ;;  %v6656_v19 = vpack.c.bf16 %v10439_v61, %v10438_v9  ;;  %v10441_v11 = vand.u32 4294901760, %v8163_v15  ;;  %v8590_v24 = vsub.f32 %v3200_v39, %v3228_v43  ;;  %v3963_v15 = vld [vmem:[%s8521_s26 + $0x30] sm:$0xff]  ;;  %v3238_v39 = vand.u32 4294901760, %v3203_v59 }
  0xec   : > { %6741 = vmatpush1.bf16.msra.mxu1 %v6740_v52  ;;  %6647 = vmatprep.subr.bf16.mxu0 %v6646_v57  ;;  %v6744_v6 = vpack.c.bf16 %v10423_v44, %v10422_v55  ;;  %v3958_v57 = vld [vmem:[%s8521_s26 + $0x8] sm:$0xff]  ;;  %v3957_v52 = vld [vmem:[%s8521_s26] sm:$0xff]  ;;  %v3204_v44 = vld [vmem:[%s8509_s22 + $0x38] sm:$0xff]  ;;  %v8615_v9 = vsub.f32 %v3959_v26, %v3990_v29  ;;  %v10455_v26 = vand.u32 4294901760, %v8372_v17 }
  0xed   : > { %6743 = vmatprep.subr.bf16.mxu1 %v6742_v35  ;;  %2186 = vmatprep.mubr.f32.mxu0 %v10222_v48  ;;  %v10432_v35 = vand.u32 4294901760, %v8074_v40  ;;  %v3202_v55 = vld [vmem:[%s8509_s22 + $0x28] sm:$0xff]  ;;  %v3984_v40 = vand.u32 4294901760, %v3958_v57  ;;  %v3986_v25 = vand.u32 4294901760, %v3957_v52  ;;  %10444 = vst [vmem:[#allocation14_spill] sm:$0xff] %v8590_v24  ;;  %v3236_v2 = vand.u32 4294901760, %v3204_v44 }
  0xee   : > { %2190 = vmatmul.mubr.f32.gmra.mrb[6].mxu0 %v10428_v7  ;;  %2946 = vmatprep.mubr.f32.mxu1 %v10222_v48  ;;  %v8587_v7 = vsub.f32 %v3198_v34, %v3224_v63  ;;  %v3232_v22 = vand.u32 4294901760, %v3202_v55  ;;  %v8599_v34 = vsub.f32 %v3199_v50, %v3230_v8  ;;  %v3998_v50 = vand.u32 4294901760, %v3963_v15 }
  0xef   : > { %6649 = vmatpush1.bf16.msra.mxu0 %v6648_v3  ;;  %2950 = vmatmul.mubr.f32.gmra.mrb[6].mxu1 %v10431_v27  ;;  %v6748_v30 = vpack.c.bf16 %v10433_v28, %v10432_v35  ;;  %v6750_v3 = vpack.c.bf16 %v10437_v46, %v10436_v53  ;;  %v8592_v27 = vpack.c.bf16 %v3230_v8, %v3226_v33  ;;  %v3961_v35 = vld [vmem:[%s8521_s26 + $0x20] sm:$0xff]  ;;  %v3206_v53 = vld [vmem:[%s8509_s22 + $0x48] sm:$0xff]  ;;  %v3207_v8 = vld [vmem:[%s8509_s22 + $0x50] sm:$0xff] }
  0xf0   : > { %6745 = vmatpush1.bf16.msra.mxu1 %v6744_v6  ;;  %6651 = vmatprep.subr.bf16.mxu0 %v6650_v16  ;;  %v3988_v6 = vand.u32 4294901760, %v3960_v12  ;;  %v10440_v16 = vand.u32 4294901760, %v8159_v41  ;;  %10443 = vst [vmem:[#allocation15_spill] sm:$0xff] %v8587_v7  ;;  %v3964_v41 = vld [vmem:[%s8521_s26 + $0x38] sm:$0xff]  ;;  %v8597_v28 = vsub.f32 %v3197_v10, %v3226_v33  ;;  %10447 = vst [vmem:[#allocation35_spill] sm:$0xff] %v8599_v34  ;;  %v3994_v10 = vand.u32 4294901760, %v3961_v35 }
  0xf1   : > { %6747 = vmatprep.subr.bf16.mxu1 %v6746_v47  ;;  %2314 = vmatprep.mubr.f32.mxu0 %v10222_v48  ;;  %v8585_v47 = vpack.c.bf16 %v3228_v43, %v3224_v63  ;;  %10445 = vst [vmem:[#allocation18_spill] sm:$0xff] %v8592_v27  ;;  %v3234_v63 = vand.u32 4294901760, %v3201_v54  ;;  %v8607_v32 = vpack.c.bf16 %v3990_v29, %v3986_v25  ;;  %v3996_v46 = vand.u32 4294901760, %v3964_v41  ;;  %v3205_v33 = vld [vmem:[%s8509_s22 + $0x40] sm:$0xff] }
  0xf2   : > { %v6752_v18 = vpack.c.bf16 %v10441_v11, %v10440_v16  ;;  %3074 = vmatprep.mubr.f32.mxu1 %v10222_v48  ;;  %10446 = vst [vmem:[#allocation34_spill] sm:$0xff] %v8597_v28  ;;  %v8601_v43 = vpack.c.bf16 %v3988_v6, %v3984_v40  ;;  %v8605_v58 = vsub.f32 %v3960_v12, %v3988_v6  ;;  %v3240_v16 = vand.u32 4294901760, %v3206_v53 }
  0xf3   : > { %10442 = vst [vmem:[#allocation17_spill] sm:$0xff] %v8585_v47  ;;  %6653 = vmatpush1.bf16.msra.mxu0 %v6652_v42  ;;  %v8603_v42 = vsub.f32 %v3958_v57, %v3984_v40  ;;  %10451 = vst [vmem:[#allocation20_spill] sm:$0xff] %v8607_v32  ;;  %v8617_v57 = vpack.c.bf16 %v3236_v2, %v3232_v22  ;;  %v8619_v12 = vsub.f32 %v3202_v55, %v3232_v22 }
  0xf4   : > { %6749 = vmatpush1.bf16.msra.mxu1 %v6748_v30  ;;  %6655 = vmatprep.subr.bf16.mxu0 %v6654_v37  ;;  %10448 = vst [vmem:[#allocation2_spill] sm:$0xff] %v8601_v43  ;;  %10450 = vst [vmem:[#allocation9_spill] sm:$0xff] %v8605_v58  ;;  %v3208_v30 = vld [vmem:[%s8509_s22 + $0x58] sm:$0xff]  ;;  %v3992_v37 = vand.u32 4294901760, %v3962_v21  ;;  %v10453_v40 = vand.u32 4294901760, %v8360_v5  ;;  %v8623_v6 = vsub.f32 %v3204_v44, %v3236_v2  ;;  %v3242_v5 = vand.u32 4294901760, %v3205_v33 }
  0xf5   : > { %6751 = vmatprep.subr.bf16.mxu1 %v6750_v3  ;;  %10449 = vst [vmem:[#allocation3_spill] sm:$0xff] %v8603_v42  ;;  %v8613_v3 = vsub.f32 %v3957_v52, %v3986_v25  ;;  %10452 = vst [vmem:[#allocation4_spill] sm:$0xff] %v8617_v57  ;;  %v8625_v61 = vpack.c.bf16 %v3238_v39, %v3234_v63  ;;  %v3966_v52 = vld [vmem:[%s8521_s26 + $0x48] sm:$0xff]  ;;  %v3968_v25 = vld [vmem:[%s8521_s26 + $0x58] sm:$0xff]  ;;  %v8631_v29 = vsub.f32 %v3201_v54, %v3234_v63 }
  0xf6   : > { %v8633_v55 = vsub.f32 %v3203_v59, %v3238_v39  ;;  %v3246_v11 = vand.u32 4294901760, %v3207_v8  ;;  %v3965_v44 = vld [vmem:[%s8521_s26 + $0x40] sm:$0xff]  ;;  %v8637_v22 = vpack.c.bf16 %v3996_v46, %v3992_v37  ;;  %v8639_v2 = vsub.f32 %v3962_v21, %v3992_v37  ;;  %v3212_v57 = vld [vmem:[%s8509_s22 + $0x78] sm:$0xff] }
  0xf7   : > { %6657 = vmatpush1.bf16.msra.mxu0 %v6656_v19  ;;  %10454 = vst [vmem:[#allocation7_spill] sm:$0xff] %v8625_v61  ;;  %v3244_v19 = vand.u32 4294901760, %v3208_v30  ;;  %v8643_v17 = vpack.c.bf16 %v3998_v50, %v3994_v10  ;;  %v10458_v54 = vand.u32 4294901760, %v8177_v51  ;;  %v8647_v59 = vsub.f32 %v3961_v35, %v3994_v10  ;;  %v3210_v61 = vld [vmem:[%s8509_s22 + $0x68] sm:$0xff]  ;;  %v3209_v35 = vld [vmem:[%s8509_s22 + $0x60] sm:$0xff]  ;;  %v3211_v10 = vld [vmem:[%s8509_s22 + $0x70] sm:$0xff] }
  0xf8   : > { %6753 = vmatpush1.bf16.msra.mxu1 %v6752_v18  ;;  %2263 = vmatprep.subr.mxu0 %v10453_v40  ;;  %v3967_v18 = vld [vmem:[%s8521_s26 + $0x50] sm:$0xff]  ;;  %10456 = vst [vmem:[#allocation16_spill] sm:$0xff] %v8637_v22  ;;  %v8641_v40 = vsub.f32 %v3964_v41, %v3996_v46  ;;  %v8649_v63 = vsub.f32 %v3963_v15, %v3998_v50  ;;  %v4000_v39 = vand.u32 4294901760, %v3966_v52  ;;  %v6344_v22 = vld [vmem:[%s7508_s27 + $0x40] sm:$0xff]  ;;  %v10459_v21 = vand.u32 4294901760, %v8186_v4 }
  0xf9   : > { %3023 = vmatprep.subr.mxu1 %v10455_v26  ;;  %10457 = vst [vmem:[#allocation24_spill] sm:$0xff] %v8643_v17  ;;  %v4004_v26 = vand.u32 4294901760, %v3968_v25  ;;  %v8657_v41 = vpack.c.bf16 %v3244_v19, %v3240_v16  ;;  %v8659_v37 = vsub.f32 %v3206_v53, %v3240_v16  ;;  %v4002_v51 = vand.u32 4294901760, %v3965_v44 }
  0xfa   : > { %v4006_v46 = vand.u32 4294901760, %v3967_v18  ;;  %v8665_v15 = vsub.f32 %v3208_v30, %v3244_v19  ;;  %v8669_v4 = vsub.f32 %v3205_v33, %v3242_v5  ;;  %v8673_v53 = vsub.f32 %v3207_v8, %v3246_v11 }
  0xfb   : > { %2267 = vmatpush1.msra.mxu0 %v10458_v54  ;;  %10460 = vst [vmem:[#allocation25_spill] sm:$0xff] %v8657_v41  ;;  %v3248_v50 = vand.u32 4294901760, %v3210_v61  ;;  %v3252_v16 = vand.u32 4294901760, %v3212_v57  ;;  %v3219_v54 = vsel %vm178_vm0, %v6344_v22, 0  ;;  %v8680_v30 = vsub.f32 %v3966_v52, %v4000_v39  ;;  %v3971_v52 = vld [vmem:[%s8521_s26 + $0x70] sm:$0xff] }
  0xfc   : > { %6659 = vmatprep.subr.bf16.mxu0 %v10386_v1  ;;  %3027 = vmatpush1.msra.mxu1 %v10459_v21  ;;  %v8667_v1 = vpack.c.bf16 %v3246_v11, %v3242_v5  ;;  %10462 = vst [vmem:[#allocation40_spill] sm:$0xff] %v8673_v53  ;;  %v3250_v33 = vand.u32 4294901760, %v3209_v35  ;;  %v3254_v19 = vand.u32 4294901760, %v3211_v10  ;;  %v3972_v5 = vld [vmem:[%s8521_s26 + $0x78] sm:$0xff]  ;;  %v8686_v8 = vsub.f32 %v3968_v25, %v4004_v26  ;;  %v6352_v25 = vld [vmem:[%s7508_s27 + $0x50] sm:$0xff] }
  0xfd   : > { %2316 = vmatmul.mubr.f32.vlgmr.msra.gmra.mrb[4].mxu0 %v10381_v31  ;;  %6755 = vmatprep.subr.bf16.mxu1 %v10388_v14  ;;  %v8678_v14 = vpack.c.bf16 %v4004_v26, %v4000_v39  ;;  %v8688_v11 = vpack.c.bf16 %v4006_v46, %v4002_v51  ;;  %v8698_v22 = vand.u32 4294901760, %v3219_v54  ;;  %v8705_v39 = vsub.f32 %v3210_v61, %v3248_v50 }
  0xfe   : > { %10461 = vst [vmem:[#allocation31_spill] sm:$0xff] %v8667_v1  ;;  %6661 = vmatpush1.bf16.msra.mxu0 %v10389_v36  ;;  %3076 = vmatmul.mubr.f32.vlgmr.msra.gmra.mrb[4].mxu1 %v10382_v62  ;;  %v3970_v36 = vld [vmem:[%s8521_s26 + $0x68] sm:$0xff]  ;;  %v4012_v21 = vand.u32 4294901760, %v3972_v5  ;;  %v8719_v61 = vsub.f32 %v3209_v35, %v3250_v33  ;;  %v10476_v35 = vand.u32 4294901760, %v8590_v24 }
  0xff   : > { %6757 = vmatpush1.bf16.msra.mxu1 %v10391_v0  ;;  %6663 = vmatprep.subr.bf16.mxu0 %v10392_v23  ;;  %10463 = vst [vmem:[#allocation21_spill] sm:$0xff] %v8678_v14  ;;  %10464 = vst [vmem:[#allocation22_spill] sm:$0xff] %v8688_v11  ;;  %v8690_v0 = vsub.f32 %v3965_v44, %v4002_v51  ;;  %v8694_v23 = vsub.f32 %v3967_v18, %v4006_v46  ;;  %v4008_v26 = vand.u32 4294901760, %v3970_v36  ;;  %v10469_v18 = vld [vmem:[#allocation27_spill] sm:$0xff] }
 0x100   : > { %6759 = vmatprep.subr.bf16.mxu1 %v10393_v49  ;;  %2321 = vmatprep.mubr.f32.mxu0 %v10222_v48  ;;  %10467 = vst [vmem:[#allocation36_spill] sm:$0xff] %v8698_v22  ;;  %v8703_v44 = vpack.c.bf16 %v3252_v16, %v3248_v50  ;;  %v8709_v51 = vsub.f32 %v3212_v57, %v3252_v16  ;;  %v3969_v49 = vld [vmem:[%s8521_s26 + $0x60] sm:$0xff]  ;;  %10472 = vst [vmem:[#allocation13_spill] sm:$0xff] %v8719_v61  ;;  %v3979_v50 = vsel %vm178_vm0, %v6352_v25, 0  ;;  %v10478_v57 = vld [vmem:[#allocation28_spill] sm:$0xff] }
 0x101   : > { %10465 = vst [vmem:[#allocation26_spill] sm:$0xff] %v8690_v0  ;;  %2323 = vmatmul.mubr.f32.gmra.mrb[6].mxu0 %v8246_v45  ;;  %3081 = vmatprep.mubr.f32.mxu1 %v10222_v48  ;;  %10466 = vst [vmem:[#allocation19_spill] sm:$0xff] %v8694_v23  ;;  %v8711_v46 = vpack.c.bf16 %v3254_v19, %v3250_v33  ;;  %v10471_v0 = vld [vmem:[#allocation29_spill] sm:$0xff]  ;;  %v8725_v16 = vsub.f32 %v3211_v10, %v3254_v19  ;;  %v4010_v19 = vand.u32 4294901760, %v3969_v49  ;;  %v10481_v61 = vld [vmem:[#allocation30_spill] sm:$0xff] }
 0x102   : > { %6665 = vmatpush1.bf16.msra.mxu0 %v10394_v13  ;;  %3083 = vmatmul.mubr.f32.gmra.mrb[6].mxu1 %v8259_v20  ;;  %10468 = vst [vmem:[#allocation6_spill] sm:$0xff] %v8703_v44  ;;  %v3344_v33 = vsub.f32 %v8590_v24, %v10476_v35  ;;  %v8740_v25 = vpack.c.bf16 %v4012_v21, %v4008_v26  ;;  %v4014_v13 = vand.u32 4294901760, %v3971_v52  ;;  %v8750_v35 = vld [vmem:[%s8521_s26 + $0x88] sm:$0xff]  ;;  %v10486_v24 = vld [vmem:[#allocation37_spill] sm:$0xff] }
 0x103   : > { %6761 = vmatpush1.bf16.msra.mxu1 %v8027_v56  ;;  %6667 = vmatprep.subr.bf16.mxu0 %v10469_v18  ;;  %10470 = vst [vmem:[#allocation5_spill] sm:$0xff] %v8711_v46  ;;  %10473 = vst [vmem:[#allocation8_spill] sm:$0xff] %v8725_v16  ;;  %v8728_v18 = vld [vmem:[%s8509_s22 + $0x88] sm:$0xff]  ;;  %v8737_v56 = vsub.f32 %v3219_v54, %v8698_v22  ;;  %v8742_v10 = vsub.f32 %v3970_v36, %v4008_v26  ;;  %v3213_v16 = vld [vmem:[%s8509_s22 + $0x80] sm:$0xff]  ;;  %v10484_v54 = vand.u32 4294901760, %v8597_v28 }
 0x104   : > { %6763 = vmatprep.subr.bf16.mxu1 %v10471_v0  ;;  %2411 = vmatprep.mubr.f32.mxu0 %v10222_v48  ;;  %10474 = vst [vmem:[#allocation10_spill] sm:$0xff] %v8728_v18  ;;  %v10475_v0 = vand.u32 4294901760, %v8587_v7  ;;  %10479 = vst [vmem:[#allocation12_spill] sm:$0xff] %v8740_v25  ;;  %v10485_v22 = vand.u32 4294901760, %v8599_v34  ;;  %v8758_v26 = vand.u32 4294901760, %v3979_v50 }
 0x105   : > { %3171 = vmatprep.mubr.f32.mxu1 %v10222_v48  ;;  %10477 = vst [vmem:[#allocation23_spill] sm:$0xff] %v8737_v56  ;;  %10480 = vst [vmem:[#allocation41_spill] sm:$0xff] %v8742_v10  ;;  %v8761_v10 = vsub.f32 %v3969_v49, %v4010_v19  ;;  %v10492_v49 = vld [vmem:[#allocation33_spill] sm:$0xff] }
 0x106   : > { %v3332_v23 = vsub.f32 %v8587_v7, %v10475_v0  ;;  %6669 = vmatpush1.bf16.msra.mxu0 %v10478_v57  ;;  %v10482_v0 = vld [vmem:[#allocation32_spill] sm:$0xff]  ;;  %v8747_v7 = vsub.f32 %v3972_v5, %v4012_v21  ;;  %v3338_v57 = vsub.f32 %v8597_v28, %v10484_v54  ;;  %v3350_v36 = vsub.f32 %v8599_v34, %v10485_v22  ;;  %v3973_v5 = vld [vmem:[%s8521_s26 + $0x80] sm:$0xff] }
 0x107   : > { %6765 = vmatpush1.bf16.msra.mxu1 %v10481_v61  ;;  %6671 = vmatprep.subr.bf16.mxu0 %v10482_v0  ;;  %10487 = vst [vmem:[#allocation27_spill] sm:$0xff] %v8761_v10  ;;  %v8764_v61 = vand.u32 4294901760, %v8728_v18  ;;  %v10489_v21 = vand.u32 4294901760, %v8603_v42  ;;  %v10490_v54 = vand.u32 4294901760, %v8605_v58  ;;  %v3345_v34 = vand.u32 4294901760, %v3344_v33 }
 0x108   : > { %10483 = vst [vmem:[#allocation11_spill] sm:$0xff] %v8747_v7  ;;  %6767 = vmatprep.subr.bf16.mxu1 %v10486_v24  ;;  %v8773_v7 = vand.u32 4294901760, %v3213_v16  ;;  %v3333_v22 = vand.u32 4294901760, %v3332_v23  ;;  %v8777_v10 = vpack.c.bf16 %v4014_v13, %v4010_v19  ;;  %v8779_v18 = vsub.f32 %v3971_v52, %v4014_v13  ;;  %v10499_v19 = vld [vmem:[#allocation42_spill] sm:$0xff] }
 0x109   : > { %10488 = vst [vmem:[#allocation29_spill] sm:$0xff] %v8764_v61  ;;  %v4092_v0 = vsub.f32 %v8603_v42, %v10489_v21  ;;  %v4104_v28 = vsub.f32 %v8605_v58, %v10490_v54  ;;  %v8782_v61 = vand.u32 4294901760, %v8750_v35  ;;  %v10495_v42 = vld [vmem:[#allocation39_spill] sm:$0xff]  ;;  %v10496_v54 = vld [vmem:[#allocation38_spill] sm:$0xff]  ;;  %v8787_v23 = vand.u32 4294901760, %v3973_v5 }
 0x10a   : > { %10491 = vst [vmem:[#allocation28_spill] sm:$0xff] %v8773_v7  ;;  %6673 = vmatpush1.bf16.msra.mxu0 %v10492_v49  ;;  %10493 = vst [vmem:[#allocation30_spill] sm:$0xff] %v8777_v10  ;;  %v3339_v33 = vand.u32 4294901760, %v3338_v57  ;;  %v3351_v24 = vand.u32 4294901760, %v3350_v36  ;;  %v8790_v49 = vsub.f32 %v3979_v50, %v8758_v26  ;;  %v8794_v52 = vsub.f32 %v3213_v16, %v8773_v7 }
 0x10b   : > { %10494 = vst [vmem:[#allocation32_spill] sm:$0xff] %v8782_v61  ;;  %6769 = vmatpush1.bf16.msra.mxu1 %v10495_v42  ;;  %2362 = vmatprep.subr.mxu0 %v10496_v54  ;;  %10497 = vst [vmem:[#allocation37_spill] sm:$0xff] %v8787_v23  ;;  %v4093_v13 = vand.u32 4294901760, %v4092_v0  ;;  %v4105_v21 = vand.u32 4294901760, %v4104_v28  ;;  %v8797_v42 = vpack.c.bf16 %v3345_v34, %v3333_v22  ;;  %v10500_v57 = vand.u32 4294901760, %v8737_v56  ;;  %v6353_v22 = vld [vmem:[%s7508_s27 + $0x58] sm:$0xff] }
 0x10c   : > { %10498 = vst [vmem:[#allocation33_spill] sm:$0xff] %v8790_v49  ;;  %3122 = vmatprep.subr.mxu1 %v10499_v19  ;;  %v8800_v54 = vsub.f32 %v3973_v5, %v8787_v23  ;;  %v6345_v19 = vld [vmem:[%s7508_s27 + $0x48] sm:$0xff]  ;;  %v10501_v16 = vand.u32 4294901760, %v8613_v3  ;;  %v10070_v34 = vand.u32 4294901760, %v8623_v6  ;;  %v10071_v0 = vand.u32 4294901760, %v8631_v29 }
 0x10d   : > { %v8805_v50 = vsub.f32 %v8737_v56, %v10500_v57  ;;  %v8819_v57 = vpack.c.bf16 %v3351_v24, %v3339_v33  ;;  %v10074_v36 = vand.u32 4294901760, %v8790_v49  ;;  %v10502_v5 = vand.u32 4294901760, %v8615_v9 }
 0x10e   : > { %2364 = vmatpush1.msra.mxu0 %v10410_v60  ;;  %v4098_v28 = vsub.f32 %v8613_v3, %v10501_v16  ;;  %v10079_v60 = vand.u32 4294901760, %v8639_v2  ;;  %v8826_v16 = vpack.c.bf16 %v4105_v21, %v4093_v13  ;;  %v3222_v24 = vsel %vm178_vm0, %v6345_v19, 0 }
 0x10f   : > { %2413 = vmatmul.mubr.f32.vlgmr.msra.gmra.mrb[4].mxu0 %v10381_v31  ;;  %3124 = vmatpush1.msra.mxu1 %v10415_v38  ;;  %v4110_v31 = vsub.f32 %v8615_v9, %v10502_v5  ;;  %v10503_v58 = vand.u32 4294901760, %v8619_v12  ;;  %v3982_v13 = vsel %vm178_vm0, %v6353_v22, 0  ;;  %v3368_v19 = vsub.f32 %v8623_v6, %v10070_v34 }
 0x110   : > { %6771 = vmatprep.subr.bf16.mxu0 %v8585_v47  ;;  %3173 = vmatmul.mubr.f32.vlgmr.msra.gmra.mrb[4].mxu1 %v10382_v62  ;;  %v4099_v5 = vand.u32 4294901760, %v4098_v28  ;;  %v3362_v33 = vsub.f32 %v8631_v29, %v10071_v0  ;;  %v10504_v38 = vand.u32 4294901760, %v8633_v55  ;;  %v8857_v28 = vsub.f32 %v8790_v49, %v10074_v36 }
 0x111   : > { %6773 = vmatpush1.bf16.msra.mxu0 %v8592_v27  ;;  %6867 = vmatprep.subr.bf16.mxu1 %v8601_v43  ;;  %v3356_v62 = vsub.f32 %v8619_v12, %v10503_v58  ;;  %v4116_v22 = vsub.f32 %v8639_v2, %v10079_v60  ;;  %v10505_v34 = vand.u32 4294901760, %v8641_v40  ;;  %v8865_v21 = vand.u32 4294901760, %v3222_v24  ;;  %v10509_v60 = vld [vmem:[#allocation7_spill] sm:$0xff]  ;;  %v10510_v43 = vld [vmem:[#allocation16_spill] sm:$0xff] }
 0x112   : > { %6869 = vmatpush1.bf16.msra.mxu1 %v8607_v32  ;;  %2418 = vmatprep.mubr.f32.mxu0 %v10222_v48  ;;  %v3374_v58 = vsub.f32 %v8633_v55, %v10504_v38  ;;  %v10506_v38 = vld [vmem:[#allocation4_spill] sm:$0xff]  ;;  %v10507_v32 = vand.u32 4294901760, %v8647_v59  ;;  %v8873_v27 = vand.u32 4294901760, %v3982_v13  ;;  %v10511_v56 = vand.u32 4294901760, %v8649_v63 }
 0x113   : > { %2420 = vmatmul.mubr.f32.gmra.mrb[6].mxu0 %v8246_v45  ;;  %3178 = vmatprep.mubr.f32.mxu1 %v10222_v48  ;;  %v4128_v0 = vsub.f32 %v8641_v40, %v10505_v34  ;;  %v4111_v45 = vand.u32 4294901760, %v4110_v31  ;;  %v3357_v34 = vand.u32 4294901760, %v3356_v62  ;;  %v3363_v49 = vand.u32 4294901760, %v3362_v33 }
 0x114   : > { %6775 = vmatprep.subr.bf16.mxu0 %v10506_v38  ;;  %3180 = vmatmul.mubr.f32.gmra.mrb[6].mxu1 %v8259_v20  ;;  %v4122_v36 = vsub.f32 %v8647_v59, %v10507_v32  ;;  %10508 = vst [vmem:[#allocation39_spill] sm:$0xff] %v8873_v27  ;;  %v4134_v38 = vsub.f32 %v8649_v63, %v10511_v56  ;;  %v3369_v32 = vand.u32 4294901760, %v3368_v19  ;;  %v3375_v47 = vand.u32 4294901760, %v3374_v58 }
 0x115   : > { %6777 = vmatpush1.bf16.msra.mxu0 %v10509_v60  ;;  %6871 = vmatprep.subr.bf16.mxu1 %v10510_v43  ;;  %v4117_v56 = vand.u32 4294901760, %v4116_v22  ;;  %v4129_v43 = vand.u32 4294901760, %v4128_v0  ;;  %v8889_v20 = vsub.f32 %v3222_v24, %v8865_v21  ;;  %v8892_v31 = vpack.c.bf16 %v4111_v45, %v4099_v5  ;;  %v10518_v45 = vld [vmem:[#allocation19_spill] sm:$0xff] }
 0x116   : > { %6873 = vmatpush1.bf16.msra.mxu1 %v8643_v17  ;;  %6779 = vmatprep.subr.bf16.mxu0 %v8657_v41  ;;  %v4123_v19 = vand.u32 4294901760, %v4122_v36  ;;  %v10513_v33 = vand.u32 4294901760, %v8659_v37  ;;  %v8900_v60 = vsub.f32 %v3982_v13, %v8873_v27  ;;  %v4135_v22 = vand.u32 4294901760, %v4134_v38  ;;  %v10528_v27 = vld [vmem:[#allocation8_spill] sm:$0xff] }
 0x117   : > { %6875 = vmatprep.subr.bf16.mxu1 %v8678_v14  ;;  %3306 = vmatprep.mubr.f32.mxu0 %v10222_v48  ;;  %10512 = vst [vmem:[#allocation38_spill] sm:$0xff] %v8889_v20  ;;  %v10514_v0 = vand.u32 4294901760, %v8665_v15  ;;  %v10515_v5 = vand.u32 4294901760, %v8669_v4  ;;  %v6790_v13 = vpack.c.bf16 %v3369_v32, %v3357_v34  ;;  %v10516_v38 = vand.u32 4294901760, %v8673_v53 }
 0x118   : > { %4066 = vmatprep.mubr.f32.mxu1 %v10222_v48  ;;  %v8897_v58 = vsub.f32 %v8659_v37, %v10513_v33  ;;  %v8916_v33 = vpack.c.bf16 %v3375_v47, %v3363_v49  ;;  %v10519_v41 = vand.u32 4294901760, %v8680_v30  ;;  %v10522_v47 = vld [vmem:[#allocation11_spill] sm:$0xff] }
 0x119   : > { %6781 = vmatpush1.bf16.msra.mxu0 %v8667_v1  ;;  %v8906_v24 = vsub.f32 %v8665_v15, %v10514_v0  ;;  %v8911_v36 = vsub.f32 %v8669_v4, %v10515_v5  ;;  %v8921_v62 = vsub.f32 %v8673_v53, %v10516_v38  ;;  %v10100_v0 = vand.u32 4294901760, %v8686_v8  ;;  %v10517_v1 = vld [vmem:[#allocation26_spill] sm:$0xff] }
 0x11a   : > { %6877 = vmatpush1.bf16.msra.mxu1 %v8688_v11  ;;  %6783 = vmatprep.subr.bf16.mxu0 %v8703_v44  ;;  %v6886_v5 = vpack.c.bf16 %v4129_v43, %v4117_v56  ;;  %v10107_v14 = vand.u32 4294901760, %v10517_v1  ;;  %v3381_v34 = vand.u32 4294901760, %v8897_v58  ;;  %v8933_v38 = vpack.c.bf16 %v4135_v22, %v4123_v19  ;;  %v10520_v58 = vld [vmem:[#allocation29_spill] sm:$0xff] }
 0x11b   : > { %6879 = vmatprep.subr.bf16.mxu1 %v8740_v25  ;;  %v3393_v43 = vand.u32 4294901760, %v8906_v24  ;;  %v3387_v56 = vand.u32 4294901760, %v8911_v36  ;;  %v4140_v11 = vsub.f32 %v8680_v30, %v10519_v41  ;;  %v3399_v49 = vand.u32 4294901760, %v8921_v62  ;;  %v10521_v19 = vld [vmem:[#allocation41_spill] sm:$0xff] }
 0x11c   : > { %v4152_v32 = vsub.f32 %v8686_v8, %v10100_v0  ;;  %v4146_v41 = vsub.f32 %v10517_v1, %v10107_v14  ;;  %v10523_v36 = vand.u32 4294901760, %v10518_v45  ;;  %v10525_v25 = vand.u32 4294901760, %v8889_v20 }
 0x11d   : > { %6785 = vmatpush1.bf16.msra.mxu0 %v8711_v46  ;;  %v10524_v46 = vld [vmem:[#allocation13_spill] sm:$0xff]  ;;  %v10526_v22 = vand.u32 4294901760, %v8705_v39  ;;  %v10527_v44 = vand.u32 4294901760, %v8709_v51  ;;  %v10529_v1 = vand.u32 4294901760, %v8900_v60  ;;  %v4141_v62 = vand.u32 4294901760, %v4140_v11 }
 0x11e   : > { %6881 = vmatpush1.bf16.msra.mxu1 %v8777_v10  ;;  %3257 = vmatprep.subr.mxu0 %v10520_v58  ;;  %v4158_v10 = vsub.f32 %v10518_v45, %v10523_v36  ;;  %v3321_v0 = vsub.f32 %v8889_v20, %v10525_v25  ;;  %v10530_v45 = vld [vmem:[#allocation27_spill] sm:$0xff]  ;;  %v10531_v20 = vld [vmem:[#allocation10_spill] sm:$0xff]  ;;  %v10532_v14 = vand.u32 4294901760, %v10521_v19  ;;  %v8986_v25 = vsub.f32 %v8750_v35, %v8782_v61 }
 0x11f   : > { %4017 = vmatprep.subr.mxu1 %v8782_v61  ;;  %v3404_v24 = vsub.f32 %v8705_v39, %v10526_v22  ;;  %v3416_v17 = vsub.f32 %v8709_v51, %v10527_v44  ;;  %v4081_v36 = vsub.f32 %v8900_v60, %v10529_v1  ;;  %v8974_v22 = vsub.f32 %v10531_v20, %v10520_v58 }
 0x120   : > { %v4153_v44 = vand.u32 4294901760, %v4152_v32  ;;  %v4164_v1 = vsub.f32 %v10521_v19, %v10532_v14  ;;  %v10534_v20 = vand.u32 4294901760, %v8805_v50  ;;  %v4159_v53 = vand.u32 4294901760, %v4158_v10 }
 0x121   : > { %3259 = vmatpush1.msra.mxu0 %v8773_v7  ;;  %v10533_v7 = vand.u32 4294901760, %v10522_v47  ;;  %v10535_v32 = vand.u32 4294901760, %v10524_v46  ;;  %v3322_v14 = vand.u32 4294901760, %v3321_v0  ;;  %v3405_v58 = vand.u32 4294901760, %v3404_v24 }
 0x122   : > { %6787 = vmatprep.subr.bf16.mxu0 %v8797_v42  ;;  %4019 = vmatpush1.msra.mxu1 %v8787_v23  ;;  %v4147_v42 = vand.u32 4294901760, %v4146_v41  ;;  %v3417_v35 = vand.u32 4294901760, %v3416_v17  ;;  %v10537_v61 = vand.u32 4294901760, %v10528_v27  ;;  %v6794_v10 = vpack.c.bf16 %v3393_v43, %v3381_v34 }
 0x123   : > { %v4176_v11 = vsub.f32 %v10522_v47, %v10533_v7  ;;  %3312 = vmatmul.mubr.f32.vlgmr.msra.gmra.mrb[8].mxu0 %v10534_v20  ;;  %6883 = vmatprep.subr.bf16.mxu1 %v8826_v16  ;;  %v3410_v23 = vsub.f32 %v10524_v46, %v10535_v32  ;;  %v10536_v7 = vand.u32 4294901760, %v8857_v28  ;;  %v4082_v20 = vand.u32 4294901760, %v4081_v36 }
 0x124   : > { %6789 = vmatpush1.bf16.msra.mxu0 %v8819_v57  ;;  %v3422_v50 = vsub.f32 %v10528_v27, %v10537_v61  ;;  %v10538_v16 = vand.u32 4294901760, %v10530_v45  ;;  %v10539_v57 = vand.u32 4294901760, %v8779_v18  ;;  %v10124_v24 = vand.u32 4294901760, %v8974_v22  ;;  %3317 = vmatprep.mubr.f32.mxu0 %v10222_v48 }
 0x125   : > { %4072 = vmatmul.mubr.f32.vlgmr.msra.gmra.mrb[8].mxu1 %v10536_v7  ;;  %6791 = vmatprep.subr.bf16.mxu0 %v6790_v13  ;;  %v6890_v17 = vpack.c.bf16 %v4153_v44, %v4141_v62  ;;  %v4165_v41 = vand.u32 4294901760, %v4164_v1  ;;  %v4177_v32 = vand.u32 4294901760, %v4176_v11  ;;  %v10123_v61 = vand.u32 4294901760, %v8986_v25  ;;  %v10540_v7 = vld [vmem:[#allocation15_spill] sm:$0xff] }
 0x126   : > { %6885 = vmatpush1.bf16.msra.mxu1 %v8892_v31  ;;  %v4170_v0 = vsub.f32 %v10530_v45, %v10538_v16  ;;  %v4182_v28 = vsub.f32 %v8779_v18, %v10539_v57  ;;  %v6796_v31 = vpack.c.bf16 %v3399_v49, %v3387_v56  ;;  %v6892_v13 = vpack.c.bf16 %v4159_v53, %v4147_v42  ;;  %v10543_v16 = vld [vmem:[#allocation9_spill] sm:$0xff]  ;;  %v10544_v57 = vld [vmem:[#allocation34_spill] sm:$0xff] }
 0x127   : > { %6887 = vmatprep.subr.bf16.mxu1 %v6886_v5  ;;  %3323 = vmatmul.mubr.f32.gmra.mrb[10].mxu0 %v3322_v14  ;;  %v6798_v34 = vpack.c.bf16 %v3417_v35, %v3405_v58  ;;  %v3411_v43 = vand.u32 4294901760, %v3410_v23  ;;  %v3423_v36 = vand.u32 4294901760, %v3422_v50  ;;  %v10122_v5 = vand.u32 4294901760, %v8794_v52  ;;  %v10541_v35 = vld [vmem:[#allocation14_spill] sm:$0xff] }
 0x128   : > { %4077 = vmatprep.mubr.f32.mxu1 %v10222_v48  ;;  %6793 = vmatpush1.bf16.msra.mxu0 %v8916_v33  ;;  %v4171_v62 = vand.u32 4294901760, %v4170_v0  ;;  %v4183_v44 = vand.u32 4294901760, %v4182_v28  ;;  %v3428_v53 = vsub.f32 %v8974_v22, %v10124_v24  ;;  %v10121_v49 = vand.u32 4294901760, %v8800_v54  ;;  %v10545_v28 = vld [vmem:[#allocation35_spill] sm:$0xff] }
 0x129   : > { %4083 = vmatmul.mubr.f32.gmra.mrb[10].mxu1 %v4082_v20  ;;  %6795 = vmatprep.subr.bf16.mxu0 %v6794_v10  ;;  %v6894_v56 = vpack.c.bf16 %v4177_v32, %v4165_v41  ;;  %v4188_v23 = vsub.f32 %v8986_v25, %v10123_v61  ;;  %v6800_v33 = vpack.c.bf16 %v3423_v36, %v3411_v43  ;;  %v10542_v10 = vld [vmem:[#allocation3_spill] sm:$0xff]  ;;  %v10571_v61 = vand.u32 4294901760, %v10540_v7 }
 0x12a   : > { %6889 = vmatpush1.bf16.msra.mxu1 %v8933_v38  ;;  %3483 = vmatprep.mubr.f32.mxu0 %v10222_v48  ;;  %v3434_v38 = vsub.f32 %v8794_v52, %v10122_v5  ;;  %v6896_v58 = vpack.c.bf16 %v4183_v44, %v4171_v62  ;;  %v3429_v1 = vand.u32 4294901760, %v3428_v53  ;;  %v4194_v11 = vsub.f32 %v8800_v54, %v10121_v49  ;;  %v10547_v44 = vld [vmem:[#allocation40_spill] sm:$0xff]  ;;  %v10569_v49 = vld [vmem:[#allocation30_spill] sm:$0xff]  ;;  %v10570_v5 = vld [vmem:[#allocation29_spill] sm:$0xff] }
 0x12b   : > { %6891 = vmatprep.subr.bf16.mxu1 %v6890_v17  ;;  %4243 = vmatprep.mubr.f32.mxu1 %v10222_v48  ;;  %v4189_v42 = vand.u32 4294901760, %v4188_v23  ;;  %v6802_v50 = vpack.c.bf16 %v10541_v35, %v10540_v7  ;;  %v6898_v0 = vpack.c.bf16 %v10543_v16, %v10542_v10  ;;  %v6804_v17 = vpack.c.bf16 %v10545_v28, %v10544_v57  ;;  %v10549_v23 = vld [vmem:[#allocation26_spill] sm:$0xff] }
 0x12c   : > { %6797 = vmatpush1.bf16.msra.mxu0 %v6796_v31  ;;  %v3435_v14 = vand.u32 4294901760, %v3434_v38  ;;  %v4195_v20 = vand.u32 4294901760, %v4194_v11  ;;  %v6900_v41 = vpack.c.bf16 %v8615_v9, %v8613_v3  ;;  %v6806_v32 = vpack.c.bf16 %v8623_v6, %v8619_v12 }
 0x12d   : > { %6799 = vmatprep.subr.bf16.mxu0 %v6798_v34  ;;  %v6902_v31 = vpack.c.bf16 %v8641_v40, %v8639_v2  ;;  %v6808_v34 = vpack.c.bf16 %v8633_v55, %v8631_v29  ;;  %v6904_v43 = vpack.c.bf16 %v8649_v63, %v8647_v59  ;;  %v6810_v36 = vpack.c.bf16 %v8665_v15, %v8659_v37 }
 0x12e   : > { %6893 = vmatpush1.bf16.msra.mxu1 %v6892_v13  ;;  %v10546_v13 = vld [vmem:[#allocation36_spill] sm:$0xff]  ;;  %v6906_v62 = vpack.c.bf16 %v8686_v8, %v8680_v30  ;;  %v6812_v53 = vpack.c.bf16 %v10547_v44, %v8669_v4  ;;  %v6816_v11 = vpack.c.bf16 %v10528_v27, %v10524_v46  ;;  %v10572_v24 = vand.u32 4294901760, %v10541_v35 }
 0x12f   : > { %6895 = vmatprep.subr.bf16.mxu1 %v6894_v56  ;;  %v10548_v56 = vld [vmem:[#allocation39_spill] sm:$0xff]  ;;  %v10580_v7 = vand.u32 4294901760, %v8615_v9 }
 0x130   : > { %6801 = vmatpush1.bf16.msra.mxu0 %v6800_v33  ;;  %v10550_v33 = vld [vmem:[#allocation19_spill] sm:$0xff] }
 0x131   : > { %3430 = vmatprep.subr.mxu0 %v3429_v1  ;;  %v6908_v38 = vpack.c.bf16 %v10550_v33, %v10549_v23  ;;  %v6910_v1 = vpack.c.bf16 %v10522_v47, %v10521_v19 }
 0x132   : > { %6897 = vmatpush1.bf16.msra.mxu1 %v6896_v58  ;;  %v6814_v58 = vpack.c.bf16 %v8709_v51, %v8705_v39 }
 0x133   : > { %4190 = vmatprep.subr.mxu1 %v4189_v42  ;;  %v6912_v42 = vpack.c.bf16 %v8779_v18, %v10530_v45 }
 0x134   : > { %3436 = vmatpush1.msra.mxu0 %v3435_v14  ;;  %v10551_v14 = vld [vmem:[#allocation17_spill] sm:$0xff] }
 0x135   : > { %6803 = vmatprep.subr.bf16.mxu0 %v6802_v50  ;;  %3485 = vmatmul.mubr.f32.vlgmr.msra.gmra.mrb[8].mxu0 %v10546_v13  ;;  %v10552_v50 = vld [vmem:[#allocation23_spill] sm:$0xff] }
 0x136   : > { %4196 = vmatpush1.msra.mxu1 %v4195_v20  ;;  %6805 = vmatpush1.bf16.msra.mxu0 %v6804_v17  ;;  %v10553_v20 = vld [vmem:[#allocation2_spill] sm:$0xff]  ;;  %v10555_v17 = vld [vmem:[#allocation33_spill] sm:$0xff] }
 0x137   : > { %6899 = vmatprep.subr.bf16.mxu1 %v6898_v0  ;;  %4245 = vmatmul.mubr.f32.vlgmr.msra.gmra.mrb[8].mxu1 %v8758_v26  ;;  %v10554_v0 = vld [vmem:[#allocation18_spill] sm:$0xff]  ;;  %v10587_v9 = vand.u32 4294901760, %v10555_v17 }
 0x138   : > { %6901 = vmatpush1.bf16.msra.mxu1 %v6900_v41  ;;  %6807 = vmatprep.subr.bf16.mxu0 %v6806_v32  ;;  %v10556_v41 = vld [vmem:[#allocation20_spill] sm:$0xff] }
 0x139   : > { %6903 = vmatprep.subr.bf16.mxu1 %v6902_v31  ;;  %3490 = vmatprep.mubr.f32.mxu0 %v10222_v48  ;;  %v10557_v32 = vld [vmem:[#allocation4_spill] sm:$0xff] }
 0x13a   : > { %3492 = vmatmul.mubr.f32.gmra.mrb[10].mxu0 %v8865_v21  ;;  %4250 = vmatprep.mubr.f32.mxu1 %v10222_v48  ;;  %v10558_v31 = vld [vmem:[#allocation16_spill] sm:$0xff] }
 0x13b   : > { %6809 = vmatpush1.bf16.msra.mxu0 %v6808_v34  ;;  %4252 = vmatmul.mubr.f32.gmra.mrb[10].mxu1 %v10548_v56  ;;  %v10559_v34 = vld [vmem:[#allocation38_spill] sm:$0xff] }
 0x13c   : > { %6905 = vmatpush1.bf16.msra.mxu1 %v6904_v43  ;;  %6811 = vmatprep.subr.bf16.mxu0 %v6810_v36  ;;  %v10560_v43 = vld [vmem:[#allocation7_spill] sm:$0xff]  ;;  %v10561_v36 = vld [vmem:[#allocation24_spill] sm:$0xff] }
 0x13d   : > { %6907 = vmatprep.subr.bf16.mxu1 %v6906_v62  ;;  %3598 = vmatprep.mubr.f32.mxu0 %v10222_v48  ;;  %v10562_v62 = vld [vmem:[#allocation25_spill] sm:$0xff] }
 0x13e   : > { %4358 = vmatprep.mubr.f32.mxu1 %v10222_v48 }
 0x13f   : > { %6813 = vmatpush1.bf16.msra.mxu0 %v6812_v53  ;;  %v10563_v53 = vld [vmem:[#allocation21_spill] sm:$0xff] }
 0x140   : > { %6909 = vmatpush1.bf16.msra.mxu1 %v6908_v38  ;;  %6815 = vmatprep.subr.bf16.mxu0 %v6814_v58  ;;  %v10564_v38 = vld [vmem:[#allocation31_spill] sm:$0xff]  ;;  %v10565_v58 = vld [vmem:[#allocation22_spill] sm:$0xff] }
 0x141   : > { %6911 = vmatprep.subr.bf16.mxu1 %v6910_v1  ;;  %v10566_v1 = vld [vmem:[#allocation6_spill] sm:$0xff] }
 0x143   : > { %6817 = vmatpush1.bf16.msra.mxu0 %v6816_v11  ;;  %v10567_v11 = vld [vmem:[#allocation12_spill] sm:$0xff] }
 0x144   : > { %6913 = vmatpush1.bf16.msra.mxu1 %v6912_v42  ;;  %3548 = vmatprep.subr.mxu0 %v8974_v22  ;;  %v10568_v42 = vld [vmem:[#allocation5_spill] sm:$0xff] }
 0x145   : > { %4308 = vmatprep.subr.mxu1 %v8986_v25 }
 0x147   : > { %3551 = vmatpush1.msra.mxu0 %v8794_v52 }
 0x148   : > { %6819 = vmatprep.subr.bf16.mxu0 %v10551_v14  ;;  %4311 = vmatpush1.msra.mxu1 %v8800_v54 }
 0x149   : > { %3601 = vmatmul.mubr.f32.vlgmr.msra.gmra.mrb[8].mxu0 %v10552_v50  ;;  %6915 = vmatprep.subr.bf16.mxu1 %v10553_v20 }
 0x14a   : > { %6821 = vmatpush1.bf16.msra.mxu0 %v10554_v0  ;;  %4361 = vmatmul.mubr.f32.vlgmr.msra.gmra.mrb[8].mxu1 %v10555_v17  ;;  %v10592_v17 = vand.u32 4294901760, %v8659_v37 }
 0x14b   : > { %6917 = vmatpush1.bf16.msra.mxu1 %v10556_v41  ;;  %6823 = vmatprep.subr.bf16.mxu0 %v10557_v32 }
 0x14c   : > { %6919 = vmatprep.subr.bf16.mxu1 %v10558_v31  ;;  %3606 = vmatprep.mubr.f32.mxu0 %v10222_v48 }
 0x14d   : > { %3609 = vmatmul.mubr.f32.gmra.mrb[10].mxu0 %v10559_v34  ;;  %4366 = vmatprep.mubr.f32.mxu1 %v10222_v48 }
 0x14e   : > { %6825 = vmatpush1.bf16.msra.mxu0 %v10560_v43  ;;  %4369 = vmatmul.mubr.f32.gmra.mrb[10].mxu1 %v8900_v60 }
 0x14f   : > { %6921 = vmatpush1.bf16.msra.mxu1 %v10561_v36  ;;  %6827 = vmatprep.subr.bf16.mxu0 %v10562_v62  ;;  %v10577_v62 = vand.u32 4294901760, %v10545_v28  ;;  %v10583_v28 = vld [vmem:[#allocation37_spill] sm:$0xff] }
 0x150   : > { %6923 = vmatprep.subr.bf16.mxu1 %v10563_v53  ;;  %3697 = vmatprep.mubr.f32.mxu0 %v10222_v48  ;;  %v10575_v53 = vand.u32 4294901760, %v10543_v16  ;;  %v10582_v16 = vand.u32 4294901760, %v8623_v6  ;;  %v10589_v6 = vand.u32 4294901760, %v8633_v55  ;;  %v10594_v55 = vand.u32 4294901760, %v8680_v30  ;;  %v5479_v30 = vld [vmem:[%s9138_s12 + $0x10] sm:$0xff] }
 0x151   : > { %4457 = vmatprep.mubr.f32.mxu1 %v10222_v48 }
 0x152   : > { %6829 = vmatpush1.bf16.msra.mxu0 %v10564_v38  ;;  %v6834_v38 = vpack.c.bf16 %v10572_v24, %v10571_v61  ;;  %v10578_v24 = vld [vmem:[#allocation28_spill] sm:$0xff]  ;;  %v10579_v61 = vand.u32 4294901760, %v8613_v3  ;;  %v4718_v3 = vld [vmem:[%s9116_s6 + $0x8] sm:$0xff] }
 0x153   : > { %6925 = vmatpush1.bf16.msra.mxu1 %v10565_v58  ;;  %6831 = vmatprep.subr.bf16.mxu0 %v10566_v1  ;;  %v10573_v58 = vld [vmem:[#allocation32_spill] sm:$0xff]  ;;  %v10574_v1 = vand.u32 4294901760, %v10542_v10  ;;  %v10581_v10 = vand.u32 4294901760, %v8619_v12  ;;  %v10588_v12 = vand.u32 4294901760, %v8631_v29 }
 0x154   : > { %6927 = vmatprep.subr.bf16.mxu1 %v10567_v11  ;;  %v6932_v35 = vpack.c.bf16 %v10580_v7, %v10579_v61  ;;  %v10591_v61 = vand.u32 4294901760, %v8649_v63  ;;  %v10593_v7 = vand.u32 4294901760, %v8665_v15  ;;  %v4744_v63 = vand.u32 4294901760, %v4718_v3 }
 0x155   : > { %v6930_v11 = vpack.c.bf16 %v10575_v53, %v10574_v1  ;;  %v10585_v53 = vand.u32 4294901760, %v8641_v40  ;;  %v4720_v40 = vld [vmem:[%s9116_s6 + $0x18] sm:$0xff] }
 0x156   : > { %6833 = vmatpush1.bf16.msra.mxu0 %v10568_v42  ;;  %v10576_v42 = vand.u32 4294901760, %v10544_v57  ;;  %v6838_v57 = vpack.c.bf16 %v10582_v16, %v10581_v10  ;;  %v6842_v29 = vpack.c.bf16 %v10593_v7, %v10592_v17  ;;  %v10595_v10 = vand.u32 4294901760, %v8686_v8  ;;  %v4722_v17 = vld [vmem:[%s9116_s6 + $0x28] sm:$0xff]  ;;  %v4724_v7 = vld [vmem:[%s9116_s6 + $0x38] sm:$0xff] }
 0x157   : > { %6929 = vmatpush1.bf16.msra.mxu1 %v10569_v49  ;;  %3648 = vmatprep.subr.mxu0 %v10570_v5  ;;  %v4748_v37 = vand.u32 4294901760, %v4720_v40  ;;  %v10597_v8 = vand.u32 4294901760, %v8669_v4 }
 0x158   : > { %4408 = vmatprep.subr.mxu1 %v10573_v58  ;;  %v6836_v36 = vpack.c.bf16 %v10577_v62, %v10576_v42  ;;  %v10584_v62 = vand.u32 4294901760, %v8639_v2  ;;  %v10586_v42 = vand.u32 4294901760, %v10552_v50  ;;  %v6840_v2 = vpack.c.bf16 %v10589_v6, %v10588_v12  ;;  %v4717_v50 = vld [vmem:[%s9116_s6] sm:$0xff] }
 0x159   : > { %v6938_v16 = vpack.c.bf16 %v10595_v10, %v10594_v55  ;;  %v4746_v15 = vand.u32 4294901760, %v4717_v50  ;;  %v10601_v12 = vand.u32 4294901760, %v10550_v33  ;;  %v5510_v33 = vand.u32 4294901760, %v5479_v30  ;;  %v4723_v55 = vld [vmem:[%s9116_s6 + $0x30] sm:$0xff] }
 0x15a   : > { %3650 = vmatpush1.msra.mxu0 %v10578_v24  ;;  %v6934_v1 = vpack.c.bf16 %v10585_v53, %v10584_v62  ;;  %v5477_v53 = vld [vmem:[%s9138_s12] sm:$0xff]  ;;  %v10607_v10 = vand.u32 4294901760, %v10528_v27  ;;  %v4752_v27 = vand.u32 4294901760, %v4722_v17 }
 0x15b   : > { %6835 = vmatprep.subr.bf16.mxu0 %v6834_v38  ;;  %4410 = vmatpush1.msra.mxu1 %v10583_v28  ;;  %v4719_v38 = vld [vmem:[%s9116_s6 + $0x10] sm:$0xff] }
 0x15c   : > { %3701 = vmatmul.mubr.f32.vlgmr.msra.gmra.mrb[8].mxu0 %v10586_v42  ;;  %6931 = vmatprep.subr.bf16.mxu1 %v6930_v11  ;;  %v10590_v11 = vand.u32 4294901760, %v8647_v59  ;;  %v10596_v59 = vand.u32 4294901760, %v10559_v34  ;;  %v4750_v62 = vand.u32 4294901760, %v4719_v38  ;;  %v10599_v34 = vand.u32 4294901760, %v8900_v60 }
 0x15d   : > { %6837 = vmatpush1.bf16.msra.mxu0 %v6836_v36  ;;  %4461 = vmatmul.mubr.f32.vlgmr.msra.gmra.mrb[8].mxu1 %v10587_v9  ;;  %v10600_v9 = vand.u32 4294901760, %v10549_v23  ;;  %v10604_v60 = vand.u32 4294901760, %v10521_v19  ;;  %v5506_v23 = vand.u32 4294901760, %v5477_v53  ;;  %v10609_v19 = vand.u32 4294901760, %v8779_v18  ;;  %v5484_v18 = vld [vmem:[%s9138_s12 + $0x38] sm:$0xff] }
 0x15e   : > { %6933 = vmatpush1.bf16.msra.mxu1 %v6932_v35  ;;  %6839 = vmatprep.subr.bf16.mxu0 %v6838_v57  ;;  %v6936_v36 = vpack.c.bf16 %v10591_v61, %v10590_v11  ;;  %v5478_v35 = vld [vmem:[%s9138_s12 + $0x8] sm:$0xff]  ;;  %v5480_v57 = vld [vmem:[%s9138_s12 + $0x18] sm:$0xff]  ;;  %v10602_v11 = vand.u32 4294901760, %v8705_v39  ;;  %v4721_v39 = vld [vmem:[%s9116_s6 + $0x20] sm:$0xff] }
 0x15f   : > { %6935 = vmatprep.subr.bf16.mxu1 %v6934_v1  ;;  %3706 = vmatprep.mubr.f32.mxu0 %v10222_v48  ;;  %v10598_v1 = vand.u32 4294901760, %v10547_v44  ;;  %v6940_v6 = vpack.c.bf16 %v10601_v12, %v10600_v9  ;;  %v5504_v61 = vand.u32 4294901760, %v5478_v35  ;;  %v5508_v44 = vand.u32 4294901760, %v5480_v57 }
 0x160   : > { %3710 = vmatmul.mubr.f32.gmra.mrb[10].mxu0 %v10596_v59  ;;  %4466 = vmatprep.mubr.f32.mxu1 %v10222_v48  ;;  %v4756_v9 = vand.u32 4294901760, %v4724_v7  ;;  %v9211_v12 = vsub.f32 %v4717_v50, %v4746_v15  ;;  %v4728_v50 = vld [vmem:[%s9116_s6 + $0x58] sm:$0xff] }
 0x161   : > { %6841 = vmatpush1.bf16.msra.mxu0 %v6840_v2  ;;  %v6844_v42 = vpack.c.bf16 %v10598_v1, %v10597_v8  ;;  %4470 = vmatmul.mubr.f32.gmra.mrb[10].mxu1 %v10599_v34  ;;  %v10603_v2 = vand.u32 4294901760, %v8709_v51  ;;  %v10606_v51 = vand.u32 4294901760, %v10524_v46  ;;  %v9203_v1 = vpack.c.bf16 %v4750_v62, %v4746_v15 }
 0x162   : > { %6937 = vmatpush1.bf16.msra.mxu1 %v6936_v36  ;;  %6843 = vmatprep.subr.bf16.mxu0 %v6842_v29  ;;  %v10605_v36 = vand.u32 4294901760, %v10522_v47  ;;  %v9201_v47 = vpack.c.bf16 %v4748_v37, %v4744_v63  ;;  %v9205_v34 = vsub.f32 %v4718_v3, %v4744_v63  ;;  %v9207_v46 = vsub.f32 %v4720_v40, %v4748_v37  ;;  %v5481_v3 = vld [vmem:[%s9138_s12 + $0x20] sm:$0xff]  ;;  %v5483_v63 = vld [vmem:[%s9138_s12 + $0x30] sm:$0xff] }
 0x163   : > { %v6846_v4 = vpack.c.bf16 %v10603_v2, %v10602_v11  ;;  %6939 = vmatprep.subr.bf16.mxu1 %v6938_v16  ;;  %3834 = vmatprep.mubr.f32.mxu0 %v10222_v48  ;;  %v6848_v59 = vpack.c.bf16 %v10607_v10, %v10606_v51  ;;  %v10608_v16 = vand.u32 4294901760, %v10530_v45  ;;  %10611 = vst [vmem:[#allocation41_spill] sm:$0xff] %v9203_v1  ;;  %v5482_v45 = vld [vmem:[%s9138_s12 + $0x28] sm:$0xff]  ;;  %10614 = vst [vmem:[#allocation8_spill] sm:$0xff] %v9211_v12 }
 0x164   : > { %v6942_v29 = vpack.c.bf16 %v10605_v36, %v10604_v60  ;;  %4594 = vmatprep.mubr.f32.mxu1 %v10222_v48  ;;  %10610 = vst [vmem:[#allocation42_spill] sm:$0xff] %v9201_v47  ;;  %10612 = vst [vmem:[#allocation11_spill] sm:$0xff] %v9205_v34  ;;  %v9213_v11 = vpack.c.bf16 %v5508_v44, %v5504_v61  ;;  %v4754_v2 = vand.u32 4294901760, %v4721_v39  ;;  %v5512_v51 = vand.u32 4294901760, %v5482_v45 }
 0x165   : > { %v6944_v8 = vpack.c.bf16 %v10609_v19, %v10608_v16  ;;  %6845 = vmatpush1.bf16.msra.mxu0 %v6844_v42  ;;  %10613 = vst [vmem:[#allocation13_spill] sm:$0xff] %v9207_v46  ;;  %v4758_v42 = vand.u32 4294901760, %v4723_v55  ;;  %v9217_v40 = vsub.f32 %v4719_v38, %v4750_v62  ;;  %v9219_v37 = vsub.f32 %v5478_v35, %v5504_v61  ;;  %v4727_v38 = vld [vmem:[%s9116_s6 + $0x50] sm:$0xff]  ;;  %v5486_v16 = vld [vmem:[%s9138_s12 + $0x48] sm:$0xff] }
 0x166   : > { %6941 = vmatpush1.bf16.msra.mxu1 %v6940_v6  ;;  %6847 = vmatprep.subr.bf16.mxu0 %v6846_v4  ;;  %10615 = vst [vmem:[#allocation27_spill] sm:$0xff] %v9213_v11  ;;  %v9221_v60 = vsub.f32 %v5480_v57, %v5508_v44  ;;  %v9223_v36 = vpack.c.bf16 %v5510_v33, %v5506_v23  ;;  %v4726_v6 = vld [vmem:[%s9116_s6 + $0x48] sm:$0xff]  ;;  %v5516_v10 = vand.u32 4294901760, %v5484_v18  ;;  %v5514_v62 = vand.u32 4294901760, %v5481_v3  ;;  %v9270_v11 = vld [vmem:[%s9116_s6 + $0x78] sm:$0xff] }
 0x167   : > { %6943 = vmatprep.subr.bf16.mxu1 %v6942_v29  ;;  %10616 = vst [vmem:[#allocation10_spill] sm:$0xff] %v9217_v40  ;;  %v9227_v15 = vsub.f32 %v5477_v53, %v5506_v23  ;;  %v9229_v4 = vsub.f32 %v5479_v30, %v5510_v33  ;;  %v4725_v29 = vld [vmem:[%s9116_s6 + $0x40] sm:$0xff]  ;;  %v9233_v35 = vpack.c.bf16 %v4756_v9, %v4752_v27  ;;  %v5518_v61 = vand.u32 4294901760, %v5483_v63 }
 0x168   : > { %10617 = vst [vmem:[#allocation15_spill] sm:$0xff] %v9223_v36  ;;  %v9235_v57 = vsub.f32 %v4722_v17, %v4752_v27  ;;  %v10619_v53 = vand.u32 4294901760, %v8974_v22  ;;  %v9239_v30 = vsub.f32 %v4724_v7, %v4756_v9  ;;  %v9241_v44 = vpack.c.bf16 %v4758_v42, %v4754_v2  ;;  %v5485_v27 = vld [vmem:[%s9138_s12 + $0x40] sm:$0xff]  ;;  %v5487_v9 = vld [vmem:[%s9138_s12 + $0x50] sm:$0xff] }
 0x169   : > { %6849 = vmatpush1.bf16.msra.mxu0 %v6848_v59  ;;  %10618 = vst [vmem:[#allocation14_spill] sm:$0xff] %v9233_v35  ;;  %v4760_v23 = vand.u32 4294901760, %v4726_v6  ;;  %v4764_v33 = vand.u32 4294901760, %v4728_v50  ;;  %v5488_v59 = vld [vmem:[%s9138_s12 + $0x58] sm:$0xff]  ;;  %v10621_v17 = vand.u32 4294901760, %v8986_v25  ;;  %v9248_v19 = vsub.f32 %v4721_v39, %v4754_v2 }
 0x16a   : > { %6945 = vmatpush1.bf16.msra.mxu1 %v6944_v8  ;;  %3783 = vmatprep.subr.mxu0 %v10619_v53  ;;  %10620 = vst [vmem:[#allocation3_spill] sm:$0xff] %v9241_v44  ;;  %v9250_v8 = vsub.f32 %v4723_v55, %v4758_v42  ;;  %v4762_v22 = vand.u32 4294901760, %v4725_v29  ;;  %v4766_v7 = vand.u32 4294901760, %v4727_v38  ;;  %v9254_v53 = vpack.c.bf16 %v5516_v10, %v5512_v51 }
 0x16b   : > { %4543 = vmatprep.subr.mxu1 %v10621_v17  ;;  %v9256_v44 = vsub.f32 %v5482_v45, %v5512_v51  ;;  %v9258_v35 = vsub.f32 %v5484_v18, %v5516_v10  ;;  %v9260_v36 = vsub.f32 %v5481_v3, %v5514_v62  ;;  %v10623_v25 = vand.u32 4294901760, %v8794_v52  ;;  %v4730_v17 = vld [vmem:[%s9116_s6 + $0x68] sm:$0xff]  ;;  %v6360_v45 = vld [vmem:[%s7508_s27 + $0x60] sm:$0xff] }
 0x16c   : > { %10622 = vst [vmem:[#allocation9_spill] sm:$0xff] %v9254_v53  ;;  %v9264_v39 = vpack.c.bf16 %v5518_v61, %v5514_v62  ;;  %v9266_v55 = vsub.f32 %v5483_v63, %v5518_v61  ;;  %v5520_v2 = vand.u32 4294901760, %v5486_v16  ;;  %v5524_v42 = vand.u32 4294901760, %v5488_v59 }
 0x16d   : > { %3787 = vmatpush1.msra.mxu0 %v10623_v25  ;;  %v10625_v52 = vand.u32 4294901760, %v8800_v54  ;;  %v9281_v18 = vpack.c.bf16 %v4764_v33, %v4760_v23  ;;  %v9283_v3 = vsub.f32 %v4726_v6, %v4760_v23  ;;  %v5522_v63 = vand.u32 4294901760, %v5485_v27  ;;  %v9297_v54 = vld [vmem:[%s9116_s6 + $0x70] sm:$0xff] }
 0x16e   : > { %10624 = vst [vmem:[#allocation34_spill] sm:$0xff] %v9264_v39  ;;  %6851 = vmatprep.subr.bf16.mxu0 %v10551_v14  ;;  %v5526_v51 = vand.u32 4294901760, %v5487_v9  ;;  %3836 = vmatmul.mubr.f32.vlgmr.msra.gmra.mrb[8].mxu0 %v10546_v13  ;;  %v9287_v10 = vsub.f32 %v4728_v50, %v4764_v33  ;;  %v9289_v62 = vpack.c.bf16 %v4766_v7, %v4762_v22  ;;  %v9294_v14 = vld [vmem:[%s9116_s6 + $0x60] sm:$0xff]  ;;  %v4772_v50 = vand.u32 4294901760, %v9270_v11 }
 0x16f   : > { %4547 = vmatpush1.msra.mxu1 %v10625_v52  ;;  %10626 = vst [vmem:[#allocation35_spill] sm:$0xff] %v9281_v18  ;;  %v9291_v61 = vsub.f32 %v4725_v29, %v4762_v22  ;;  %6853 = vmatpush1.bf16.msra.mxu0 %v10554_v0  ;;  %v9301_v23 = vsub.f32 %v4727_v38, %v4766_v7  ;;  %v4739_v29 = vsel %vm178_vm0, %v6360_v45, 0  ;;  %v5490_v38 = vld [vmem:[%s9138_s12 + $0x68] sm:$0xff]  ;;  %v5492_v7 = vld [vmem:[%s9138_s12 + $0x78] sm:$0xff]  ;;  %v4770_v52 = vand.u32 4294901760, %v9294_v14 }
 0x170   : > { %6947 = vmatprep.subr.bf16.mxu1 %v10553_v20  ;;  %10627 = vst [vmem:[#allocation36_spill] sm:$0xff] %v9289_v62  ;;  %4596 = vmatmul.mubr.f32.vlgmr.msra.gmra.mrb[8].mxu1 %v8758_v26  ;;  %v895_v6 = vpop.f32.mrb[0].mxu0  ;;  %v4768_v20 = vand.u32 4294901760, %v4730_v17  ;;  %v9308_v0 = vpack.c.bf16 %v5524_v42, %v5520_v2  ;;  %v9310_v22 = vsub.f32 %v5486_v16, %v5520_v2  ;;  %v4774_v16 = vand.u32 4294901760, %v9297_v54 }
 0x171   : > { %10628 = vst [vmem:[#allocation40_spill] sm:$0xff] %v9291_v61  ;;  %10629 = vst [vmem:[#allocation39_spill] sm:$0xff] %v9301_v23  ;;  %6949 = vmatpush1.bf16.msra.mxu1 %v10556_v41  ;;  %6855 = vmatprep.subr.bf16.mxu0 %v10557_v32  ;;  %v897_v33 = vpop.f32.mrb[1].mxu0  ;;  %v9312_v25 = vsub.f32 %v5488_v59, %v5524_v42  ;;  %v9319_v32 = vpack.c.bf16 %v5526_v51, %v5522_v63  ;;  %v9326_v59 = vld [vmem:[%s9138_s12 + $0x60] sm:$0xff]  ;;  %v5491_v42 = vld [vmem:[%s9138_s12 + $0x70] sm:$0xff] }
 0x172   : > { %907 = vst [vmem:[%s9276_s15] sm:$0xff] %v895_v6  ;;  %10630 = vst [vmem:[#allocation26_spill] sm:$0xff] %v9308_v0  ;;  %6951 = vmatprep.subr.bf16.mxu1 %v10558_v31  ;;  %3841 = vmatprep.mubr.f32.mxu0 %v10222_v48  ;;  %v1654_v41 = vpop.f32.mrb[0].mxu1  ;;  %v9321_v45 = vsub.f32 %v5485_v27, %v5522_v63  ;;  %v9331_v2 = vsub.f32 %v5487_v9, %v5526_v51  ;;  %v9336_v6 = vand.u32 4294901760, %v4739_v29  ;;  %v10638_v27 = vld [vmem:[#allocation24_spill] sm:$0xff]  ;;  %v10639_v63 = vld [vmem:[#allocation25_spill] sm:$0xff] }
 0x173   : > { %10631 = vst [vmem:[#allocation19_spill] sm:$0xff] %v9312_v25  ;;  %908 = vst [vmem:[%s9276_s15 + $0x8] sm:$0xff] %v897_v33  ;;  %3843 = vmatmul.mubr.f32.gmra.mrb[10].mxu0 %v8865_v21  ;;  %4601 = vmatprep.mubr.f32.mxu1 %v10222_v48  ;;  %v1656_v31 = vpop.f32.mrb[1].mxu1  ;;  %v5528_v9 = vand.u32 4294901760, %v5490_v38  ;;  %v5532_v51 = vand.u32 4294901760, %v5492_v7  ;;  %v5530_v25 = vand.u32 4294901760, %v9326_v59 }
 0x174   : > { %10632 = vst [vmem:[#allocation17_spill] sm:$0xff] %v9319_v32  ;;  %10633 = vst [vmem:[#allocation23_spill] sm:$0xff] %v9321_v45  ;;  %6857 = vmatpush1.bf16.msra.mxu0 %v10560_v43  ;;  %4603 = vmatmul.mubr.f32.gmra.mrb[10].mxu1 %v10548_v56  ;;  %v902_v33 = vpop.f32.mrb[2].mxu0  ;;  %v9343_v45 = vsub.f32 %v4730_v17, %v4768_v20  ;;  %v9383_v32 = vsub.f32 %v9297_v54, %v4774_v16 }
 0x175   : > { %6322 = vst [vmem:[%s9276_s15 + $0x20] sm:$0xff] %v1654_v41  ;;  %10634 = vst [vmem:[#allocation2_spill] sm:$0xff] %v9331_v2  ;;  %v9341_v41 = vpack.c.bf16 %v4772_v50, %v4768_v20  ;;  %v6368_v2 = vld [vmem:[%s7508_s27 + $0x70] sm:$0xff]  ;;  %6953 = vmatpush1.bf16.msra.mxu1 %v10638_v27  ;;  %6859 = vmatprep.subr.bf16.mxu0 %v10639_v63  ;;  %v904_v43 = vpop.f32.mrb[3].mxu0  ;;  %v10641_v20 = vld [vmem:[#allocation21_spill] sm:$0xff]  ;;  %v9358_v63 = vpack.c.bf16 %v4774_v16, %v4770_v52 }
 0x176   : > { %10635 = vst [vmem:[#allocation18_spill] sm:$0xff] %v9336_v6  ;;  %6323 = vst [vmem:[%s9276_s15 + $0x28] sm:$0xff] %v1656_v31  ;;  %v9350_v31 = vsub.f32 %v9270_v11, %v4772_v50  ;;  %6955 = vmatprep.subr.bf16.mxu1 %v10641_v20  ;;  %3931 = vmatprep.mubr.f32.mxu0 %v10222_v48  ;;  %v1661_v27 = vpop.f32.mrb[2].mxu1  ;;  %v10644_v20 = vand.u32 4294901760, %v9205_v34  ;;  %v5499_v11 = vsel %vm178_vm0, %v6368_v2, 0  ;;  %v10647_v50 = vld [vmem:[#allocation31_spill] sm:$0xff] }
 0x177   : > { %10636 = vst [vmem:[#allocation33_spill] sm:$0xff] %v9341_v41  ;;  %10637 = vst [vmem:[#allocation20_spill] sm:$0xff] %v9343_v45  ;;  %v9361_v45 = vld [vmem:[%s9116_s6 + $0x88] sm:$0xff]  ;;  %4691 = vmatprep.mubr.f32.mxu1 %v10222_v48  ;;  %v1663_v17 = vpop.f32.mrb[3].mxu1  ;;  %v10645_v41 = vand.u32 4294901760, %v9207_v46  ;;  %v10656_v16 = vld [vmem:[#allocation12_spill] sm:$0xff] }
 0x178   : > { %909 = vst [vmem:[%s9276_s15 + $0x10] sm:$0xff] %v902_v33  ;;  %10640 = vst [vmem:[#allocation4_spill] sm:$0xff] %v9350_v31  ;;  %v5534_v33 = vand.u32 4294901760, %v5491_v42  ;;  %v9374_v31 = vsub.f32 %v4739_v29, %v9336_v6  ;;  %6861 = vmatpush1.bf16.msra.mxu0 %v10647_v50  ;;  %v10652_v29 = vld [vmem:[#allocation6_spill] sm:$0xff]  ;;  %v9391_v6 = vsub.f32 %v5492_v7, %v5532_v51  ;;  %v9394_v2 = vand.u32 4294901760, %v9361_v45  ;;  %v9398_v50 = vld [vmem:[%s9138_s12 + $0x88] sm:$0xff] }
 0x179   : > { %910 = vst [vmem:[%s9276_s15 + $0x18] sm:$0xff] %v904_v43  ;;  %10642 = vst [vmem:[#allocation16_spill] sm:$0xff] %v9358_v63  ;;  %v4852_v43 = vsub.f32 %v9205_v34, %v10644_v20  ;;  %v4864_v63 = vsub.f32 %v9207_v46, %v10645_v41  ;;  %v9385_v20 = vpack.c.bf16 %v5532_v51, %v5528_v9  ;;  %v10651_v41 = vld [vmem:[#allocation22_spill] sm:$0xff]  ;;  %6863 = vmatprep.subr.bf16.mxu0 %v10652_v29 }
 0x17a   : > { %10643 = vst [vmem:[#allocation38_spill] sm:$0xff] %v9361_v45  ;;  %6324 = vst [vmem:[%s9276_s15 + $0x30] sm:$0xff] %v1661_v27  ;;  %v9380_v27 = vsub.f32 %v9294_v14, %v4770_v52  ;;  %v9387_v34 = vsub.f32 %v5490_v38, %v5528_v9  ;;  %6957 = vmatpush1.bf16.msra.mxu1 %v10651_v41  ;;  %v10654_v14 = vand.u32 4294901760, %v9211_v12  ;;  %v10655_v52 = vand.u32 4294901760, %v9217_v40  ;;  %v5493_v7 = vld [vmem:[%s9138_s12 + $0x80] sm:$0xff] }
 0x17b   : > { %10646 = vst [vmem:[#allocation7_spill] sm:$0xff] %v9374_v31  ;;  %6325 = vst [vmem:[%s9276_s15 + $0x38] sm:$0xff] %v1663_v17  ;;  %v4733_v17 = vld [vmem:[%s9116_s6 + $0x80] sm:$0xff]  ;;  %6959 = vmatprep.subr.bf16.mxu1 %v10656_v16  ;;  %v9407_v9 = vpack.c.bf16 %v5534_v33, %v5530_v25  ;;  %v10658_v51 = vand.u32 4294901760, %v9219_v37  ;;  %v10659_v29 = vand.u32 4294901760, %v9221_v60  ;;  %v9416_v45 = vand.u32 4294901760, %v5499_v11 }
 0x17c   : > { %10648 = vst [vmem:[#allocation30_spill] sm:$0xff] %v9380_v27  ;;  %10649 = vst [vmem:[#allocation29_spill] sm:$0xff] %v9383_v32  ;;  %v4858_v54 = vsub.f32 %v9211_v12, %v10654_v14  ;;  %v4870_v38 = vsub.f32 %v9217_v40, %v10655_v52  ;;  %v9419_v14 = vsub.f32 %v9326_v59, %v5530_v25  ;;  %v4853_v12 = vand.u32 4294901760, %v4852_v43  ;;  %v10660_v40 = vld [vmem:[#allocation5_spill] sm:$0xff] }
 0x17d   : > { %10650 = vst [vmem:[#allocation32_spill] sm:$0xff] %v9385_v20  ;;  %10653 = vst [vmem:[#allocation28_spill] sm:$0xff] %v9394_v2  ;;  %v5612_v41 = vsub.f32 %v9219_v37, %v10658_v51  ;;  %v5624_v46 = vsub.f32 %v9221_v60, %v10659_v29  ;;  %v4865_v52 = vand.u32 4294901760, %v4864_v63  ;;  %v10150_v16 = vand.u32 4294901760, %v9374_v31  ;;  %6865 = vmatpush1.bf16.msra.mxu0 %v10660_v40 }
 0x17e   : > { %10657 = vst [vmem:[#allocation37_spill] sm:$0xff] %v9407_v9  ;;  %v9423_v32 = vsub.f32 %v5491_v42, %v5534_v33  ;;  %v9425_v27 = vand.u32 4294901760, %v4733_v17  ;;  %v9428_v51 = vand.u32 4294901760, %v9398_v50  ;;  %6961 = vmatpush1.bf16.msra.mxu1 %v10569_v49  ;;  %3882 = vmatprep.subr.mxu0 %v10570_v5  ;;  %v9433_v25 = vand.u32 4294901760, %v5493_v7 }
 0x17f   : > { %v4859_v59 = vand.u32 4294901760, %v4858_v54  ;;  %v4871_v63 = vand.u32 4294901760, %v4870_v38  ;;  %v10151_v40 = vand.u32 4294901760, %v9229_v4  ;;  %4642 = vmatprep.subr.mxu1 %v10573_v58  ;;  %v5613_v33 = vand.u32 4294901760, %v5612_v41  ;;  %v6361_v38 = vld [vmem:[%s7508_s27 + $0x68] sm:$0xff]  ;;  %v6369_v41 = vld [vmem:[%s7508_s27 + $0x78] sm:$0xff] }
 0x180   : > { %10661 = vst [vmem:[#allocation24_spill] sm:$0xff] %v9425_v27  ;;  %10662 = vst [vmem:[#allocation25_spill] sm:$0xff] %v9428_v51  ;;  %v9438_v42 = vsub.f32 %v4733_v17, %v9425_v27  ;;  %v5625_v43 = vand.u32 4294901760, %v5624_v46  ;;  %v9441_v29 = vsub.f32 %v5499_v11, %v9416_v45  ;;  %v9443_v49 = vpack.c.bf16 %v4865_v52, %v4853_v12 }
 0x181   : > { %10663 = vst [vmem:[#allocation21_spill] sm:$0xff] %v9433_v25  ;;  %v9446_v5 = vsub.f32 %v5493_v7, %v9433_v25  ;;  %v9451_v54 = vsub.f32 %v9374_v31, %v10150_v16  ;;  %v10152_v58 = vand.u32 4294901760, %v9235_v57  ;;  %3884 = vmatpush1.msra.mxu0 %v10578_v24  ;;  %v10665_v46 = vand.u32 4294901760, %v9227_v15 }
 0x182   : > { %10664 = vst [vmem:[#allocation31_spill] sm:$0xff] %v9441_v29  ;;  %v10153_v12 = vand.u32 4294901760, %v9239_v30  ;;  %v10154_v17 = vand.u32 4294901760, %v9248_v19  ;;  %3933 = vmatmul.mubr.f32.vlgmr.msra.gmra.mrb[8].mxu0 %v10546_v13  ;;  %4644 = vmatpush1.msra.mxu1 %v10583_v28  ;;  %v9465_v52 = vpack.c.bf16 %v4871_v63, %v4859_v59  ;;  %v5630_v24 = vsub.f32 %v9229_v4, %v10151_v40  ;;  %v10666_v63 = vld [vmem:[#allocation27_spill] sm:$0xff] }
 0x183   : > { %v5618_v11 = vsub.f32 %v9227_v15, %v10665_v46  ;;  %v10157_v16 = vand.u32 4294901760, %v9256_v44  ;;  %6963 = vmatprep.subr.bf16.mxu0 %v9201_v47  ;;  %4693 = vmatmul.mubr.f32.vlgmr.msra.gmra.mrb[8].mxu1 %v8758_v26  ;;  %v9474_v7 = vpack.c.bf16 %v5625_v43, %v5613_v33  ;;  %v4742_v59 = vsel %vm178_vm0, %v6361_v38, 0  ;;  %v10667_v43 = vld [vmem:[#allocation15_spill] sm:$0xff] }
 0x184   : > { %6965 = vmatpush1.bf16.msra.mxu0 %v9203_v1  ;;  %7059 = vmatprep.subr.bf16.mxu1 %v10666_v63  ;;  %v4876_v46 = vsub.f32 %v9235_v57, %v10152_v58  ;;  %v5502_v33 = vsel %vm178_vm0, %v6369_v41, 0  ;;  %v4888_v38 = vsub.f32 %v9239_v30, %v10153_v12  ;;  %v4882_v40 = vsub.f32 %v9248_v19, %v10154_v17  ;;  %v10671_v17 = vld [vmem:[#allocation14_spill] sm:$0xff] }
 0x185   : > { %7061 = vmatpush1.bf16.msra.mxu1 %v10667_v43  ;;  %3938 = vmatprep.mubr.f32.mxu0 %v10222_v48  ;;  %v5619_v28 = vand.u32 4294901760, %v5618_v11  ;;  %v10668_v13 = vand.u32 4294901760, %v9250_v8  ;;  %v5631_v41 = vand.u32 4294901760, %v5630_v24  ;;  %v5636_v11 = vsub.f32 %v9256_v44, %v10157_v16 }
 0x186   : > { %3940 = vmatmul.mubr.f32.gmra.mrb[10].mxu0 %v8865_v21  ;;  %4698 = vmatprep.mubr.f32.mxu1 %v10222_v48  ;;  %v10669_v26 = vand.u32 4294901760, %v9258_v35  ;;  %v9506_v43 = vand.u32 4294901760, %v4742_v59  ;;  %v10673_v24 = vand.u32 4294901760, %v9260_v36  ;;  %v9519_v63 = vand.u32 4294901760, %v5502_v33 }
 0x187   : > { %v4894_v58 = vsub.f32 %v9250_v8, %v10668_v13  ;;  %6967 = vmatprep.subr.bf16.mxu0 %v10671_v17  ;;  %4700 = vmatmul.mubr.f32.gmra.mrb[10].mxu1 %v10548_v56  ;;  %v10672_v13 = vand.u32 4294901760, %v9441_v29  ;;  %v4877_v17 = vand.u32 4294901760, %v4876_v46  ;;  %v10676_v56 = vand.u32 4294901760, %v9266_v55 }
 0x188   : > { %v5648_v12 = vsub.f32 %v9258_v35, %v10669_v26  ;;  %10670 = vst [vmem:[#allocation22_spill] sm:$0xff] %v9506_v43  ;;  %v5642_v1 = vsub.f32 %v9260_v36, %v10673_v24  ;;  %10674 = vst [vmem:[#allocation6_spill] sm:$0xff] %v9519_v63  ;;  %v10675_v26 = vld [vmem:[#allocation3_spill] sm:$0xff]  ;;  %7063 = vmatprep.subr.bf16.mxu1 %v9254_v53  ;;  %v4889_v24 = vand.u32 4294901760, %v4888_v38  ;;  %v4883_v16 = vand.u32 4294901760, %v4882_v40 }
 0x189   : > { %v9513_v21 = vsub.f32 %v9441_v29, %v10672_v13  ;;  %6969 = vmatpush1.bf16.msra.mxu0 %v10675_v26  ;;  %v5654_v31 = vsub.f32 %v9266_v55, %v10676_v56  ;;  %7065 = vmatpush1.bf16.msra.mxu1 %v9264_v39  ;;  %v4895_v47 = vand.u32 4294901760, %v4894_v58  ;;  %v9533_v46 = vpack.c.bf16 %v5631_v41, %v5619_v28  ;;  %v10685_v39 = vld [vmem:[#allocation23_spill] sm:$0xff] }
 0x18a   : > { %6971 = vmatprep.subr.bf16.mxu0 %v9281_v18  ;;  %7067 = vmatprep.subr.bf16.mxu1 %v9308_v0  ;;  %v5637_v56 = vand.u32 4294901760, %v5636_v11  ;;  %v5649_v53 = vand.u32 4294901760, %v5648_v12  ;;  %v9536_v13 = vsub.f32 %v4742_v59, %v9506_v43  ;;  %v5643_v38 = vand.u32 4294901760, %v5642_v1  ;;  %v10686_v11 = vld [vmem:[#allocation2_spill] sm:$0xff]  ;;  %v10697_v43 = vld [vmem:[#allocation29_spill] sm:$0xff] }
 0x18b   : > { %4826 = vmatprep.mubr.f32.mxu0 %v10222_v48  ;;  %5586 = vmatprep.mubr.f32.mxu1 %v10222_v48  ;;  %v5591_v29 = vand.u32 4294901760, %v9513_v21  ;;  %v10678_v40 = vand.u32 4294901760, %v9283_v3  ;;  %v9546_v26 = vsub.f32 %v5502_v33, %v9519_v63  ;;  %v5655_v28 = vand.u32 4294901760, %v5654_v31  ;;  %v10681_v21 = vld [vmem:[#allocation17_spill] sm:$0xff] }
 0x18c   : > { %10677 = vst [vmem:[#allocation12_spill] sm:$0xff] %v9536_v13  ;;  %v10679_v12 = vand.u32 4294901760, %v9287_v10  ;;  %v10680_v41 = vand.u32 4294901760, %v9291_v61  ;;  %v6982_v33 = vpack.c.bf16 %v4889_v24, %v4877_v17  ;;  %v9562_v0 = vpack.c.bf16 %v4895_v47, %v4883_v16  ;;  %v10687_v47 = vld [vmem:[#allocation20_spill] sm:$0xff]  ;;  %v10693_v16 = vld [vmem:[#allocation30_spill] sm:$0xff] }
 0x18d   : > { %v9543_v58 = vsub.f32 %v9283_v3, %v10678_v40  ;;  %6973 = vmatpush1.bf16.msra.mxu0 %v9289_v62  ;;  %7069 = vmatpush1.bf16.msra.mxu1 %v10681_v21  ;;  %v10682_v40 = vld [vmem:[#allocation33_spill] sm:$0xff]  ;;  %v10683_v31 = vand.u32 4294901760, %v9301_v23  ;;  %v10186_v63 = vand.u32 4294901760, %v10685_v39  ;;  %v10688_v24 = vld [vmem:[#allocation4_spill] sm:$0xff]  ;;  %v9579_v18 = vpack.c.bf16 %v5655_v28, %v5643_v38 }
 0x18e   : > { %v9552_v59 = vsub.f32 %v9287_v10, %v10679_v12  ;;  %v9557_v1 = vsub.f32 %v9291_v61, %v10680_v41  ;;  %6975 = vmatprep.subr.bf16.mxu0 %v10682_v40  ;;  %v10684_v12 = vld [vmem:[#allocation19_spill] sm:$0xff]  ;;  %7071 = vmatprep.subr.bf16.mxu1 %v9385_v20  ;;  %v7078_v41 = vpack.c.bf16 %v5649_v53, %v5637_v56  ;;  %v10690_v61 = vand.u32 4294901760, %v9310_v22 }
 0x18f   : > { %v9567_v62 = vsub.f32 %v9301_v23, %v10683_v31  ;;  %v4901_v17 = vand.u32 4294901760, %v9543_v58  ;;  %v10689_v23 = vld [vmem:[#allocation16_spill] sm:$0xff]  ;;  %v10691_v31 = vand.u32 4294901760, %v10684_v12  ;;  %v10695_v38 = vand.u32 4294901760, %v10687_v47 }
 0x190   : > { %v4913_v53 = vand.u32 4294901760, %v9552_v59  ;;  %v4907_v56 = vand.u32 4294901760, %v9557_v1  ;;  %v5660_v21 = vsub.f32 %v9310_v22, %v10690_v61  ;;  %v5666_v61 = vsub.f32 %v10685_v39, %v10186_v63 }
 0x191   : > { %6977 = vmatpush1.bf16.msra.mxu0 %v10689_v23  ;;  %7073 = vmatpush1.bf16.msra.mxu1 %v9407_v9  ;;  %v4919_v58 = vand.u32 4294901760, %v9567_v62  ;;  %v5672_v40 = vsub.f32 %v10684_v12, %v10691_v31  ;;  %v10692_v59 = vand.u32 4294901760, %v10686_v11  ;;  %v10694_v9 = vand.u32 4294901760, %v9536_v13 }
 0x192   : > { %4777 = vmatprep.subr.mxu0 %v9394_v2  ;;  %5537 = vmatprep.subr.mxu1 %v9428_v51  ;;  %v4924_v28 = vsub.f32 %v10687_v47, %v10695_v38  ;;  %v10696_v23 = vand.u32 4294901760, %v10688_v24  ;;  %v10698_v39 = vand.u32 4294901760, %v9546_v26  ;;  %v5661_v62 = vand.u32 4294901760, %v5660_v21 }
 0x193   : > { %v5678_v1 = vsub.f32 %v10686_v11, %v10692_v59  ;;  %v4841_v31 = vsub.f32 %v9536_v13, %v10694_v9  ;;  %v10699_v13 = vld [vmem:[#allocation38_spill] sm:$0xff]  ;;  %v10700_v63 = vand.u32 4294901760, %v9387_v34  ;;  %v9632_v9 = vsub.f32 %v9398_v50, %v9428_v51 }
 0x194   : > { %v4936_v20 = vsub.f32 %v10688_v24, %v10696_v23  ;;  %v5601_v59 = vsub.f32 %v9546_v26, %v10698_v39  ;;  %v9620_v38 = vsub.f32 %v10699_v13, %v9394_v2  ;;  %v5673_v23 = vand.u32 4294901760, %v5672_v40 }
 0x195   : > { %4779 = vmatpush1.msra.mxu0 %v9425_v27  ;;  %5539 = vmatpush1.msra.mxu1 %v9433_v25  ;;  %v5684_v39 = vsub.f32 %v9387_v34, %v10700_v63  ;;  %v10701_v27 = vand.u32 4294901760, %v9391_v6  ;;  %v10702_v13 = vand.u32 4294901760, %v9451_v54  ;;  %v5679_v11 = vand.u32 4294901760, %v5678_v1 }
 0x196   : > { %6979 = vmatprep.subr.bf16.mxu0 %v9443_v49  ;;  %7075 = vmatprep.subr.bf16.mxu1 %v9474_v7  ;;  %v5667_v49 = vand.u32 4294901760, %v5666_v61  ;;  %v10703_v40 = vand.u32 4294901760, %v10693_v16  ;;  %v4842_v63 = vand.u32 4294901760, %v4841_v31  ;;  %v4937_v2 = vand.u32 4294901760, %v4936_v20 }
 0x197   : > { %v5696_v21 = vsub.f32 %v9391_v6, %v10701_v27  ;;  %4832 = vmatmul.mubr.f32.vlgmr.msra.gmra.mrb[12].mxu0 %v10702_v13  ;;  %5592 = vmatmul.mubr.f32.vlgmr.msra.gmra.mrb[12].mxu1 %v5591_v29  ;;  %v4925_v27 = vand.u32 4294901760, %v4924_v28  ;;  %v10704_v50 = vand.u32 4294901760, %v10697_v43  ;;  %v5602_v54 = vand.u32 4294901760, %v5601_v59 }
 0x198   : > { %v4930_v25 = vsub.f32 %v10693_v16, %v10703_v40  ;;  %6981 = vmatpush1.bf16.msra.mxu0 %v9465_v52  ;;  %7077 = vmatpush1.bf16.msra.mxu1 %v9533_v46  ;;  %v6986_v7 = vpack.c.bf16 %v4913_v53, %v4901_v17  ;;  %v10705_v61 = vand.u32 4294901760, %v9419_v14  ;;  %v10706_v31 = vand.u32 4294901760, %v9423_v32 }
 0x199   : > { %v4942_v51 = vsub.f32 %v10697_v43, %v10704_v50  ;;  %6983 = vmatprep.subr.bf16.mxu0 %v6982_v33  ;;  %v10202_v29 = vand.u32 4294901760, %v9620_v38  ;;  %7079 = vmatprep.subr.bf16.mxu1 %v7078_v41  ;;  %v7082_v20 = vpack.c.bf16 %v5673_v23, %v5661_v62  ;;  %v5685_v28 = vand.u32 4294901760, %v5684_v39 }
 0x19a   : > { %v5690_v1 = vsub.f32 %v9419_v14, %v10705_v61  ;;  %v5702_v52 = vsub.f32 %v9423_v32, %v10706_v31  ;;  %v5697_v13 = vand.u32 4294901760, %v5696_v21  ;;  %4837 = vmatprep.mubr.f32.mxu0 %v10222_v48  ;;  %v10201_v46 = vand.u32 4294901760, %v9632_v9  ;;  %5597 = vmatprep.mubr.f32.mxu1 %v10222_v48  ;;  %v10709_v61 = vld [vmem:[#allocation8_spill] sm:$0xff] }
 0x19b   : > { %v6988_v33 = vpack.c.bf16 %v4919_v58, %v4907_v56  ;;  %v7084_v17 = vpack.c.bf16 %v5679_v11, %v5667_v49  ;;  %4843 = vmatmul.mubr.f32.gmra.mrb[14].mxu0 %v4842_v63  ;;  %v6990_v53 = vpack.c.bf16 %v4937_v2, %v4925_v27  ;;  %v4931_v59 = vand.u32 4294901760, %v4930_v25  ;;  %5603 = vmatmul.mubr.f32.gmra.mrb[14].mxu1 %v5602_v54  ;;  %v10707_v63 = vld [vmem:[#allocation11_spill] sm:$0xff]  ;;  %v10708_v27 = vld [vmem:[#allocation13_spill] sm:$0xff] }
 0x19c   : > { %6985 = vmatpush1.bf16.msra.mxu0 %v9562_v0  ;;  %v4943_v40 = vand.u32 4294901760, %v4942_v51  ;;  %v10200_v41 = vand.u32 4294901760, %v9438_v42  ;;  %7081 = vmatpush1.bf16.msra.mxu1 %v9579_v18  ;;  %v5691_v62 = vand.u32 4294901760, %v5690_v1  ;;  %v5703_v23 = vand.u32 4294901760, %v5702_v52  ;;  %v10710_v1 = vld [vmem:[#allocation10_spill] sm:$0xff] }
 0x19d   : > { %6987 = vmatprep.subr.bf16.mxu0 %v6986_v7  ;;  %v4948_v11 = vsub.f32 %v9620_v38, %v10202_v29  ;;  %v10199_v56 = vand.u32 4294901760, %v9446_v5  ;;  %7083 = vmatprep.subr.bf16.mxu1 %v7082_v20  ;;  %v7086_v58 = vpack.c.bf16 %v5697_v13, %v5685_v28  ;;  %v5708_v0 = vsub.f32 %v9632_v9, %v10201_v46  ;;  %v10711_v13 = vld [vmem:[#allocation18_spill] sm:$0xff] }
 0x19e   : > { %5003 = vmatprep.mubr.f32.mxu0 %v10222_v48  ;;  %5763 = vmatprep.mubr.f32.mxu1 %v10222_v48  ;;  %v6992_v18 = vpack.c.bf16 %v4943_v40, %v4931_v59  ;;  %v4954_v2 = vsub.f32 %v9438_v42, %v10200_v41  ;;  %v7088_v51 = vpack.c.bf16 %v5703_v23, %v5691_v62  ;;  %v10712_v40 = vld [vmem:[#allocation22_spill] sm:$0xff]  ;;  %v10713_v62 = vld [vmem:[#allocation40_spill] sm:$0xff]  ;;  %v10714_v23 = vld [vmem:[#allocation39_spill] sm:$0xff]  ;;  %v10738_v46 = vand.u32 4294901760, %v10707_v63 }
 0x19f   : > { %v4949_v25 = vand.u32 4294901760, %v4948_v11  ;;  %v5714_v39 = vsub.f32 %v9446_v5, %v10199_v56  ;;  %v5709_v21 = vand.u32 4294901760, %v5708_v0  ;;  %v6994_v50 = vpack.c.bf16 %v10708_v27, %v10707_v63  ;;  %v10716_v0 = vld [vmem:[#allocation23_spill] sm:$0xff]  ;;  %v10736_v56 = vld [vmem:[#allocation37_spill] sm:$0xff]  ;;  %v10737_v41 = vld [vmem:[#allocation28_spill] sm:$0xff] }
 0x1a0   : > { %6989 = vmatpush1.bf16.msra.mxu0 %v6988_v33  ;;  %7085 = vmatpush1.bf16.msra.mxu1 %v7084_v17  ;;  %v4955_v49 = vand.u32 4294901760, %v4954_v2  ;;  %v7090_v7 = vpack.c.bf16 %v9221_v60, %v9219_v37  ;;  %v6996_v31 = vpack.c.bf16 %v10710_v1, %v10709_v61  ;;  %v7092_v52 = vpack.c.bf16 %v9229_v4, %v9227_v15 }
 0x1a1   : > { %6991 = vmatprep.subr.bf16.mxu0 %v6990_v53  ;;  %7087 = vmatprep.subr.bf16.mxu1 %v7086_v58  ;;  %v5715_v54 = vand.u32 4294901760, %v5714_v39  ;;  %v6998_v20 = vpack.c.bf16 %v9239_v30, %v9235_v57  ;;  %v7094_v28 = vpack.c.bf16 %v9258_v35, %v9256_v44  ;;  %v7000_v33 = vpack.c.bf16 %v9250_v8, %v9248_v19  ;;  %v10715_v58 = vld [vmem:[#allocation6_spill] sm:$0xff] }
 0x1a2   : > { %v7096_v17 = vpack.c.bf16 %v9266_v55, %v9260_v36  ;;  %v7002_v53 = vpack.c.bf16 %v9287_v10, %v9283_v3  ;;  %v7098_v59 = vpack.c.bf16 %v10684_v12, %v9310_v22  ;;  %v7004_v11 = vpack.c.bf16 %v10714_v23, %v10713_v62 }
 0x1a3   : > { %v7008_v39 = vpack.c.bf16 %v10697_v43, %v10693_v16  ;;  %v10739_v29 = vand.u32 4294901760, %v10708_v27  ;;  %v10747_v63 = vand.u32 4294901760, %v9229_v4  ;;  %v10755_v4 = vand.u32 4294901760, %v9248_v19 }
 0x1a4   : > { %6993 = vmatpush1.bf16.msra.mxu0 %v6992_v18  ;;  %7089 = vmatpush1.bf16.msra.mxu1 %v7088_v51  ;;  %v10717_v18 = vld [vmem:[#allocation2_spill] sm:$0xff]  ;;  %v7006_v51 = vpack.c.bf16 %v10688_v24, %v10687_v47  ;;  %v10762_v19 = vand.u32 4294901760, %v10684_v12 }
 0x1a5   : > { %4950 = vmatprep.subr.mxu0 %v4949_v25  ;;  %5710 = vmatprep.subr.mxu1 %v5709_v21  ;;  %v7100_v2 = vpack.c.bf16 %v10717_v18, %v10716_v0  ;;  %v7102_v25 = vpack.c.bf16 %v9391_v6, %v9387_v34  ;;  %v7104_v21 = vpack.c.bf16 %v9423_v32, %v9419_v14  ;;  %v10768_v12 = vand.u32 4294901760, %v10717_v18 }
 0x1a8   : > { %4956 = vmatpush1.msra.mxu0 %v4955_v49  ;;  %5716 = vmatpush1.msra.mxu1 %v5715_v54  ;;  %v10718_v49 = vld [vmem:[#allocation42_spill] sm:$0xff]  ;;  %v10720_v54 = vld [vmem:[#allocation27_spill] sm:$0xff] }
 0x1a9   : > { %6995 = vmatprep.subr.bf16.mxu0 %v6994_v50  ;;  %5005 = vmatmul.mubr.f32.vlgmr.msra.gmra.mrb[12].mxu0 %v10711_v13  ;;  %v10719_v50 = vld [vmem:[#allocation7_spill] sm:$0xff] }
 0x1aa   : > { %7091 = vmatprep.subr.bf16.mxu1 %v7090_v7  ;;  %6997 = vmatpush1.bf16.msra.mxu0 %v6996_v31  ;;  %v10721_v7 = vld [vmem:[#allocation41_spill] sm:$0xff]  ;;  %v10722_v31 = vld [vmem:[#allocation31_spill] sm:$0xff] }
 0x1ab   : > { %5765 = vmatmul.mubr.f32.vlgmr.msra.gmra.mrb[12].mxu1 %v9416_v45  ;;  %6999 = vmatprep.subr.bf16.mxu0 %v6998_v20  ;;  %v10724_v20 = vld [vmem:[#allocation14_spill] sm:$0xff] }
 0x1ac   : > { %7093 = vmatpush1.bf16.msra.mxu1 %v7092_v52  ;;  %5010 = vmatprep.mubr.f32.mxu0 %v10222_v48  ;;  %v10723_v52 = vld [vmem:[#allocation15_spill] sm:$0xff] }
 0x1ad   : > { %7095 = vmatprep.subr.bf16.mxu1 %v7094_v28  ;;  %5012 = vmatmul.mubr.f32.gmra.mrb[14].mxu0 %v10712_v40  ;;  %v10725_v28 = vld [vmem:[#allocation9_spill] sm:$0xff] }
 0x1ae   : > { %5770 = vmatprep.mubr.f32.mxu1 %v10222_v48  ;;  %7001 = vmatpush1.bf16.msra.mxu0 %v7000_v33  ;;  %v10726_v33 = vld [vmem:[#allocation12_spill] sm:$0xff] }
 0x1af   : > { %5772 = vmatmul.mubr.f32.gmra.mrb[14].mxu1 %v10715_v58  ;;  %7003 = vmatprep.subr.bf16.mxu0 %v7002_v53  ;;  %v10728_v53 = vld [vmem:[#allocation34_spill] sm:$0xff] }
 0x1b0   : > { %7097 = vmatpush1.bf16.msra.mxu1 %v7096_v17  ;;  %5118 = vmatprep.mubr.f32.mxu0 %v10222_v48  ;;  %v10727_v17 = vld [vmem:[#allocation3_spill] sm:$0xff] }
 0x1b1   : > { %7099 = vmatprep.subr.bf16.mxu1 %v7098_v59  ;;  %5878 = vmatprep.mubr.f32.mxu1 %v10222_v48  ;;  %v10729_v59 = vld [vmem:[#allocation35_spill] sm:$0xff] }
 0x1b2   : > { %7005 = vmatpush1.bf16.msra.mxu0 %v7004_v11  ;;  %v10730_v11 = vld [vmem:[#allocation26_spill] sm:$0xff] }
 0x1b3   : > { %7007 = vmatprep.subr.bf16.mxu0 %v7006_v51  ;;  %v10732_v51 = vld [vmem:[#allocation17_spill] sm:$0xff] }
 0x1b4   : > { %7101 = vmatpush1.bf16.msra.mxu1 %v7100_v2  ;;  %v10731_v2 = vld [vmem:[#allocation36_spill] sm:$0xff] }
 0x1b5   : > { %7103 = vmatprep.subr.bf16.mxu1 %v7102_v25  ;;  %v10733_v25 = vld [vmem:[#allocation33_spill] sm:$0xff] }
 0x1b6   : > { %7009 = vmatpush1.bf16.msra.mxu0 %v7008_v39  ;;  %v10734_v39 = vld [vmem:[#allocation32_spill] sm:$0xff] }
 0x1b7   : > { %5068 = vmatprep.subr.mxu0 %v9620_v38 }
 0x1b8   : > { %7105 = vmatpush1.bf16.msra.mxu1 %v7104_v21  ;;  %v10735_v21 = vld [vmem:[#allocation16_spill] sm:$0xff] }
 0x1b9   : > { %5828 = vmatprep.subr.mxu1 %v9632_v9 }
 0x1ba   : > { %5071 = vmatpush1.msra.mxu0 %v9438_v42 }
 0x1bb   : > { %7011 = vmatprep.subr.bf16.mxu0 %v10718_v49  ;;  %5121 = vmatmul.mubr.f32.vlgmr.msra.gmra.mrb[12].mxu0 %v10719_v50 }
 0x1bc   : > { %5831 = vmatpush1.msra.mxu1 %v9446_v5  ;;  %7013 = vmatpush1.bf16.msra.mxu0 %v10721_v7 }
 0x1bd   : > { %7107 = vmatprep.subr.bf16.mxu1 %v10720_v54  ;;  %5881 = vmatmul.mubr.f32.vlgmr.msra.gmra.mrb[12].mxu1 %v10722_v31 }
 0x1be   : > { %7109 = vmatpush1.bf16.msra.mxu1 %v10723_v52  ;;  %7015 = vmatprep.subr.bf16.mxu0 %v10724_v20 }
 0x1bf   : > { %7111 = vmatprep.subr.bf16.mxu1 %v10725_v28  ;;  %5126 = vmatprep.mubr.f32.mxu0 %v10222_v48 }
 0x1c0   : > { %5129 = vmatmul.mubr.f32.gmra.mrb[14].mxu0 %v10726_v33  ;;  %5886 = vmatprep.mubr.f32.mxu1 %v10222_v48 }
 0x1c1   : > { %7017 = vmatpush1.bf16.msra.mxu0 %v10727_v17  ;;  %5889 = vmatmul.mubr.f32.gmra.mrb[14].mxu1 %v9546_v26 }
 0x1c2   : > { %7113 = vmatpush1.bf16.msra.mxu1 %v10728_v53  ;;  %7019 = vmatprep.subr.bf16.mxu0 %v10729_v59  ;;  %v10740_v59 = vld [vmem:[#allocation25_spill] sm:$0xff] }
 0x1c3   : > { %7115 = vmatprep.subr.bf16.mxu1 %v10730_v11  ;;  %5217 = vmatprep.mubr.f32.mxu0 %v10222_v48  ;;  %v7026_v11 = vpack.c.bf16 %v10739_v29, %v10738_v46  ;;  %v10748_v29 = vand.u32 4294901760, %v9235_v57  ;;  %v10749_v46 = vand.u32 4294901760, %v9239_v30  ;;  %v10756_v57 = vand.u32 4294901760, %v9250_v8 }
 0x1c4   : > { %5977 = vmatprep.mubr.f32.mxu1 %v10222_v48  ;;  %v10763_v8 = vand.u32 4294901760, %v10726_v33  ;;  %v10769_v33 = vand.u32 4294901760, %v10687_v47  ;;  %v10775_v47 = vand.u32 4294901760, %v9419_v14 }
 0x1c5   : > { %7021 = vmatpush1.bf16.msra.mxu0 %v10731_v2  ;;  %v10741_v2 = vand.u32 4294901760, %v9219_v37  ;;  %v7030_v37 = vpack.c.bf16 %v10749_v46, %v10748_v29  ;;  %v7032_v30 = vpack.c.bf16 %v10756_v57, %v10755_v4  ;;  %v10778_v29 = vand.u32 4294901760, %v9632_v9  ;;  %v10786_v46 = vld [vmem:[#allocation33_spill] sm:$0xff] }
 0x1c6   : > { %7117 = vmatpush1.bf16.msra.mxu1 %v10732_v51  ;;  %7023 = vmatprep.subr.bf16.mxu0 %v10733_v25  ;;  %v10742_v51 = vand.u32 4294901760, %v9221_v60  ;;  %v10750_v60 = vld [vmem:[#allocation21_spill] sm:$0xff] }
 0x1c7   : > { %7119 = vmatprep.subr.bf16.mxu1 %v10734_v39  ;;  %v10743_v39 = vand.u32 4294901760, %v10709_v61  ;;  %v10751_v61 = vand.u32 4294901760, %v9256_v44  ;;  %v10757_v44 = vand.u32 4294901760, %v9260_v36  ;;  %v10764_v36 = vand.u32 4294901760, %v10713_v62 }
 0x1c8   : > { %v7122_v25 = vpack.c.bf16 %v10742_v51, %v10741_v2  ;;  %v10753_v51 = vand.u32 4294901760, %v10719_v50  ;;  %v10759_v50 = vand.u32 4294901760, %v9283_v3  ;;  %v10771_v62 = vand.u32 4294901760, %v9387_v34 }
 0x1c9   : > { %7025 = vmatpush1.bf16.msra.mxu0 %v10735_v21  ;;  %v10744_v21 = vand.u32 4294901760, %v10710_v1  ;;  %v10752_v1 = vand.u32 4294901760, %v9258_v35  ;;  %v10758_v35 = vand.u32 4294901760, %v9266_v55  ;;  %v10765_v55 = vand.u32 4294901760, %v10714_v23 }
 0x1ca   : > { %7121 = vmatpush1.bf16.msra.mxu1 %v10736_v56  ;;  %5168 = vmatprep.subr.mxu0 %v10737_v41  ;;  %v10745_v56 = vld [vmem:[#allocation24_spill] sm:$0xff]  ;;  %v10746_v41 = vand.u32 4294901760, %v9227_v15  ;;  %v10754_v15 = vand.u32 4294901760, %v10722_v31  ;;  %v10761_v31 = vand.u32 4294901760, %v9310_v22  ;;  %v10767_v22 = vand.u32 4294901760, %v10716_v0 }
 0x1cb   : > { %5928 = vmatprep.subr.mxu1 %v10740_v59  ;;  %v7028_v53 = vpack.c.bf16 %v10744_v21, %v10743_v39  ;;  %v7126_v2 = vpack.c.bf16 %v10752_v1, %v10751_v61  ;;  %v7036_v3 = vpack.c.bf16 %v10765_v55, %v10764_v36  ;;  %v10770_v21 = vand.u32 4294901760, %v10688_v24  ;;  %v10788_v61 = vld [vmem:[#allocation16_spill] sm:$0xff]  ;;  %v10789_v1 = vld [vmem:[#allocation37_spill] sm:$0xff] }
 0x1cc   : > { %v7124_v27 = vpack.c.bf16 %v10747_v63, %v10746_v41  ;;  %v7128_v41 = vpack.c.bf16 %v10758_v35, %v10757_v44  ;;  %v7132_v39 = vpack.c.bf16 %v10768_v12, %v10767_v22  ;;  %v10772_v23 = vand.u32 4294901760, %v9391_v6 }
 0x1cd   : > { %5170 = vmatpush1.msra.mxu0 %v10745_v56  ;;  %v7038_v63 = vpack.c.bf16 %v10770_v21, %v10769_v33  ;;  %v10774_v0 = vand.u32 4294901760, %v10697_v43  ;;  %v10776_v24 = vand.u32 4294901760, %v9423_v32  ;;  %v10777_v6 = vand.u32 4294901760, %v9620_v38  ;;  %v10781_v38 = vld [vmem:[#allocation34_spill] sm:$0xff] }
 0x1ce   : > { %7027 = vmatprep.subr.bf16.mxu0 %v7026_v11  ;;  %5930 = vmatpush1.msra.mxu1 %v10750_v60  ;;  %v10760_v11 = vand.u32 4294901760, %v9287_v10  ;;  %v10766_v10 = vand.u32 4294901760, %v9546_v26  ;;  %v10773_v26 = vand.u32 4294901760, %v10693_v16  ;;  %v10779_v43 = vand.u32 4294901760, %v9438_v42 }
 0x1cf   : > { %5221 = vmatmul.mubr.f32.vlgmr.msra.gmra.mrb[12].mxu0 %v10753_v51  ;;  %7123 = vmatprep.subr.bf16.mxu1 %v7122_v25  ;;  %v7130_v25 = vpack.c.bf16 %v10762_v19, %v10761_v31  ;;  %v7136_v34 = vpack.c.bf16 %v10776_v24, %v10775_v47  ;;  %v10780_v32 = vand.u32 4294901760, %v9446_v5 }
 0x1d0   : > { %7029 = vmatpush1.bf16.msra.mxu0 %v7028_v53  ;;  %5981 = vmatmul.mubr.f32.vlgmr.msra.gmra.mrb[12].mxu1 %v10754_v15  ;;  %v7034_v53 = vpack.c.bf16 %v10760_v11, %v10759_v50  ;;  %v7040_v18 = vpack.c.bf16 %v10774_v0, %v10773_v26 }
 0x1d1   : > { %7125 = vmatpush1.bf16.msra.mxu1 %v7124_v27  ;;  %7031 = vmatprep.subr.bf16.mxu0 %v7030_v37  ;;  %v7134_v27 = vpack.c.bf16 %v10772_v23, %v10771_v62  ;;  %v10787_v37 = vld [vmem:[#allocation32_spill] sm:$0xff] }
 0x1d2   : > { %7127 = vmatprep.subr.bf16.mxu1 %v7126_v2  ;;  %5226 = vmatprep.mubr.f32.mxu0 %v10222_v48  ;;  %v10790_v2 = vld [vmem:[#allocation28_spill] sm:$0xff] }
 0x1d3   : > { %5230 = vmatmul.mubr.f32.gmra.mrb[14].mxu0 %v10763_v8  ;;  %5986 = vmatprep.mubr.f32.mxu1 %v10222_v48 }
 0x1d4   : > { %7033 = vmatpush1.bf16.msra.mxu0 %v7032_v30  ;;  %5990 = vmatmul.mubr.f32.gmra.mrb[14].mxu1 %v10766_v10 }
 0x1d5   : > { %7129 = vmatpush1.bf16.msra.mxu1 %v7128_v41  ;;  %7035 = vmatprep.subr.bf16.mxu0 %v7034_v53 }
 0x1d6   : > { %7131 = vmatprep.subr.bf16.mxu1 %v7130_v25  ;;  %5354 = vmatprep.mubr.f32.mxu0 %v10222_v48 }
 0x1d7   : > { %6114 = vmatprep.mubr.f32.mxu1 %v10222_v48 }
 0x1d8   : > { %7037 = vmatpush1.bf16.msra.mxu0 %v7036_v3 }
 0x1d9   : > { %7133 = vmatpush1.bf16.msra.mxu1 %v7132_v39  ;;  %7039 = vmatprep.subr.bf16.mxu0 %v7038_v63 }
 0x1da   : > { %7135 = vmatprep.subr.bf16.mxu1 %v7134_v27 }
 0x1dc   : > { %7041 = vmatpush1.bf16.msra.mxu0 %v7040_v18 }
 0x1dd   : > { %7137 = vmatpush1.bf16.msra.mxu1 %v7136_v34  ;;  %5303 = vmatprep.subr.mxu0 %v10777_v6 }
 0x1de   : > { %6063 = vmatprep.subr.mxu1 %v10778_v29 }
 0x1e0   : > { %5307 = vmatpush1.msra.mxu0 %v10779_v43 }
 0x1e1   : > { %7043 = vmatprep.subr.bf16.mxu0 %v10718_v49  ;;  %6067 = vmatpush1.msra.mxu1 %v10780_v32  ;;  %v10782_v49 = vld [vmem:[#allocation35_spill] sm:$0xff] }
 0x1e2   : > { %5356 = vmatmul.mubr.f32.vlgmr.msra.gmra.mrb[12].mxu0 %v10711_v13  ;;  %7139 = vmatprep.subr.bf16.mxu1 %v10720_v54  ;;  %v2414_v14 = vpop.f32.mrb[4].mxu0 }
 0x1e3   : > { %7045 = vmatpush1.bf16.msra.mxu0 %v10721_v7  ;;  %6116 = vmatmul.mubr.f32.vlgmr.msra.gmra.mrb[12].mxu1 %v9416_v45  ;;  %6330 = vst [vmem:[%s9276_s15 + $0x40] sm:$0xff] %v2414_v14  ;;  %v2416_v42 = vpop.f32.mrb[5].mxu0  ;;  %v3174_v16 = vpop.f32.mrb[4].mxu1 }
 0x1e4   : > { %7141 = vmatpush1.bf16.msra.mxu1 %v10723_v52  ;;  %7047 = vmatprep.subr.bf16.mxu0 %v10724_v20  ;;  %6331 = vst [vmem:[%s9276_s15 + $0x48] sm:$0xff] %v2416_v42  ;;  %6338 = vst [vmem:[%s9276_s15 + $0x60] sm:$0xff] %v3174_v16  ;;  %v3176_v5 = vpop.f32.mrb[5].mxu1  ;;  %v10783_v52 = vld [vmem:[#allocation26_spill] sm:$0xff] }
 0x1e5   : > { %7143 = vmatprep.subr.bf16.mxu1 %v10725_v28  ;;  %5361 = vmatprep.mubr.f32.mxu0 %v10222_v48  ;;  %6339 = vst [vmem:[%s9276_s15 + $0x68] sm:$0xff] %v3176_v5  ;;  %v10784_v28 = vld [vmem:[#allocation36_spill] sm:$0xff] }
 0x1e6   : > { %5363 = vmatmul.mubr.f32.gmra.mrb[14].mxu0 %v10712_v40  ;;  %6121 = vmatprep.mubr.f32.mxu1 %v10222_v48  ;;  %v2421_v9 = vpop.f32.mrb[6].mxu0 }
 0x1e7   : > { %7049 = vmatpush1.bf16.msra.mxu0 %v10727_v17  ;;  %6123 = vmatmul.mubr.f32.gmra.mrb[14].mxu1 %v10715_v58  ;;  %6332 = vst [vmem:[%s9276_s15 + $0x50] sm:$0xff] %v2421_v9  ;;  %v2423_v54 = vpop.f32.mrb[7].mxu0  ;;  %v3181_v7 = vpop.f32.mrb[6].mxu1  ;;  %v10785_v17 = vld [vmem:[#allocation17_spill] sm:$0xff] }
 0x1e8   : > { %7145 = vmatpush1.bf16.msra.mxu1 %v10781_v38  ;;  %7051 = vmatprep.subr.bf16.mxu0 %v10782_v49  ;;  %6333 = vst [vmem:[%s9276_s15 + $0x58] sm:$0xff] %v2423_v54  ;;  %6340 = vst [vmem:[%s9276_s15 + $0x70] sm:$0xff] %v3181_v7  ;;  %v3183_v20 = vpop.f32.mrb[7].mxu1 }
 0x1e9   : > { %7147 = vmatprep.subr.bf16.mxu1 %v10783_v52  ;;  %5451 = vmatprep.mubr.f32.mxu0 %v10222_v48  ;;  %6341 = vst [vmem:[%s9276_s15 + $0x78] sm:$0xff] %v3183_v20 }
 0x1ea   : > { %6211 = vmatprep.mubr.f32.mxu1 %v10222_v48 }
 0x1eb   : > { %7053 = vmatpush1.bf16.msra.mxu0 %v10784_v28 }
 0x1ec   : > { %7149 = vmatpush1.bf16.msra.mxu1 %v10785_v17  ;;  %7055 = vmatprep.subr.bf16.mxu0 %v10786_v46 }
 0x1ed   : > { %7151 = vmatprep.subr.bf16.mxu1 %v10787_v37 }
 0x1ef   : > { %7057 = vmatpush1.bf16.msra.mxu0 %v10788_v61 }
 0x1f0   : > { %7153 = vmatpush1.bf16.msra.mxu1 %v10789_v1  ;;  %5402 = vmatprep.subr.mxu0 %v10790_v2 }
 0x1f1   : > { %6162 = vmatprep.subr.mxu1 %v10740_v59 }
 0x1f3   : > { %5404 = vmatpush1.msra.mxu0 %v10745_v56 }
 0x1f4   : > { %5453 = vmatmul.mubr.f32.vlgmr.msra.gmra.mrb[12].mxu0 %v10711_v13  ;;  %6164 = vmatpush1.msra.mxu1 %v10750_v60 }
 0x1f5   : > { %6213 = vmatmul.mubr.f32.vlgmr.msra.gmra.mrb[12].mxu1 %v9416_v45  ;;  %5458 = vmatprep.mubr.f32.mxu0 %v10222_v48 }
 0x1f6   : > { %6218 = vmatprep.mubr.f32.mxu1 %v10222_v48 }
 0x1f8   : > { %5460 = vmatmul.mubr.f32.gmra.mrb[14].mxu0 %v10712_v40 }
 0x1f9   : > { %6220 = vmatmul.mubr.f32.gmra.mrb[14].mxu1 %v10715_v58 }
 0x255   : > { %v3934_v59 = vpop.f32.mrb[8].mxu0 }
 0x256   : > { %6346 = vst [vmem:[%s9276_s15 + $0x80] sm:$0xff] %v3934_v59  ;;  %v3936_v56 = vpop.f32.mrb[9].mxu0  ;;  %v4694_v13 = vpop.f32.mrb[8].mxu1 }
 0x257   : > { %6347 = vst [vmem:[%s9276_s15 + $0x88] sm:$0xff] %v3936_v56  ;;  %6354 = vst [vmem:[%s9276_s15 + $0xa0] sm:$0xff] %v4694_v13  ;;  %v4696_v45 = vpop.f32.mrb[9].mxu1 }
 0x258   : > { %6355 = vst [vmem:[%s9276_s15 + $0xa8] sm:$0xff] %v4696_v45 }
 0x259   : > { %v3941_v60 = vpop.f32.mrb[10].mxu0 }
 0x25a   : > { %6348 = vst [vmem:[%s9276_s15 + $0x90] sm:$0xff] %v3941_v60  ;;  %v3943_v48 = vpop.f32.mrb[11].mxu0  ;;  %v4701_v40 = vpop.f32.mrb[10].mxu1 }
 0x25b   : > { %6349 = vst [vmem:[%s9276_s15 + $0x98] sm:$0xff] %v3943_v48  ;;  %6356 = vst [vmem:[%s9276_s15 + $0xb0] sm:$0xff] %v4701_v40  ;;  %v4703_v58 = vpop.f32.mrb[11].mxu1 }
 0x25c   : > { %6357 = vst [vmem:[%s9276_s15 + $0xb8] sm:$0xff] %v4703_v58 }
 0x2c7   : > { %v5454_v51 = vpop.f32.mrb[12].mxu0 }
 0x2c8   : > { %6362 = vst [vmem:[%s9276_s15 + $0xc0] sm:$0xff] %v5454_v51  ;;  %v5456_v15 = vpop.f32.mrb[13].mxu0  ;;  %v6214_v4 = vpop.f32.mrb[12].mxu1 }
 0x2c9   : > { %6363 = vst [vmem:[%s9276_s15 + $0xc8] sm:$0xff] %v5456_v15  ;;  %6370 = vst [vmem:[%s9276_s15 + $0xe0] sm:$0xff] %v6214_v4  ;;  %v6216_v57 = vpop.f32.mrb[13].mxu1 }
 0x2ca   : > { %6371 = vst [vmem:[%s9276_s15 + $0xe8] sm:$0xff] %v6216_v57 }
 0x2cb   : > { %v5461_v30 = vpop.f32.mrb[14].mxu0 }
 0x2cc   : > { %6364 = vst [vmem:[%s9276_s15 + $0xd0] sm:$0xff] %v5461_v30  ;;  %v5463_v44 = vpop.f32.mrb[15].mxu0  ;;  %v6221_v35 = vpop.f32.mrb[14].mxu1 }
 0x2cd   : > { %6365 = vst [vmem:[%s9276_s15 + $0xd8] sm:$0xff] %v5463_v44  ;;  %6372 = vst [vmem:[%s9276_s15 + $0xf0] sm:$0xff] %v6221_v35  ;;  %v6223_v41 = vpop.f32.mrb[15].mxu1 }
 0x2ce   : > { %6373 = vst [vmem:[%s9276_s15 + $0xf8] sm:$0xff] %v6223_v41 }
 0x2cf PF: > { %s12_s9 = sadd.s32 1, %s7329_s9  }
 0x2d0   : > { %p9_p4 = scmp.ge.s32.totalorder %s12_s9, 6  }
 0x2d2   :  { %11 = sbr.rel (!%p9_p4) target bundleno = 1 (0x1), region = 80 }

</bundles_post_ra>
